<compile_context>
chip_gen: v7x
topology: tpu7x:2x2x1
jax: 0.10.0
libtpu: 0.0.40
codegen_flags: <defaults>
</compile_context>

<pallas_src>
import functools

import jax
import jax.numpy as jnp
from jax.experimental import pallas as pl
from jax.experimental.pallas import tpu as pltpu


def _round_up(x, m):
    return ((x + m - 1) // m) * m


# ----------------------------------------------------------------------------
# Pallas kernel: species-weighted product basis + channel mixing + residual
# ----------------------------------------------------------------------------
def _interaction_kernel(attrs_ref, feats_ref, *rest, f_in, f_out, t_out, n_l,
                        corr, n_species, use_sc, per_rank, species_mac,
                        dot_dtype):
    if use_sc:
        sc_ref, wprod_ref, wmix_ref, out_ref = rest
    else:
        wprod_ref, wmix_ref, out_ref = rest

    # --- species weights for all correlation orders -------------------------
    if species_mac:
        # Few species: unrolled VPU broadcast multiply-adds (no K=4 matmul,
        # keeps the MXU push/pop path free for the real matmul).
        attrs = attrs_ref[...].astype(jnp.float32)            # [tn, S]
        wprod = wprod_ref[...].astype(jnp.float32)            # [S, corr*F_in]
        w_all = attrs[:, 0:1] * wprod[0:1, :]
        for s in range(1, n_species):
            w_all = w_all + attrs[:, s:s + 1] * wprod[s:s + 1, :]
    else:
        w_all = jnp.dot(attrs_ref[...], wprod_ref[...],
                        preferred_element_type=jnp.float32)   # [tn, corr*F_in]

    # --- scalar-path symmetric-contraction recursion (f32 on the VPU) -------
    # Higher-rank components enter the recursion linearly, so the recursion is
    # carried on the [tn, F_in] coefficient h and applied per component below
    # (mathematically identical to the per-component recursion).
    feats = feats_ref[...].astype(jnp.float32)                # [tn, T_out*F_in]
    x0 = feats[:, 0:f_in]
    h = w_all[:, (corr - 1) * f_in: corr * f_in]
    for nu in range(corr - 2, -1, -1):
        h = (h + w_all[:, nu * f_in:(nu + 1) * f_in]) * x0

    # --- per-rank linear channel mixing --------------------------------------
    if per_rank:
        # Production-size path (v7x): one [tn,F_in]x[F_in,F_out] matmul per
        # component; no zero-padded block-diagonal weight resident in VMEM.
        outs = []
        comp = 0
        for l in range(n_l):
            wl = wmix_ref[l * f_in:(l + 1) * f_in, :].astype(dot_dtype)
            for _ in range(3 ** l):
                bt = h * feats[:, comp * f_in:(comp + 1) * f_in]
                outs.append(jnp.dot(bt.astype(dot_dtype), wl,
                                    preferred_element_type=jnp.float32))
                comp += 1
        y = jnp.concatenate(outs, axis=1)                     # [tn, T_out*F_out]
    else:
        # Small-size path: ONE fused block-diagonal matmul; h is folded into
        # each component slice (no lane-replicated tile(h) temp).
        b_slices = [h * feats[:, t * f_in:(t + 1) * f_in] for t in range(t_out)]
        b = jnp.concatenate(b_slices, axis=1).astype(dot_dtype)
        y = jnp.dot(b, wmix_ref[...].astype(dot_dtype),
                    preferred_element_type=jnp.float32)

    if use_sc:
        y = y + sc_ref[...].astype(jnp.float32)
    out_ref[...] = y.astype(out_ref.dtype)


# ----------------------------------------------------------------------------
# Wrapper
# ----------------------------------------------------------------------------
def interaction_layer(node_feats, sc, node_attrs, w_prod, w_lin, *,
                      l_max_target, use_sc=True, tile_n=None,
                      stream_dtype=jnp.bfloat16, mix_mode="auto",
                      species_mode="auto"):
    n, t_in, f_in = node_feats.shape
    _, n_species = node_attrs.shape
    corr = w_prod.shape[0]
    n_l, f_in_w, f_out = w_lin.shape
    t_out = sum(3 ** l for l in range(l_max_target + 1))
    assert n_l == l_max_target + 1 and f_in_w == f_in
    # NOTE: assumes component-major [t, f] node-feature layout where the first
    # T_out components are the target ranks (rank 0 first).
    assert t_out <= t_in

    use_sc = bool(use_sc) and sc is not None
    stream_dtype = jnp.dtype(stream_dtype)
    dot_dtype = jnp.bfloat16 if stream_dtype == jnp.bfloat16 else jnp.float32

    # ---- wrapper-side layout plumbing (cheap; fuses with upstream casts) ----
    # Stream only the components the kernel actually reads.
    feats = (node_feats[:, :t_out, :]
             .reshape(n, t_out * f_in).astype(stream_dtype))
    attrs = node_attrs.astype(stream_dtype)       # one-hot -> exact in bf16

    # Packed species-weight table: [S, corr*F_in].
    wprod_packed = jnp.transpose(w_prod, (1, 0, 2)).reshape(
        n_species, corr * f_in).astype(stream_dtype)

    if mix_mode == "auto":
        blockdiag_bytes = (t_out * f_in) * (t_out * f_out) * stream_dtype.itemsize
        mix_mode = "blockdiag" if blockdiag_bytes <= (1 << 20) else "per_rank"
    per_rank = (mix_mode == "per_rank")

    if per_rank:
        w_mix = w_lin.reshape(n_l * f_in, f_out).astype(stream_dtype)
    else:
        w_big = jnp.zeros((t_out * f_in, t_out * f_out), dtype=jnp.float32)
        t = 0
        for l in range(n_l):
            wl = w_lin[l].astype(jnp.float32)
            for _ in range(3 ** l):
                w_big = w_big.at[t * f_in:(t + 1) * f_in,
                                 t * f_out:(t + 1) * f_out].set(wl)
                t += 1
        w_mix = w_big.astype(stream_dtype)

    if species_mode == "auto":
        species_mode = "mac" if n_species <= 8 else "matmul"
    species_mac = (species_mode == "mac")

    # ---- node tiling: no wrapper-side padding; ragged last block is safe
    #      because rows are independent and OOB rows are masked on store ------
    if tile_n is None:
        if n >= (1 << 15):
            tile_n = 2048
        elif n >= (1 << 13):
            tile_n = 1024
        elif n >= (1 << 11):
            tile_n = 512
        else:
            tile_n = 256
    tile_n = int(tile_n)
    if tile_n >= n:
        tile_n = n                       # single block == full node axis
    else:
        tile_n = max(8, (tile_n // 8) * 8)
    grid = (pl.cdiv(n, tile_n),)

    operands = [attrs, feats]
    in_specs = [
        pl.BlockSpec((tile_n, n_species), lambda i: (i, 0)),
        pl.BlockSpec((tile_n, t_out * f_in), lambda i: (i, 0)),
    ]
    if use_sc:
        sc_flat = sc.reshape(n, t_out * f_out).astype(stream_dtype)
        operands.append(sc_flat)
        in_specs.append(pl.BlockSpec((tile_n, t_out * f_out), lambda i: (i, 0)))
    operands += [wprod_packed, w_mix]
    in_specs += [
        pl.BlockSpec(wprod_packed.shape, lambda i: (0, 0)),
        pl.BlockSpec(w_mix.shape, lambda i: (0, 0)),
    ]

    # Scoped-VMEM estimate (double-buffered streams + resident weights + temps).
    itm = stream_dtype.itemsize
    blk_in = tile_n * (n_species + t_out * f_in
                       + (t_out * f_out if use_sc else 0)) * itm
    blk_out = tile_n * t_out * f_out * 4
    w_bytes = (wprod_packed.size + w_mix.size) * itm
    est = 2 * (blk_in + blk_out) + w_bytes \
        + 6 * tile_n * t_out * max(f_in, f_out) * 4
    cp = dict(dimension_semantics=("parallel",))
    if est > (12 << 20):
        cp["vmem_limit_bytes"] = int(min(100 << 20, 2 * est))

    kernel = functools.partial(
        _interaction_kernel, f_in=f_in, f_out=f_out, t_out=t_out, n_l=n_l,
        corr=corr, n_species=n_species, use_sc=use_sc, per_rank=per_rank,
        species_mac=species_mac, dot_dtype=dot_dtype)

    out_flat = pl.pallas_call(
        kernel,
        out_shape=jax.ShapeDtypeStruct((n, t_out * f_out), jnp.float32),
        grid_spec=pltpu.PrefetchScalarGridSpec(
            num_scalar_prefetch=0,
            grid=grid,
            in_specs=in_specs,
            out_specs=pl.BlockSpec((tile_n, t_out * f_out), lambda i: (i, 0)),
        ),
        compiler_params=pltpu.CompilerParams(**cp),
    )(*operands)

    return out_flat.reshape(n, t_out, f_out)


# ----------------------------------------------------------------------------
# Pure-JAX reference (same math, no Pallas)
# ----------------------------------------------------------------------------
def interaction_layer_ref(node_feats, sc, node_attrs, w_prod, w_lin,
                          *, l_max_target, use_sc=True):
    t_out = sum(3 ** l for l in range(l_max_target + 1))
    x0 = node_feats[:, 0, :]
    xt = node_feats[:, :t_out, :]
    corr = w_prod.shape[0]

    w = node_attrs @ w_prod[corr - 1]
    b = w[:, None, :] * xt
    for nu in range(corr - 2, -1, -1):
        w = node_attrs @ w_prod[nu]
        b = (b + w[:, None, :] * xt) * x0[:, None, :]

    outs, offset = [], 0
    for l in range(l_max_target + 1):
        ncomp = 3 ** l
        outs.append(jnp.einsum('ncf,fo->nco',
                               b[:, offset:offset + ncomp, :], w_lin[l]))
        offset += ncomp
    out = jnp.concatenate(outs, axis=1)
    if use_sc and sc is not None:
        out = out + sc
    return out


# ----------------------------------------------------------------------------
# Demo / self-test
# ----------------------------------------------------------------------------
if __name__ == "__main__":
    l_max_node_feats = 2          # T_in  = 1 + 3 + 9 = 13
    l_max_target_feats = 1        # T_out = 1 + 3      = 4
    in_features = 16
    out_features = 32
    n_species = 4
    correlation = 3

    n_nodes = 500                 # deliberately NOT a multiple of tile_n
    t_in = sum(3 ** l for l in range(l_max_node_feats + 1))
    t_out = sum(3 ** l for l in range(l_max_target_feats + 1))

    key = jax.random.PRNGKey(0)
    k_feats, k_sc, k_spec, k_wp, k_wl = jax.random.split(key, 5)

    node_feats = jax.random.normal(k_feats, (n_nodes, t_in, in_features),
                                   dtype=jnp.float32)
    sc = jax.random.normal(k_sc, (n_nodes, t_out, out_features),
                           dtype=jnp.float32)
    species = jax.random.randint(k_spec, (n_nodes,), 0, n_species)
    node_attrs = jax.nn.one_hot(species, n_species, dtype=jnp.float32)

    w_prod = (jax.random.normal(k_wp, (correlation, n_species, in_features),
                                dtype=jnp.float32)
              / jnp.sqrt(jnp.float32(n_species)))
    w_lin = (jax.random.normal(k_wl, (l_max_target_feats + 1, in_features,
                                      out_features), dtype=jnp.float32)
             / jnp.sqrt(jnp.float32(in_features)))

    ref = interaction_layer_ref(node_feats, sc, node_attrs, w_prod, w_lin,
                                l_max_target=l_max_target_feats, use_sc=True)
    ref_nosc = interaction_layer_ref(node_feats, None, node_attrs, w_prod,
                                     w_lin, l_max_target=l_max_target_feats,
                                     use_sc=False)

    # 1) strict f32 path (fused block-diagonal mixing).
    out_f32 = jax.block_until_ready(
        interaction_layer(node_feats, sc, node_attrs, w_prod, w_lin,
                          l_max_target=l_max_target_feats, use_sc=True,
                          stream_dtype=jnp.float32))
    assert out_f32.shape == (n_nodes, t_out, out_features)
    assert jnp.allclose(out_f32, ref, atol=1e-4, rtol=1e-4), \
        "mismatch vs reference (f32 / blockdiag)"

    # 2) strict f32 path, per-rank mixing (the production-size / v7x branch).
    out_pr = jax.block_until_ready(
        interaction_layer(node_feats, sc, node_attrs, w_prod, w_lin,
                          l_max_target=l_max_target_feats, use_sc=True,
                          stream_dtype=jnp.float32, mix_mode="per_rank"))
    assert jnp.allclose(out_pr, ref, atol=1e-4, rtol=1e-4), \
        "mismatch vs reference (f32 / per_rank)"

    # 3) strict f32 path, one-hot species matmul branch (many-species fallback).
    out_mm = jax.block_until_ready(
        interaction_layer(node_feats, sc, node_attrs, w_prod, w_lin,
                          l_max_target=l_max_target_feats, use_sc=True,
                          stream_dtype=jnp.float32, species_mode="matmul"))
    assert jnp.allclose(out_mm, ref, atol=1e-4, rtol=1e-4), \
        "mismatch vs reference (f32 / species matmul)"

    # 4) default performance path: bf16 streaming (sanity vs f32 reference).
    out_bf16 = jax.block_until_ready(
        interaction_layer(node_feats, sc, node_attrs, w_prod, w_lin,
                          l_max_target=l_max_target_feats, use_sc=True))
    assert jnp.allclose(out_bf16, ref, atol=3e-1, rtol=1e-1), \
        "mismatch vs reference (bf16)"

    # 5) no-residual path: no sc stream is materialized or DMA'd.
    out_nosc = jax.block_until_ready(
        interaction_layer(node_feats, None, node_attrs, w_prod, w_lin,
                          l_max_target=l_max_target_feats, use_sc=False))
    assert jnp.allclose(out_nosc, ref_nosc, atol=3e-1, rtol=1e-1), \
        "mismatch vs reference (bf16, use_sc=False)"

    print("KERNEL_OK")
</pallas_src>

<mosaic_0001>
module attributes {stable_mosaic.version = 11 : i64} {
  func.func @_interaction_kernel(%arg0: i32, %arg1: memref<256x4xf32, #tpu.memory_space<vmem>>, %arg2: memref<256x64xf32, #tpu.memory_space<vmem>>, %arg3: memref<256x128xf32, #tpu.memory_space<vmem>>, %arg4: memref<4x48xf32, #tpu.memory_space<vmem>>, %arg5: memref<64x128xf32, #tpu.memory_space<vmem>>, %arg6: memref<256x128xf32, #tpu.memory_space<vmem>>) attributes {dimension_semantics = [#tpu.dimension_semantics<parallel>], iteration_bounds = array<i64: 2>, scalar_prefetch = 0 : i64, scratch_operands = 0 : i64, tpu.core_type = #tpu.core_type<tc>, window_params = [{transform_indices = @transform_0, window_bounds = array<i64: 256, 4>}, {transform_indices = @transform_1, window_bounds = array<i64: 256, 64>}, {transform_indices = @transform_2, window_bounds = array<i64: 256, 128>}, {pipeline_mode = #tpu.pipeline_mode<synchronous>, transform_indices = @transform_3, window_bounds = array<i64: 4, 48>}, {pipeline_mode = #tpu.pipeline_mode<synchronous>, transform_indices = @transform_4, window_bounds = array<i64: 64, 128>}, {transform_indices = @transform_5, window_bounds = array<i64: 256, 128>}]} {
    %c0 = arith.constant 0 : index
    %c0_0 = arith.constant 0 : index
    %0 = vector.load %arg1[%c0, %c0_0] : memref<256x4xf32, #tpu.memory_space<vmem>>, vector<256x4xf32>
    %c0_1 = arith.constant 0 : index
    %c0_2 = arith.constant 0 : index
    %1 = vector.load %arg4[%c0_1, %c0_2] : memref<4x48xf32, #tpu.memory_space<vmem>>, vector<4x48xf32>
    %2 = vector.extract_strided_slice %0 {offsets = [0, 0], sizes = [256, 1], strides = [1, 1]} : vector<256x4xf32> to vector<256x1xf32>
    %3 = vector.extract_strided_slice %1 {offsets = [0, 0], sizes = [1, 48], strides = [1, 1]} : vector<4x48xf32> to vector<1x48xf32>
    %4 = vector.broadcast %2 : vector<256x1xf32> to vector<256x48xf32>
    %5 = vector.broadcast %3 : vector<1x48xf32> to vector<256x48xf32>
    %6 = arith.mulf %4, %5 : vector<256x48xf32>
    %7 = vector.extract_strided_slice %0 {offsets = [0, 1], sizes = [256, 1], strides = [1, 1]} : vector<256x4xf32> to vector<256x1xf32>
    %8 = vector.extract_strided_slice %1 {offsets = [1, 0], sizes = [1, 48], strides = [1, 1]} : vector<4x48xf32> to vector<1x48xf32>
    %9 = vector.broadcast %7 : vector<256x1xf32> to vector<256x48xf32>
    %10 = vector.broadcast %8 : vector<1x48xf32> to vector<256x48xf32>
    %11 = arith.mulf %9, %10 : vector<256x48xf32>
    %12 = arith.addf %6, %11 : vector<256x48xf32>
    %13 = vector.extract_strided_slice %0 {offsets = [0, 2], sizes = [256, 1], strides = [1, 1]} : vector<256x4xf32> to vector<256x1xf32>
    %14 = vector.extract_strided_slice %1 {offsets = [2, 0], sizes = [1, 48], strides = [1, 1]} : vector<4x48xf32> to vector<1x48xf32>
    %15 = vector.broadcast %13 : vector<256x1xf32> to vector<256x48xf32>
    %16 = vector.broadcast %14 : vector<1x48xf32> to vector<256x48xf32>
    %17 = arith.mulf %15, %16 : vector<256x48xf32>
    %18 = arith.addf %12, %17 : vector<256x48xf32>
    %19 = vector.extract_strided_slice %0 {offsets = [0, 3], sizes = [256, 1], strides = [1, 1]} : vector<256x4xf32> to vector<256x1xf32>
    %20 = vector.extract_strided_slice %1 {offsets = [3, 0], sizes = [1, 48], strides = [1, 1]} : vector<4x48xf32> to vector<1x48xf32>
    %21 = vector.broadcast %19 : vector<256x1xf32> to vector<256x48xf32>
    %22 = vector.broadcast %20 : vector<1x48xf32> to vector<256x48xf32>
    %23 = arith.mulf %21, %22 : vector<256x48xf32>
    %24 = arith.addf %18, %23 : vector<256x48xf32>
    %c0_3 = arith.constant 0 : index
    %c0_4 = arith.constant 0 : index
    %25 = vector.load %arg2[%c0_3, %c0_4] : memref<256x64xf32, #tpu.memory_space<vmem>>, vector<256x64xf32>
    %26 = vector.extract_strided_slice %25 {offsets = [0, 0], sizes = [256, 16], strides = [1, 1]} : vector<256x64xf32> to vector<256x16xf32>
    %27 = vector.extract_strided_slice %24 {offsets = [0, 32], sizes = [256, 16], strides = [1, 1]} : vector<256x48xf32> to vector<256x16xf32>
    %28 = vector.extract_strided_slice %24 {offsets = [0, 16], sizes = [256, 16], strides = [1, 1]} : vector<256x48xf32> to vector<256x16xf32>
    %29 = arith.addf %27, %28 : vector<256x16xf32>
    %30 = arith.mulf %29, %26 : vector<256x16xf32>
    %31 = vector.extract_strided_slice %24 {offsets = [0, 0], sizes = [256, 16], strides = [1, 1]} : vector<256x48xf32> to vector<256x16xf32>
    %32 = arith.addf %30, %31 : vector<256x16xf32>
    %33 = arith.mulf %32, %26 : vector<256x16xf32>
    %34 = vector.extract_strided_slice %25 {offsets = [0, 0], sizes = [256, 16], strides = [1, 1]} : vector<256x64xf32> to vector<256x16xf32>
    %35 = arith.mulf %33, %34 : vector<256x16xf32>
    %36 = vector.extract_strided_slice %25 {offsets = [0, 16], sizes = [256, 16], strides = [1, 1]} : vector<256x64xf32> to vector<256x16xf32>
    %37 = arith.mulf %33, %36 : vector<256x16xf32>
    %38 = vector.extract_strided_slice %25 {offsets = [0, 32], sizes = [256, 16], strides = [1, 1]} : vector<256x64xf32> to vector<256x16xf32>
    %39 = arith.mulf %33, %38 : vector<256x16xf32>
    %40 = vector.extract_strided_slice %25 {offsets = [0, 48], sizes = [256, 16], strides = [1, 1]} : vector<256x64xf32> to vector<256x16xf32>
    %41 = arith.mulf %33, %40 : vector<256x16xf32>
    %42 = tpu.concatenate %35, %37, %39, %41 in 1 : vector<256x16xf32>, vector<256x16xf32>, vector<256x16xf32>, vector<256x16xf32> -> vector<256x64xf32>
    %c0_5 = arith.constant 0 : index
    %c0_6 = arith.constant 0 : index
    %43 = vector.load %arg5[%c0_5, %c0_6] : memref<64x128xf32, #tpu.memory_space<vmem>>, vector<64x128xf32>
    %cst = arith.constant dense<0.000000e+00> : vector<256x128xf32>
    %44 = tpu.matmul %42, %43, %cst {dimension_numbers = #tpu.dot_dimension_numbers<[1], [0], [0], [1], [0, 0, 1, 1], [], []>} : vector<256x64xf32>, vector<64x128xf32>, vector<256x128xf32> -> vector<256x128xf32>
    %c0_7 = arith.constant 0 : index
    %c0_8 = arith.constant 0 : index
    %45 = vector.load %arg3[%c0_7, %c0_8] : memref<256x128xf32, #tpu.memory_space<vmem>>, vector<256x128xf32>
    %46 = arith.addf %44, %45 : vector<256x128xf32>
    %c0_9 = arith.constant 0 : index
    %c0_10 = arith.constant 0 : index
    %47 = vector.load %arg6[%c0_9, %c0_10] : memref<256x128xf32, #tpu.memory_space<vmem>>, vector<256x128xf32>
    tpu.vector_store %arg6[%c0_9, %c0_10], %46 {strides = array<i32>} : memref<256x128xf32, #tpu.memory_space<vmem>>, vector<256x128xf32>,
    return
  }
  func.func @transform_0(%arg0: i32) -> (i32, i32) {
    %c0_i32 = arith.constant 0 : i32
    %c0_i32_0 = arith.constant 0 : i32
    return %arg0, %c0_i32 : i32, i32
  }
  func.func @transform_1(%arg0: i32) -> (i32, i32) {
    %c0_i32 = arith.constant 0 : i32
    %c0_i32_0 = arith.constant 0 : i32
    return %arg0, %c0_i32 : i32, i32
  }
  func.func @transform_2(%arg0: i32) -> (i32, i32) {
    %c0_i32 = arith.constant 0 : i32
    %c0_i32_0 = arith.constant 0 : i32
    return %arg0, %c0_i32 : i32, i32
  }
  func.func @transform_3(%arg0: i32) -> (i32, i32) {
    %c0_i32 = arith.constant 0 : i32
    %c0_i32_0 = arith.constant 0 : i32
    %c0_i32_1 = arith.constant 0 : i32
    return %c0_i32, %c0_i32_0 : i32, i32
  }
  func.func @transform_4(%arg0: i32) -> (i32, i32) {
    %c0_i32 = arith.constant 0 : i32
    %c0_i32_0 = arith.constant 0 : i32
    %c0_i32_1 = arith.constant 0 : i32
    return %c0_i32, %c0_i32_0 : i32, i32
  }
  func.func @transform_5(%arg0: i32) -> (i32, i32) {
    %c0_i32 = arith.constant 0 : i32
    %c0_i32_0 = arith.constant 0 : i32
    return %arg0, %c0_i32 : i32, i32
  }
}

</mosaic_0001>

<bundles_post_ra>
// kernel: tpu_custom_call.1
= control target key start
LH: loop header
LB: loop body
LE: loop exit
PB: predicated region body
PF: predicated region fallthrough
CT: control target
= control target key end

     0   :  { %10 = vsyncpa [#allocation3], 0  ;;  %s5715_s0 = inlined_call_operand.vmem [shape: f32[500,4], index: 0, kind: input, shape index: {}]   ;;  %s5716_s1 = inlined_call_operand.vmem [shape: f32[500,64], index: 1, kind: input, shape index: {}]   ;;  %s5717_s2 = inlined_call_operand.vmem [shape: f32[500,128], index: 2, kind: input, shape index: {}]   ;;  %s5718_s3 = inlined_call_operand.vmem [shape: f32[4,48], index: 3, kind: input, shape index: {}]   ;;  %s5719_s4 = inlined_call_operand.vmem [shape: f32[64,128], index: 4, kind: input, shape index: {}]   ;;  %s5720_s5 = inlined_call_operand.hbm [shape: f32[500,128], index: 5, kind: output, shape index: {}]  }
   0x1   :  { %12 = vsyncpa [#allocation3 + $0x1], 0  ;;  %s3340_s18 = smov 0   ;;  %s3342_s19 = smov 0  }
   0x2   :  { %s3344_s20 = smov 0   ;;  %s3346_s21 = smov 0  }
   0x3 LB: > { %s3361_s22 = sadd.s32 4294967295, %s3297_s21   ;;  %s2966_s23 = sadd.s32 4294967294, %s3297_s21   ;;  %s3297_s21 = sphi %s3346_s21, %s6062_s21   ;;  %s3293_s20 = sphi %s3344_s20, %s6061_s20   ;;  %s3289_s19 = sphi %s3342_s19, %s6060_s19   ;;  %s3285_s18 = sphi %s3340_s18, %s6059_s18  }
   0x4   : > { %s3365_s24 = sadd.s32 1, %s3297_s21   ;;  %s145_s25 = sadd.s32 1, %s3293_s20 }
   0x5   : > { %s142_s26 = ssub.s32 %s3297_s21, %s3365_s24  ;;  %p155_p0 = scmp.ne.s32.totalorder %s3293_s20, %s3289_s19 }
   0x6   : > { %p143_p1 = scmp.eq.s32.totalorder %s142_s26, 0  ;;  %p156_p2 = scmp.eq.s32.totalorder %s3361_s22, 1 }
   0x7   : > { %p161_p3 = scmp.ne.s32.totalorder %s3289_s19, %s3285_s18  ;;  %p162_p4 = scmp.eq.s32.totalorder %s2966_s23, 1 }
   0x8   : > { %s3376_s27 = scalar_select %p143_p1, %s3293_s20, %s145_s25  }
   0x9   : > { %p3378_p5 = por %p156_p2, %p155_p0  ;;  %p3382_p6 = por %p162_p4, %p161_p3 }
   0xa   : > { %p2969_p7 = scmp.ge.s32.totalorder %s3297_s21, 1  ;;  %p237_p8 = scmp.lt.s32.totalorder %s3297_s21, 3 }
   0xc   : > { %p238_p9 = pnand %p2969_p7, %p237_p8 }
   0xe   : > { %241 = sbr.rel (%p238_p9) target bundleno = 1229 (0x4cd), region = 40 }
  0x15   : > { %s3389_s30 = sshll.u32 %s3361_s22, 5  ;;  %v3299_v0 = vmov 0   ;;  %v3300_v33 = vmov 1   ;;  %v3301_v36 = vmov 2   ;;  %s3303_s13 = smov 16   ;;  %vm2367_vm0 = vcmask 130048  }
  0x16   : > { %3196 = vset.pattern.permute.xlu1 %v3299_v0  ;;  %3195 = vset.pattern.permute.xlu0 %v3299_v0  ;;  %p292_p10 = scmp.lt.s32.totalorder %s3389_s30, 62  ;;  %s3304_s17 = smov 32   ;;  %vm2400_vm1 = vcmask 261120   ;;  %vm2433_vm2 = vcmask 392192   ;;  %vm2506_vm3 = vcmask 523264  }
  0x17   : > { %s3305_s23 = smov 112   ;;  %s3306_s26 = smov 96  }
  0x18   : > { %s293_s6 = scalar_select %p292_p10, %s3389_s30, 62 }
  0x19   : > { %s2869_s15 = ssub.s32 (%p3378_p5), 63, %s3389_s30 }
  0x1a   : > { %s3393_s7 = sshll.u32 %s293_s6, 3  ;;  %p2870_p11 = scmp.lt.s32.totalorder (%p3378_p5), %s2869_s15, 32 }
  0x1b   : > { %s3399_s10 = scalar_lea.vmem %s5715_s0, %s3393_s7  ;;  %s4174_s16 = scalar_lea.vmem %s5716_s1, %s3393_s7 }
  0x1c   : > { %v3402_v1 = vld [vmem:[%s3399_s10 + $0x10] sm:$0xff]  ;;  %v3405_v2 = vld [vmem:[%s3399_s10] sm:$0xff]  ;;  %v3410_v3 = vld [vmem:[%s3399_s10 + $0x18] sm:$0xff] }
  0x1d   : > { %379 = vperm.xlu1 %3196, %v3402_v1   ;;  %369 = vperm.xlu0 %3195, %v3405_v2   ;;  %v3413_v4 = vld [vmem:[%s3399_s10 + $0x8] sm:$0xff]  ;;  %v3421_v6 = vld [vmem:[%s3399_s10 + $0x20] sm:$0xff]  ;;  %v3426_v7 = vld [vmem:[%s3399_s10 + $0x38] sm:$0xff] }
  0x1e   : > { %v3418_v5 = vld [vmem:[%s3399_s10 + $0x28] sm:$0xff]  ;;  %v3429_v8 = vld [vmem:[%s3399_s10 + $0x30] sm:$0xff]  ;;  %v3437_v10 = vld [vmem:[%s3399_s10 + $0x40] sm:$0xff] }
  0x1f   : > { %v3434_v9 = vld [vmem:[%s3399_s10 + $0x48] sm:$0xff]  ;;  %v3442_v11 = vld [vmem:[%s3399_s10 + $0x58] sm:$0xff]  ;;  %v3445_v12 = vld [vmem:[%s3399_s10 + $0x50] sm:$0xff] }
  0x20   : > { %v3450_v13 = vld [vmem:[%s3399_s10 + $0x68] sm:$0xff]  ;;  %v3453_v14 = vld [vmem:[%s3399_s10 + $0x60] sm:$0xff]  ;;  %v3458_v15 = vld [vmem:[%s3399_s10 + $0x78] sm:$0xff] }
  0x21   : > { %384 = vperm.xlu1 %3196, %v3410_v3   ;;  %374 = vperm.xlu0 %3195, %v3413_v4   ;;  %v3461_v16 = vld [vmem:[%s3399_s10 + $0x70] sm:$0xff]  ;;  %v3466_v17 = vld [vmem:[%s3399_s10 + $0x88] sm:$0xff]  ;;  %v3469_v18 = vld [vmem:[%s3399_s10 + $0x80] sm:$0xff] }
  0x22   : > { %v3474_v19 = vld [vmem:[%s3399_s10 + $0x98] sm:$0xff]  ;;  %v3477_v20 = vld [vmem:[%s3399_s10 + $0x90] sm:$0xff]  ;;  %v3482_v21 = vld [vmem:[%s3399_s10 + $0xa8] sm:$0xff] }
  0x23   : > { %v3485_v22 = vld [vmem:[%s3399_s10 + $0xa0] sm:$0xff]  ;;  %v3490_v23 = vld [vmem:[%s3399_s10 + $0xb8] sm:$0xff]  ;;  %v3493_v24 = vld [vmem:[%s3399_s10 + $0xb0] sm:$0xff] }
  0x24   : > { %v3498_v25 = vld [vmem:[%s3399_s10 + $0xc8] sm:$0xff]  ;;  %v3501_v26 = vld [vmem:[%s3399_s10 + $0xc0] sm:$0xff]  ;;  %v3506_v27 = vld [vmem:[%s3399_s10 + $0xd8] sm:$0xff] }
  0x25   : > { %394 = vperm.xlu1 %3196, %v3418_v5   ;;  %389 = vperm.xlu0 %3195, %v3421_v6   ;;  %v3509_v28 = vld [vmem:[%s3399_s10 + $0xd0] sm:$0xff]  ;;  %v3514_v29 = vld [vmem:[%s3399_s10 + $0xe8] sm:$0xff]  ;;  %v3517_v30 = vld [vmem:[%s3399_s10 + $0xe0] sm:$0xff] }
  0x26   : > { %v3522_v31 = vld [vmem:[%s3399_s10 + $0xf8] sm:$0xff]  ;;  %v3525_v32 = vld [vmem:[%s3399_s10 + $0xf0] sm:$0xff] }
  0x29   : > { %404 = vperm.xlu1 %3196, %v3426_v7   ;;  %399 = vperm.xlu0 %3195, %v3429_v8  }
  0x2d   : > { %414 = vperm.xlu1 %3196, %v3434_v9   ;;  %409 = vperm.xlu0 %3195, %v3437_v10  }
  0x31   : > { %424 = vperm.xlu1 %3196, %v3442_v11   ;;  %419 = vperm.xlu0 %3195, %v3445_v12  }
  0x35   : > { %434 = vperm.xlu1 %3196, %v3450_v13   ;;  %429 = vperm.xlu0 %3195, %v3453_v14  }
  0x39   : > { %444 = vperm.xlu1 %3196, %v3458_v15   ;;  %439 = vperm.xlu0 %3195, %v3461_v16  }
  0x3d   : > { %454 = vperm.xlu1 %3196, %v3466_v17   ;;  %449 = vperm.xlu0 %3195, %v3469_v18  }
  0x41   : > { %464 = vperm.xlu1 %3196, %v3474_v19   ;;  %459 = vperm.xlu0 %3195, %v3477_v20  }
  0x45   : > { %474 = vperm.xlu1 %3196, %v3482_v21   ;;  %469 = vperm.xlu0 %3195, %v3485_v22  }
  0x49   : > { %484 = vperm.xlu1 %3196, %v3490_v23   ;;  %479 = vperm.xlu0 %3195, %v3493_v24  }
  0x4d   : > { %494 = vperm.xlu1 %3196, %v3498_v25   ;;  %489 = vperm.xlu0 %3195, %v3501_v26  }
  0x51   : > { %504 = vperm.xlu1 %3196, %v3506_v27   ;;  %499 = vperm.xlu0 %3195, %v3509_v28  }
  0x55   : > { %514 = vperm.xlu1 %3196, %v3514_v29   ;;  %509 = vperm.xlu0 %3195, %v3517_v30  }
  0x59   : > { %524 = vperm.xlu1 %3196, %v3522_v31   ;;  %519 = vperm.xlu0 %3195, %v3525_v32  }
  0x5d   : > { %3198 = vset.pattern.permute.xlu1 %v3300_v33  ;;  %3197 = vset.pattern.permute.xlu0 %v3300_v33 }
  0x5e   : > { %568 = vperm.xlu1 %3198, %v3413_v4   ;;  %564 = vperm.xlu0 %3197, %v3405_v2  }
  0x62   : > { %572 = vperm.xlu1 %3198, %v3402_v1   ;;  %576 = vperm.xlu0 %3197, %v3410_v3  }
  0x66   : > { %580 = vperm.xlu1 %3198, %v3421_v6   ;;  %584 = vperm.xlu0 %3197, %v3418_v5  }
  0x6a   : > { %588 = vperm.xlu1 %3198, %v3429_v8   ;;  %592 = vperm.xlu0 %3197, %v3426_v7  }
  0x6e   : > { %596 = vperm.xlu1 %3198, %v3437_v10   ;;  %600 = vperm.xlu0 %3197, %v3434_v9  }
  0x72   : > { %604 = vperm.xlu1 %3198, %v3445_v12   ;;  %608 = vperm.xlu0 %3197, %v3442_v11  }
  0x76   : > { %612 = vperm.xlu1 %3198, %v3453_v14   ;;  %616 = vperm.xlu0 %3197, %v3450_v13  }
  0x7a   : > { %620 = vperm.xlu1 %3198, %v3461_v16   ;;  %624 = vperm.xlu0 %3197, %v3458_v15  }
  0x7e   : > { %628 = vperm.xlu1 %3198, %v3469_v18   ;;  %632 = vperm.xlu0 %3197, %v3466_v17  }
  0x82   : > { %636 = vperm.xlu1 %3198, %v3477_v20   ;;  %640 = vperm.xlu0 %3197, %v3474_v19  }
  0x86   : > { %644 = vperm.xlu1 %3198, %v3485_v22   ;;  %648 = vperm.xlu0 %3197, %v3482_v21  }
  0x8a   : > { %652 = vperm.xlu1 %3198, %v3493_v24   ;;  %656 = vperm.xlu0 %3197, %v3490_v23  }
  0x8e   : > { %660 = vperm.xlu1 %3198, %v3501_v26   ;;  %664 = vperm.xlu0 %3197, %v3498_v25  }
  0x92   : > { %668 = vperm.xlu1 %3198, %v3509_v28   ;;  %672 = vperm.xlu0 %3197, %v3506_v27  }
  0x96   : > { %676 = vperm.xlu1 %3198, %v3517_v30   ;;  %680 = vperm.xlu0 %3197, %v3514_v29  }
  0x9a   : > { %684 = vperm.xlu1 %3198, %v3525_v32   ;;  %688 = vperm.xlu0 %3197, %v3522_v31  }
  0x9c   : > { %v3561_v34 = vpop.permute.xlu1 %379  ;;  %v3563_v35 = vpop.permute.xlu0 %369 }
  0x9e   : > { %3199 = vset.pattern.permute.xlu1 %v3301_v36  ;;  %3200 = vset.pattern.permute.xlu0 %v3301_v36 }
  0x9f   : > { %760 = vperm.xlu1 %3199, %v3405_v2   ;;  %764 = vperm.xlu0 %3200, %v3413_v4  }
  0xa0   : > { %v3567_v37 = vpop.permute.xlu1 %384  ;;  %v3569_v38 = vpop.permute.xlu0 %374 }
  0xa3   : > { %768 = vperm.xlu1 %3199, %v3402_v1   ;;  %776 = vperm.xlu0 %3200, %v3421_v6  }
  0xa4   : > { %v3573_v39 = vpop.permute.xlu1 %394  ;;  %v3575_v40 = vpop.permute.xlu0 %389 }
  0xa7   : > { %772 = vperm.xlu1 %3199, %v3410_v3   ;;  %784 = vperm.xlu0 %3200, %v3429_v8  }
  0xa8   : > { %v3579_v41 = vpop.permute.xlu1 %404  ;;  %v3581_v42 = vpop.permute.xlu0 %399 }
  0xab   : > { %780 = vperm.xlu1 %3199, %v3418_v5   ;;  %792 = vperm.xlu0 %3200, %v3437_v10  }
  0xac   : > { %v3585_v43 = vpop.permute.xlu1 %414  ;;  %v3587_v44 = vpop.permute.xlu0 %409 }
  0xaf   : > { %788 = vperm.xlu1 %3199, %v3426_v7   ;;  %800 = vperm.xlu0 %3200, %v3445_v12  }
  0xb0   : > { %v3591_v45 = vpop.permute.xlu1 %424  ;;  %v3593_v46 = vpop.permute.xlu0 %419 }
  0xb3   : > { %796 = vperm.xlu1 %3199, %v3434_v9   ;;  %808 = vperm.xlu0 %3200, %v3453_v14  }
  0xb4   : > { %v3597_v47 = vpop.permute.xlu1 %434  ;;  %v3599_v48 = vpop.permute.xlu0 %429 }
  0xb7   : > { %804 = vperm.xlu1 %3199, %v3442_v11   ;;  %816 = vperm.xlu0 %3200, %v3461_v16  }
  0xb8   : > { %v3603_v49 = vpop.permute.xlu1 %444  ;;  %v3605_v50 = vpop.permute.xlu0 %439 }
  0xb9   : > { %5786 = vst [vmem:[#allocation5_spill] sm:$0xff] %v3603_v49  ;;  %5787 = vst [vmem:[#allocation6_spill] sm:$0xff] %v3605_v50 }
  0xbb   : > { %812 = vperm.xlu1 %3199, %v3450_v13   ;;  %824 = vperm.xlu0 %3200, %v3469_v18  }
  0xbc   : > { %v3609_v51 = vpop.permute.xlu1 %454  ;;  %v3611_v52 = vpop.permute.xlu0 %449 }
  0xbd   : > { %5788 = vst [vmem:[#allocation7_spill] sm:$0xff] %v3609_v51  ;;  %5789 = vst [vmem:[#allocation8_spill] sm:$0xff] %v3611_v52 }
  0xbf   : > { %820 = vperm.xlu1 %3199, %v3458_v15   ;;  %832 = vperm.xlu0 %3200, %v3477_v20  }
  0xc0   : > { %v3615_v53 = vpop.permute.xlu1 %464  ;;  %v3617_v54 = vpop.permute.xlu0 %459 }
  0xc1   : > { %5790 = vst [vmem:[#allocation9_spill] sm:$0xff] %v3615_v53  ;;  %5791 = vst [vmem:[#allocation10_spill] sm:$0xff] %v3617_v54 }
  0xc3   : > { %828 = vperm.xlu1 %3199, %v3466_v17   ;;  %840 = vperm.xlu0 %3200, %v3485_v22  }
  0xc4   : > { %v3621_v55 = vpop.permute.xlu1 %474  ;;  %v3623_v56 = vpop.permute.xlu0 %469 }
  0xc5   : > { %5792 = vst [vmem:[#allocation11_spill] sm:$0xff] %v3621_v55  ;;  %5793 = vst [vmem:[#allocation12_spill] sm:$0xff] %v3623_v56 }
  0xc7   : > { %836 = vperm.xlu1 %3199, %v3474_v19   ;;  %848 = vperm.xlu0 %3200, %v3493_v24  }
  0xc8   : > { %v3627_v57 = vpop.permute.xlu1 %484  ;;  %v3629_v58 = vpop.permute.xlu0 %479 }
  0xc9   : > { %5794 = vst [vmem:[#allocation13_spill] sm:$0xff] %v3627_v57  ;;  %5795 = vst [vmem:[#allocation14_spill] sm:$0xff] %v3629_v58 }
  0xcb   : > { %844 = vperm.xlu1 %3199, %v3482_v21   ;;  %856 = vperm.xlu0 %3200, %v3501_v26  }
  0xcc   : > { %v3633_v59 = vpop.permute.xlu1 %494  ;;  %v3635_v60 = vpop.permute.xlu0 %489 }
  0xcd   : > { %5796 = vst [vmem:[#allocation15_spill] sm:$0xff] %v3633_v59  ;;  %5797 = vst [vmem:[#allocation16_spill] sm:$0xff] %v3635_v60 }
  0xcf   : > { %852 = vperm.xlu1 %3199, %v3490_v23   ;;  %864 = vperm.xlu0 %3200, %v3509_v28  }
  0xd0   : > { %v3639_v61 = vpop.permute.xlu1 %504  ;;  %v3641_v62 = vpop.permute.xlu0 %499 }
  0xd1   : > { %5798 = vst [vmem:[#allocation17_spill] sm:$0xff] %v3639_v61  ;;  %5799 = vst [vmem:[#allocation18_spill] sm:$0xff] %v3641_v62  ;;  %v3302_v61 = vmov 3  }
  0xd3   : > { %860 = vperm.xlu1 %3199, %v3498_v25   ;;  %872 = vperm.xlu0 %3200, %v3517_v30  }
  0xd4   : > { %v3645_v63 = vpop.permute.xlu1 %514  ;;  %v3647_v0 = vpop.permute.xlu0 %509 }
  0xd7   : > { %868 = vperm.xlu1 %3199, %v3506_v27   ;;  %880 = vperm.xlu0 %3200, %v3525_v32  }
  0xd8   : > { %v3651_v33 = vpop.permute.xlu1 %524  ;;  %v3653_v36 = vpop.permute.xlu0 %519 }
  0xdb   : > { %876 = vperm.xlu1 %3199, %v3514_v29   ;;  %3201 = vset.pattern.permute.xlu0 %v3302_v61 }
  0xdc   : > { %956 = vperm.xlu0 %3201, %v3405_v2  }
  0xdd   : > { %v3657_v62 = vpop.permute.xlu1 %568  ;;  %v3659_v60 = vpop.permute.xlu0 %564 }
  0xdf   : > { %884 = vperm.xlu1 %3199, %v3522_v31  }
  0xe0   : > { %968 = vperm.xlu0 %3201, %v3410_v3  }
  0xe1   : > { %v3663_v59 = vpop.permute.xlu1 %572  ;;  %v3665_v58 = vpop.permute.xlu0 %576 }
  0xe3   : > { %3202 = vset.pattern.permute.xlu1 %v3302_v61 }
  0xe4   : > { %960 = vperm.xlu1 %3202, %v3413_v4   ;;  %976 = vperm.xlu0 %3201, %v3418_v5  }
  0xe5   : > { %v3669_v57 = vpop.permute.xlu1 %580  ;;  %v3671_v2 = vpop.permute.xlu0 %584 }
  0xe8   : > { %964 = vperm.xlu1 %3202, %v3402_v1   ;;  %984 = vperm.xlu0 %3201, %v3426_v7  }
  0xe9   : > { %v3675_v56 = vpop.permute.xlu1 %588  ;;  %v3677_v3 = vpop.permute.xlu0 %592 }
  0xec   : > { %972 = vperm.xlu1 %3202, %v3421_v6   ;;  %992 = vperm.xlu0 %3201, %v3434_v9  }
  0xed   : > { %v3681_v61 = vpop.permute.xlu1 %596  ;;  %v3683_v4 = vpop.permute.xlu0 %600 }
  0xf0   : > { %980 = vperm.xlu1 %3202, %v3429_v8   ;;  %1000 = vperm.xlu0 %3201, %v3442_v11  }
  0xf1   : > { %v3687_v5 = vpop.permute.xlu1 %604  ;;  %v3689_v1 = vpop.permute.xlu0 %608 }
  0xf4   : > { %988 = vperm.xlu1 %3202, %v3437_v10   ;;  %1008 = vperm.xlu0 %3201, %v3450_v13  }
  0xf5   : > { %v3693_v7 = vpop.permute.xlu1 %612  ;;  %v3695_v6 = vpop.permute.xlu0 %616 }
  0xf8   : > { %996 = vperm.xlu1 %3202, %v3445_v12   ;;  %1016 = vperm.xlu0 %3201, %v3458_v15  }
  0xf9   : > { %v3699_v9 = vpop.permute.xlu1 %620  ;;  %v3701_v8 = vpop.permute.xlu0 %624 }
  0xfa   : > { %5800 = vst [vmem:[#allocation19_spill] sm:$0xff] %v3701_v8 }
  0xfc   : > { %1004 = vperm.xlu1 %3202, %v3453_v14   ;;  %1024 = vperm.xlu0 %3201, %v3466_v17   ;;  %v527_v17 = vlaneseq }
  0xfd   : > { %v3705_v11 = vpop.permute.xlu1 %628  ;;  %v3707_v10 = vpop.permute.xlu0 %632 }
  0xfe   : > { %5801 = vst [vmem:[#allocation20_spill] sm:$0xff] %v3705_v11  ;;  %5802 = vst [vmem:[#allocation21_spill] sm:$0xff] %v3707_v10  ;;  %v3727_v55 = vshrl.u32 %v527_v17, 7 }
 0x100   : > { %1012 = vperm.xlu1 %3202, %v3461_v16   ;;  %1032 = vperm.xlu0 %3201, %v3474_v19  }
 0x101   : > { %v3711_v13 = vpop.permute.xlu1 %636  ;;  %v3713_v12 = vpop.permute.xlu0 %640 }
 0x102   : > { %5803 = vst [vmem:[#allocation22_spill] sm:$0xff] %v3711_v13  ;;  %5804 = vst [vmem:[#allocation23_spill] sm:$0xff] %v3713_v12 }
 0x104   : > { %1020 = vperm.xlu1 %3202, %v3469_v18   ;;  %1040 = vperm.xlu0 %3201, %v3482_v21  }
 0x105   : > { %v3717_v15 = vpop.permute.xlu1 %644  ;;  %v3719_v14 = vpop.permute.xlu0 %648 }
 0x106   : > { %5805 = vst [vmem:[#allocation24_spill] sm:$0xff] %v3717_v15  ;;  %5806 = vst [vmem:[#allocation25_spill] sm:$0xff] %v3719_v14  ;;  %v529_v14 = vsub.s32 0, %v3727_v55 }
 0x108   : > { %1028 = vperm.xlu1 %3202, %v3477_v20   ;;  %1048 = vperm.xlu0 %3201, %v3490_v23   ;;  %v693_v20 = vsub.s32 1, %v3727_v55  ;;  %v3742_v23 = vld [vmem:[%s5718_s3] sm:$0xf] }
 0x109   : > { %v3723_v16 = vpop.permute.xlu1 %652  ;;  %v3725_v19 = vpop.permute.xlu0 %656  ;;  %v3749_v17 = vrot.slane %v3742_v23, %v529_v14 }
 0x10a   : > { %5807 = vst [vmem:[#allocation26_spill] sm:$0xff] %v3723_v16  ;;  %5808 = vst [vmem:[#allocation27_spill] sm:$0xff] %v3725_v19 }
 0x10c   : > { %1036 = vperm.xlu1 %3202, %v3485_v22   ;;  %1056 = vperm.xlu0 %3201, %v3498_v25  }
 0x10d   : > { %v3731_v18 = vpop.permute.xlu1 %660  ;;  %v3733_v21 = vpop.permute.xlu0 %664 }
 0x10e   : > { %5809 = vst [vmem:[#allocation28_spill] sm:$0xff] %v3731_v18  ;;  %5810 = vst [vmem:[#allocation29_spill] sm:$0xff] %v3733_v21  ;;  %v3752_v21 = vrot.slane %v3742_v23, %v693_v20  ;;  %v560_v18 = vmul.f32 %v3749_v17, %v3645_v63  ;;  %v562_v20 = vmul.f32 %v3749_v17, %v3651_v33 }
 0x10f   : > { %v561_v63 = vmul.f32 %v3749_v17, %v3653_v36 }
 0x110   : > { %1044 = vperm.xlu1 %3202, %v3493_v24   ;;  %1064 = vperm.xlu0 %3201, %v3506_v27  }
 0x111   : > { %v3744_v22 = vpop.permute.xlu1 %668  ;;  %v3746_v25 = vpop.permute.xlu0 %672 }
 0x112   : > { %5811 = vst [vmem:[#allocation30_spill] sm:$0xff] %v3744_v22  ;;  %5812 = vst [vmem:[#allocation31_spill] sm:$0xff] %v3746_v25  ;;  %v559_v22 = vmul.f32 %v3749_v17, %v3647_v0 }
 0x114   : > { %1052 = vperm.xlu1 %3202, %v3501_v26   ;;  %1072 = vperm.xlu0 %3201, %v3514_v29  }
 0x115   : > { %v677_v24 = vpop.permute.xlu1 %676  ;;  %v681_v27 = vpop.permute.xlu0 %680 }
 0x116   : > { %v723_v25 = vmul.f32 %v3752_v21, %v677_v24  ;;  %v724_v14 = vmul.f32 %v3752_v21, %v681_v27 }
 0x118   : > { %v755_v19 = vadd.f32 %v723_v25, %v559_v22  ;;  %v756_v16 = vadd.f32 %v724_v14, %v560_v18  ;;  %1060 = vperm.xlu1 %3202, %v3509_v28   ;;  %1080 = vperm.xlu0 %3201, %v3522_v31  }
 0x119   : > { %v685_v26 = vpop.permute.xlu1 %684  ;;  %v689_v29 = vpop.permute.xlu0 %688 }
 0x11a   : > { %v725_v0 = vmul.f32 %v3752_v21, %v685_v26  ;;  %v726_v24 = vmul.f32 %v3752_v21, %v689_v29 }
 0x11c   : > { %v757_v15 = vadd.f32 %v725_v0, %v561_v63  ;;  %v758_v27 = vadd.f32 %v726_v24, %v562_v20  ;;  %1068 = vperm.xlu1 %3202, %v3517_v30  }
 0x11e   : > { %v761_v18 = vpop.permute.xlu1 %760  ;;  %v765_v28 = vpop.permute.xlu0 %764 }
 0x120   : > { %1076 = vperm.xlu1 %3202, %v3525_v32  }
 0x122   : > { %v3772_v31 = vpop.permute.xlu1 %768  ;;  %v3774_v22 = vpop.permute.xlu0 %776 }
 0x126   : > { %v3776_v33 = vpop.permute.xlu1 %772  ;;  %v3778_v25 = vpop.permute.xlu0 %784 }
 0x12a   : > { %v3780_v36 = vpop.permute.xlu1 %780  ;;  %v3782_v14 = vpop.permute.xlu0 %792 }
 0x12e   : > { %v3784_v26 = vpop.permute.xlu1 %788  ;;  %v3786_v29 = vpop.permute.xlu0 %800 }
 0x132   : > { %v3788_v30 = vpop.permute.xlu1 %796  ;;  %v3790_v20 = vpop.permute.xlu0 %808 }
 0x136   : > { %v3792_v32 = vpop.permute.xlu1 %804  ;;  %v3794_v63 = vpop.permute.xlu0 %816 }
 0x137   : > { %5813 = vst [vmem:[#allocation32_spill] sm:$0xff] %v3794_v63  ;;  %v889_v63 = vsub.s32 2, %v3727_v55 }
 0x13a   : > { %v3796_v0 = vpop.permute.xlu1 %812  ;;  %v3798_v24 = vpop.permute.xlu0 %824 }
 0x13b   : > { %5814 = vst [vmem:[#allocation33_spill] sm:$0xff] %v3798_v24 }
 0x13e   : > { %v3800_v54 = vpop.permute.xlu1 %820  ;;  %v3802_v53 = vpop.permute.xlu0 %832 }
 0x13f   : > { %5815 = vst [vmem:[#allocation34_spill] sm:$0xff] %v3800_v54  ;;  %5816 = vst [vmem:[#allocation35_spill] sm:$0xff] %v3802_v53  ;;  %v3822_v53 = vrot.slane %v3742_v23, %v889_v63  ;;  %v531_v63 = vmul.f32 %v3749_v17, %v3563_v35  ;;  %v696_v35 = vmul.f32 %v3752_v21, %v3657_v62 }
 0x140   : > { %v698_v62 = vmul.f32 %v3752_v21, %v3665_v58  ;;  %v699_v58 = vmul.f32 %v3752_v21, %v3669_v57 }
 0x142   : > { %v3804_v12 = vpop.permute.xlu1 %828  ;;  %v3806_v13 = vpop.permute.xlu0 %840 }
 0x143   : > { %5817 = vst [vmem:[#allocation36_spill] sm:$0xff] %v3804_v12  ;;  %5818 = vst [vmem:[#allocation37_spill] sm:$0xff] %v3806_v13 }
 0x146   : > { %v3808_v52 = vpop.permute.xlu1 %836  ;;  %v3810_v51 = vpop.permute.xlu0 %848 }
 0x147   : > { %5819 = vst [vmem:[#allocation38_spill] sm:$0xff] %v3808_v52  ;;  %5820 = vst [vmem:[#allocation39_spill] sm:$0xff] %v3810_v51  ;;  %v1085_v51 = vsub.s32 3, %v3727_v55 }
 0x149   : > { %v3839_v49 = vrot.slane %v3742_v23, %v1085_v51  ;;  %v892_v23 = vmul.f32 %v3822_v53, %v765_v28 }
 0x14a   : > { %v3812_v10 = vpop.permute.xlu1 %844  ;;  %v3814_v11 = vpop.permute.xlu0 %856 }
 0x14b   : > { %5821 = vst [vmem:[#allocation40_spill] sm:$0xff] %v3812_v10  ;;  %5822 = vst [vmem:[#allocation41_spill] sm:$0xff] %v3814_v11  ;;  %v695_v11 = vmul.f32 %v3752_v21, %v3659_v60 }
 0x14e   : > { %v3817_v50 = vpop.permute.xlu1 %852  ;;  %v3819_v24 = vpop.permute.xlu0 %864 }
 0x14f   : > { %5823 = vst [vmem:[#allocation42_spill] sm:$0xff] %v3817_v50  ;;  %5824 = vst [vmem:[#allocation43_spill] sm:$0xff] %v3819_v24 }
 0x152   : > { %v3824_v12 = vpop.permute.xlu1 %860  ;;  %v873_v13 = vpop.permute.xlu0 %872 }
 0x153   : > { %5825 = vst [vmem:[#allocation44_spill] sm:$0xff] %v3824_v12  ;;  %v919_v52 = vmul.f32 %v3822_v53, %v873_v13  ;;  %v891_v12 = vmul.f32 %v3822_v53, %v761_v18 }
 0x155   : > { %v3828_v54 = vadd.f32 %v919_v52, %v755_v19  ;;  %v727_v52 = vadd.f32 %v695_v11, %v531_v63  ;;  %v532_v11 = vmul.f32 %v3749_v17, %v3569_v38  ;;  %v534_v38 = vmul.f32 %v3749_v17, %v3567_v37 }
 0x156   : > { %v3832_v10 = vpop.permute.xlu1 %868  ;;  %v881_v50 = vpop.permute.xlu0 %880 }
 0x157   : > { %5826 = vst [vmem:[#allocation45_spill] sm:$0xff] %v3828_v54  ;;  %5827 = vst [vmem:[#allocation46_spill] sm:$0xff] %v3832_v10  ;;  %v921_v24 = vmul.f32 %v3822_v53, %v881_v50  ;;  %v923_v54 = vadd.f32 %v891_v12, %v727_v52  ;;  %v894_v52 = vmul.f32 %v3822_v53, %v3776_v33 }
 0x158   : > { %v535_v33 = vmul.f32 %v3749_v17, %v3575_v40  ;;  %v701_v40 = vmul.f32 %v3752_v21, %v3675_v56 }
 0x159   : > { %v3841_v13 = vadd.f32 %v921_v24, %v757_v15 }
 0x15a   : > { %v877_v55 = vpop.permute.xlu1 %876 }
 0x15b   : > { %v920_v19 = vmul.f32 %v3822_v53, %v877_v55  ;;  %v957_v60 = vpop.permute.xlu0 %956 }
 0x15c   : > { %v1087_v10 = vmul.f32 %v3839_v49, %v957_v60 }
 0x15d   : > { %v3845_v8 = vadd.f32 %v920_v19, %v756_v16  ;;  %v728_v16 = vadd.f32 %v696_v35, %v532_v11  ;;  %v730_v19 = vadd.f32 %v698_v62, %v534_v38  ;;  %v895_v35 = vmul.f32 %v3822_v53, %v3774_v22 }
 0x15e   : > { %v3849_v50 = vadd.f32 %v1087_v10, %v923_v54  ;;  %v885_v18 = vpop.permute.xlu1 %884  ;;  %v697_v54 = vmul.f32 %v3752_v21, %v3663_v59  ;;  %v533_v10 = vmul.f32 %v3749_v17, %v3561_v34  ;;  %v700_v34 = vmul.f32 %v3752_v21, %v3671_v2 }
 0x15f   : > { %v922_v51 = vmul.f32 %v3822_v53, %v885_v18  ;;  %v969_v15 = vpop.permute.xlu0 %968  ;;  %v924_v63 = vadd.f32 %v892_v23, %v728_v16  ;;  %v926_v11 = vadd.f32 %v894_v52, %v730_v19  ;;  %v896_v2 = vmul.f32 %v3822_v53, %v3780_v36 }
 0x160   : > { %1215 = vrot.lane.b32.xlu1 %v3849_v50, %s3303_s13  ;;  %v729_v55 = vadd.f32 %v697_v54, %v533_v10  ;;  %v1090_v37 = vmul.f32 %v3839_v49, %v969_v15  ;;  %v731_v23 = vadd.f32 %v699_v58, %v535_v33  ;;  %v702_v22 = vmul.f32 %v3752_v21, %v3677_v3 }
 0x161   : > { %v3857_v12 = vadd.f32 %v922_v51, %v758_v27  ;;  %v893_v27 = vmul.f32 %v3822_v53, %v3772_v31  ;;  %v536_v31 = vmul.f32 %v3749_v17, %v3573_v39  ;;  %v538_v36 = vmul.f32 %v3749_v17, %v3579_v41 }
 0x162   : > { %v3894_v16 = vadd.f32 %v1090_v37, %v926_v11  ;;  %v537_v10 = vmul.f32 %v3749_v17, %v3581_v42  ;;  %v927_v38 = vadd.f32 %v895_v35, %v731_v23  ;;  %v898_v3 = vmul.f32 %v3822_v53, %v3784_v26 }
 0x163   : > { %v961_v28 = vpop.permute.xlu1 %960  ;;  %v977_v24 = vpop.permute.xlu0 %976  ;;  %v925_v51 = vadd.f32 %v893_v27, %v729_v55  ;;  %v732_v39 = vadd.f32 %v700_v34, %v536_v31  ;;  %v703_v42 = vmul.f32 %v3752_v21, %v3681_v61  ;;  %v734_v52 = vadd.f32 %v702_v22, %v538_v36 }
 0x164   : > { %v1088_v59 = vmul.f32 %v3839_v49, %v961_v28  ;;  %v1092_v54 = vmul.f32 %v3839_v49, %v977_v24  ;;  %v897_v28 = vmul.f32 %v3822_v53, %v3778_v25  ;;  %v733_v41 = vadd.f32 %v701_v40, %v537_v10 }
 0x165   : > { %v928_v27 = vadd.f32 %v896_v2, %v732_v39  ;;  %v704_v25 = vmul.f32 %v3752_v21, %v3683_v4  ;;  %v540_v34 = vmul.f32 %v3749_v17, %v3585_v43  ;;  %v539_v55 = vmul.f32 %v3749_v17, %v3587_v44 }
 0x166   : > { %v3877_v60 = vadd.f32 %v1088_v59, %v924_v63  ;;  %v929_v19 = vadd.f32 %v897_v28, %v733_v41  ;;  %v899_v61 = vmul.f32 %v3822_v53, %v3782_v14  ;;  %v930_v4 = vadd.f32 %v898_v3, %v734_v52 }
 0x167   : > { %v965_v18 = vpop.permute.xlu1 %964  ;;  %v985_v57 = vpop.permute.xlu0 %984  ;;  %v3916_v59 = vadd.f32 %v1092_v54, %v928_v27  ;;  %v900_v33 = vmul.f32 %v3822_v53, %v3788_v30  ;;  %v735_v43 = vadd.f32 %v703_v42, %v539_v55  ;;  %v736_v44 = vadd.f32 %v704_v25, %v540_v34  ;;  %v5837_v55 = vld [vmem:[#allocation6_spill] sm:$0xff] }
 0x168   : > { %v1089_v15 = vmul.f32 %v3839_v49, %v965_v18  ;;  %1217 = vrot.lane.b32.xlu0 %v3877_v60, %s3303_s13  ;;  %v1094_v26 = vmul.f32 %v3839_v49, %v985_v57  ;;  %v705_v18 = vmul.f32 %v3752_v21, %v3687_v5  ;;  %v706_v14 = vmul.f32 %v3752_v21, %v3689_v1 }
 0x169   : > { %5828 = vst [vmem:[#allocation47_spill] sm:$0xff] %v3916_v59  ;;  %v542_v11 = vmul.f32 %v3749_v17, %v3591_v45  ;;  %v541_v2 = vmul.f32 %v3749_v17, %v3593_v46  ;;  %v901_v23 = vmul.f32 %v3822_v53, %v3786_v29  ;;  %v932_v40 = vadd.f32 %v900_v33, %v736_v44 }
 0x16a   : > { %v3897_v62 = vadd.f32 %v1089_v15, %v925_v51  ;;  %v3938_v57 = vadd.f32 %v1094_v26, %v930_v4  ;;  %v931_v15 = vadd.f32 %v899_v61, %v735_v43  ;;  %v902_v1 = vmul.f32 %v3822_v53, %v3792_v32  ;;  %v5836_v26 = vld [vmem:[#allocation5_spill] sm:$0xff] }
 0x16b   : > { %v973_v56 = vpop.permute.xlu1 %972  ;;  %v993_v63 = vpop.permute.xlu0 %992  ;;  %v737_v45 = vadd.f32 %v705_v18, %v541_v2  ;;  %v707_v46 = vmul.f32 %v3752_v21, %v3693_v7  ;;  %v708_v29 = vmul.f32 %v3752_v21, %v3695_v6  ;;  %v738_v54 = vadd.f32 %v706_v14, %v542_v11  ;;  %v5840_v14 = vld [vmem:[#allocation20_spill] sm:$0xff]  ;;  %v5841_v11 = vld [vmem:[#allocation21_spill] sm:$0xff] }
 0x16c   : > { %v1091_v24 = vmul.f32 %v3839_v49, %v973_v56  ;;  %1219 = vrot.lane.b32.xlu1 %v3897_v62, %s3303_s13  ;;  %1221 = vrot.lane.b32.xlu0 %v3894_v16, %s3303_s13  ;;  %5829 = vst [vmem:[#allocation48_spill] sm:$0xff] %v3938_v57  ;;  %v1096_v30 = vmul.f32 %v3839_v49, %v993_v63 }
 0x16d   : > { %v543_v28 = vmul.f32 %v3749_v17, %v3599_v48  ;;  %v933_v56 = vadd.f32 %v901_v23, %v737_v45  ;;  %v903_v7 = vmul.f32 %v3822_v53, %v3790_v20  ;;  %v934_v6 = vadd.f32 %v902_v1, %v738_v54  ;;  %v5833_v20 = vld [vmem:[#allocation19_spill] sm:$0xff] }
 0x16e   : > { %v3919_v58 = vadd.f32 %v1091_v24, %v927_v38  ;;  %v3960_v36 = vadd.f32 %v1096_v30, %v932_v40  ;;  %v544_v38 = vmul.f32 %v3749_v17, %v3597_v47  ;;  %v904_v3 = vmul.f32 %v3822_v53, %v3796_v0  ;;  %v5844_v40 = vld [vmem:[#allocation7_spill] sm:$0xff] }
 0x16f   : > { %v981_v37 = vpop.permute.xlu1 %980  ;;  %v1001_v31 = vpop.permute.xlu0 %1000  ;;  %v739_v47 = vadd.f32 %v707_v46, %v543_v28  ;;  %v709_v41 = vmul.f32 %v3752_v21, %v3699_v9  ;;  %v710_v42 = vmul.f32 %v3752_v21, %v5833_v20  ;;  %v546_v34 = vmul.f32 %v3749_v17, %v5836_v26 }
 0x170   : > { %v1093_v35 = vmul.f32 %v3839_v49, %v981_v37  ;;  %1223 = vrot.lane.b32.xlu1 %v3919_v58, %s3303_s13  ;;  %1225 = vrot.lane.b32.xlu0 %v3916_v59, %s3303_s13  ;;  %5831 = vst [vmem:[#allocation50_spill] sm:$0xff] %v3960_v36  ;;  %v1098_v32 = vmul.f32 %v3839_v49, %v1001_v31  ;;  %v5838_v37 = vld [vmem:[#allocation32_spill] sm:$0xff] }
 0x171   : > { %v740_v48 = vadd.f32 %v708_v29, %v544_v38  ;;  %v935_v61 = vadd.f32 %v903_v7, %v739_v47  ;;  %v905_v31 = vmul.f32 %v3822_v53, %v5838_v37  ;;  %v711_v30 = vmul.f32 %v3752_v21, %v5840_v14  ;;  %v5846_v29 = vld [vmem:[#allocation33_spill] sm:$0xff]  ;;  %v5849_v47 = vld [vmem:[#allocation23_spill] sm:$0xff] }
 0x172   : > { %v3941_v51 = vadd.f32 %v1093_v35, %v929_v19  ;;  %v3982_v25 = vadd.f32 %v1098_v32, %v934_v6  ;;  %v545_v19 = vmul.f32 %v3749_v17, %v5837_v55  ;;  %v5839_v35 = vld [vmem:[#allocation34_spill] sm:$0xff]  ;;  %v712_v2 = vmul.f32 %v3752_v21, %v5841_v11 }
 0x173   : > { %v989_v5 = vpop.permute.xlu1 %988  ;;  %v1009_v39 = vpop.permute.xlu0 %1008  ;;  %v936_v33 = vadd.f32 %v904_v3, %v740_v48  ;;  %v906_v43 = vmul.f32 %v3822_v53, %v5839_v35  ;;  %v548_v1 = vmul.f32 %v3749_v17, %v5844_v40  ;;  %v907_v54 = vmul.f32 %v3822_v53, %v5846_v29  ;;  %v5848_v3 = vld [vmem:[#allocation22_spill] sm:$0xff] }
 0x174   : > { %5830 = vst [vmem:[#allocation49_spill] sm:$0xff] %v3941_v51  ;;  %v1095_v22 = vmul.f32 %v3839_v49, %v989_v5  ;;  %1227 = vrot.lane.b32.xlu1 %v3941_v51, %s3303_s13  ;;  %1229 = vrot.lane.b32.xlu0 %v3938_v57, %s3303_s13  ;;  %5834 = vst [vmem:[#allocation19_spill] sm:$0xff] %v3982_v25  ;;  %v1100_v0 = vmul.f32 %v3839_v49, %v1009_v39  ;;  %v5855_v35 = vld [vmem:[#allocation38_spill] sm:$0xff] }
 0x175   : > { %v741_v18 = vadd.f32 %v709_v41, %v545_v19  ;;  %v744_v6 = vadd.f32 %v712_v2, %v548_v1  ;;  %v714_v48 = vmul.f32 %v3752_v21, %v5849_v47  ;;  %v5858_v1 = vld [vmem:[#allocation11_spill] sm:$0xff] }
 0x176   : > { %v3963_v10 = vadd.f32 %v1095_v22, %v931_v15  ;;  %v742_v15 = vadd.f32 %v710_v42, %v546_v34  ;;  %v4004_v23 = vadd.f32 %v1100_v0, %v936_v33  ;;  %v5845_v22 = vld [vmem:[#allocation8_spill] sm:$0xff]  ;;  %v5852_v0 = vld [vmem:[#allocation9_spill] sm:$0xff]  ;;  %v5853_v34 = vld [vmem:[#allocation10_spill] sm:$0xff] }
 0x177   : > { %v997_v63 = vpop.permute.xlu1 %996  ;;  %v1017_v27 = vpop.permute.xlu0 %1016  ;;  %v547_v45 = vmul.f32 %v3749_v17, %v5845_v22  ;;  %v937_v46 = vadd.f32 %v905_v31, %v741_v18  ;;  %v550_v26 = vmul.f32 %v3749_v17, %v5852_v0  ;;  %v549_v55 = vmul.f32 %v3749_v17, %v5853_v34  ;;  %v5856_v18 = vld [vmem:[#allocation24_spill] sm:$0xff] }
 0x178   : > { %5832 = vst [vmem:[#allocation51_spill] sm:$0xff] %v3963_v10  ;;  %v1097_v24 = vmul.f32 %v3839_v49, %v997_v63  ;;  %1231 = vrot.lane.b32.xlu1 %v3963_v10, %s3303_s13  ;;  %1233 = vrot.lane.b32.xlu0 %v3960_v36, %s3303_s13  ;;  %5842 = vst [vmem:[#allocation5_spill] sm:$0xff] %v4004_v23  ;;  %v1102_v5 = vmul.f32 %v3839_v49, %v1017_v27 }
 0x179   : > { %v938_v28 = vadd.f32 %v906_v43, %v742_v15  ;;  %v743_v27 = vadd.f32 %v711_v30, %v547_v45  ;;  %v910_v43 = vmul.f32 %v3822_v53, %v5855_v35  ;;  %v715_v14 = vmul.f32 %v3752_v21, %v5856_v18  ;;  %v5857_v30 = vld [vmem:[#allocation25_spill] sm:$0xff]  ;;  %v5859_v45 = vld [vmem:[#allocation12_spill] sm:$0xff]  ;;  %v5867_v18 = vld [vmem:[#allocation42_spill] sm:$0xff] }
 0x17a   : > { %v3985_v52 = vadd.f32 %v1097_v24, %v933_v56  ;;  %v5847_v56 = vld [vmem:[#allocation36_spill] sm:$0xff]  ;;  %v713_v24 = vmul.f32 %v3752_v21, %v5848_v3  ;;  %v716_v11 = vmul.f32 %v3752_v21, %v5857_v30  ;;  %v746_v2 = vadd.f32 %v714_v48, %v550_v26  ;;  %v5863_v48 = vld [vmem:[#allocation27_spill] sm:$0xff] }
 0x17b   : > { %v1005_v9 = vpop.permute.xlu1 %1004  ;;  %v1025_v4 = vpop.permute.xlu0 %1024  ;;  %v908_v7 = vmul.f32 %v3822_v53, %v5847_v56  ;;  %v4026_v41 = vadd.f32 %v1102_v5, %v938_v28  ;;  %v939_v19 = vadd.f32 %v907_v54, %v743_v27  ;;  %v552_v22 = vmul.f32 %v3749_v17, %v5858_v1  ;;  %v5860_v54 = vld [vmem:[#allocation37_spill] sm:$0xff] }
 0x17c   : > { %5835 = vst [vmem:[#allocation52_spill] sm:$0xff] %v3985_v52  ;;  %v1099_v44 = vmul.f32 %v3839_v49, %v1005_v9  ;;  %1235 = vrot.lane.b32.xlu1 %v3985_v52, %s3303_s13  ;;  %1237 = vrot.lane.b32.xlu0 %v3982_v25, %s3303_s13  ;;  %v1104_v20 = vmul.f32 %v3839_v49, %v1025_v4 }
 0x17d   : > { %5850 = vst [vmem:[#allocation32_spill] sm:$0xff] %v4026_v41  ;;  %v940_v33 = vadd.f32 %v908_v7, %v744_v6  ;;  %v942_v7 = vadd.f32 %v910_v43, %v746_v2  ;;  %v748_v3 = vadd.f32 %v716_v11, %v552_v22  ;;  %v5868_v11 = vld [vmem:[#allocation28_spill] sm:$0xff] }
 0x17e   : > { %v4007_v39 = vadd.f32 %v1099_v44, %v935_v61  ;;  %v5854_v61 = vld [vmem:[#allocation35_spill] sm:$0xff]  ;;  %v745_v44 = vadd.f32 %v713_v24, %v549_v55  ;;  %v5862_v24 = vld [vmem:[#allocation26_spill] sm:$0xff]  ;;  %v5864_v55 = vld [vmem:[#allocation13_spill] sm:$0xff]  ;;  %v719_v2 = vmul.f32 %v3752_v21, %v5868_v11 }
 0x17f   : > { %v1013_v32 = vpop.permute.xlu1 %1012  ;;  %v1033_v38 = vpop.permute.xlu0 %1032  ;;  %v909_v37 = vmul.f32 %v3822_v53, %v5854_v61  ;;  %v4048_v15 = vadd.f32 %v1104_v20, %v940_v33  ;;  %v717_v47 = vmul.f32 %v3752_v21, %v5862_v24  ;;  %v718_v20 = vmul.f32 %v3752_v21, %v5863_v48  ;;  %v5865_v61 = vld [vmem:[#allocation14_spill] sm:$0xff]  ;;  %v5866_v33 = vld [vmem:[#allocation39_spill] sm:$0xff] }
 0x180   : > { %5843 = vst [vmem:[#allocation6_spill] sm:$0xff] %v4007_v39  ;;  %v1101_v63 = vmul.f32 %v3839_v49, %v1013_v32  ;;  %1239 = vrot.lane.b32.xlu1 %v4007_v39, %s3303_s13  ;;  %1241 = vrot.lane.b32.xlu0 %v4004_v23, %s3303_s13  ;;  %v1106_v5 = vmul.f32 %v3839_v49, %v1033_v38 }
 0x181   : > { %v941_v29 = vadd.f32 %v909_v37, %v745_v44  ;;  %v911_v32 = vmul.f32 %v3822_v53, %v5860_v54  ;;  %v553_v37 = vmul.f32 %v3749_v17, %v5865_v61  ;;  %v913_v35 = vmul.f32 %v3822_v53, %v5866_v33  ;;  %v5870_v54 = vld [vmem:[#allocation15_spill] sm:$0xff] }
 0x182   : > { %v4029_v42 = vadd.f32 %v1101_v63, %v937_v46  ;;  %v551_v46 = vmul.f32 %v3749_v17, %v5859_v45  ;;  %v5861_v63 = vld [vmem:[#allocation40_spill] sm:$0xff]  ;;  %v4070_v0 = vadd.f32 %v1106_v5, %v942_v7  ;;  %v5869_v5 = vld [vmem:[#allocation29_spill] sm:$0xff]  ;;  %v5875_v61 = vld [vmem:[#allocation31_spill] sm:$0xff] }
 0x183   : > { %v1021_v31 = vpop.permute.xlu1 %1020  ;;  %v1041_v9 = vpop.permute.xlu0 %1040  ;;  %v912_v27 = vmul.f32 %v3822_v53, %v5861_v63  ;;  %v749_v30 = vadd.f32 %v717_v47, %v553_v37  ;;  %v720_v1 = vmul.f32 %v3752_v21, %v5869_v5  ;;  %v5873_v47 = vld [vmem:[#allocation44_spill] sm:$0xff]  ;;  %v722_v37 = vmul.f32 %v3752_v21, %v5875_v61 }
 0x184   : > { %5851 = vst [vmem:[#allocation34_spill] sm:$0xff] %v4029_v42  ;;  %v1103_v4 = vmul.f32 %v3839_v49, %v1021_v31  ;;  %1243 = vrot.lane.b32.xlu1 %v4029_v42, %s3303_s13  ;;  %1245 = vrot.lane.b32.xlu0 %v4026_v41, %s3303_s13  ;;  %v747_v6 = vadd.f32 %v715_v14, %v551_v46 }
 0x185   : > { %v1108_v26 = vmul.f32 %v3839_v49, %v1041_v9  ;;  %v944_v44 = vadd.f32 %v912_v27, %v748_v3  ;;  %v914_v14 = vmul.f32 %v3822_v53, %v5867_v18  ;;  %v945_v63 = vadd.f32 %v913_v35, %v749_v30  ;;  %v5872_v27 = vld [vmem:[#allocation41_spill] sm:$0xff]  ;;  %v5879_v18 = vld [vmem:[#allocation18_spill] sm:$0xff]  ;;  %v5880_v30 = vld [vmem:[#allocation43_spill] sm:$0xff] }
 0x186   : > { %v4051_v40 = vadd.f32 %v1103_v4, %v939_v19  ;;  %v554_v19 = vmul.f32 %v3749_v17, %v5864_v55  ;;  %v943_v31 = vadd.f32 %v911_v32, %v747_v6  ;;  %v556_v32 = vmul.f32 %v3749_v17, %v5870_v54  ;;  %v5874_v55 = vld [vmem:[#allocation30_spill] sm:$0xff] }
 0x187   : > { %v1029_v28 = vpop.permute.xlu1 %1028  ;;  %v1049_v56 = vpop.permute.xlu0 %1048  ;;  %v4092_v45 = vadd.f32 %v1108_v26, %v944_v44  ;;  %v916_v48 = vmul.f32 %v3822_v53, %v5873_v47  ;;  %v917_v11 = vmul.f32 %v3822_v53, %v5880_v30  ;;  %v4224_v30 = vld [vmem:[%s4174_s16 + $0x48] sm:$0xff] }
 0x188   : > { %v1105_v38 = vmul.f32 %v3839_v49, %v1029_v28  ;;  %1247 = vrot.lane.b32.xlu1 %v4051_v40, %s3303_s13  ;;  %1249 = vrot.lane.b32.xlu0 %v4048_v15, %s3303_s13  ;;  %v750_v22 = vadd.f32 %v718_v20, %v554_v19  ;;  %v1110_v46 = vmul.f32 %v3839_v49, %v1049_v56  ;;  %v5871_v28 = vld [vmem:[#allocation16_spill] sm:$0xff] }
 0x189   : > { %v555_v7 = vmul.f32 %v3749_v17, %v5871_v28  ;;  %v752_v26 = vadd.f32 %v720_v1, %v556_v32  ;;  %v721_v19 = vmul.f32 %v3752_v21, %v5874_v55  ;;  %v5881_v1 = vld [vmem:[#allocation46_spill] sm:$0xff] }
 0x18a   : > { %v4073_v34 = vadd.f32 %v1105_v38, %v941_v29  ;;  %v915_v38 = vmul.f32 %v3822_v53, %v5872_v27  ;;  %v946_v24 = vadd.f32 %v914_v14, %v750_v22  ;;  %v557_v14 = vmul.f32 %v3749_v17, %v5879_v18  ;;  %v4211_v18 = vld [vmem:[%s4174_s16 + $0x30] sm:$0xff] }
 0x18b   : > { %v1037_v43 = vpop.permute.xlu1 %1036  ;;  %v1057_v4 = vpop.permute.xlu0 %1056  ;;  %v751_v20 = vadd.f32 %v719_v2, %v555_v7  ;;  %v948_v5 = vadd.f32 %v916_v48, %v752_v26  ;;  %v918_v21 = vmul.f32 %v3822_v53, %v5881_v1  ;;  %v5887_v26 = vld [vmem:[#allocation45_spill] sm:$0xff]  ;;  %v4244_v1 = vld [vmem:[%s4174_s16 + $0x68] sm:$0xff] }
 0x18c   : > { %v1107_v9 = vmul.f32 %v3839_v49, %v1037_v43  ;;  %1251 = vrot.lane.b32.xlu1 %v4073_v34, %s3303_s13  ;;  %1253 = vrot.lane.b32.xlu0 %v4070_v0, %s3303_s13  ;;  %v1112_v33 = vmul.f32 %v3839_v49, %v1057_v4  ;;  %v5878_v43 = vld [vmem:[#allocation17_spill] sm:$0xff]  ;;  %v753_v4 = vadd.f32 %v721_v19, %v557_v14 }
 0x18d   : > { %v558_v44 = vmul.f32 %v3749_v17, %v5878_v43  ;;  %v4201_v43 = vld [vmem:[%s4174_s16 + $0x20] sm:$0xff]  ;;  %v4214_v14 = vld [vmem:[%s4174_s16 + $0x38] sm:$0xff]  ;;  %5891 = vst [vmem:[#allocation35_spill] sm:$0xff] %v4244_v1 }
 0x18e   : > { %v4095_v29 = vadd.f32 %v1107_v9, %v943_v31  ;;  %v4114_v31 = vadd.f32 %v1110_v46, %v946_v24  ;;  %v947_v9 = vadd.f32 %v915_v38, %v751_v20  ;;  %v4132_v54 = vadd.f32 %v1112_v33, %v948_v5  ;;  %v4194_v33 = vld [vmem:[%s4174_s16 + $0x18] sm:$0xff]  ;;  %v4241_v5 = vld [vmem:[%s4174_s16 + $0x60] sm:$0xff] }
 0x18f   : > { %v1045_v6 = vpop.permute.xlu1 %1044  ;;  %v1065_v3 = vpop.permute.xlu0 %1064  ;;  %v754_v17 = vadd.f32 %v722_v37, %v558_v44  ;;  %v4204_v44 = vld [vmem:[%s4174_s16 + $0x28] sm:$0xff] }
 0x190   : > { %v1109_v56 = vmul.f32 %v3839_v49, %v1045_v6  ;;  %1255 = vrot.lane.b32.xlu1 %v4095_v29, %s3303_s13  ;;  %1257 = vrot.lane.b32.xlu0 %v4092_v45, %s3303_s13  ;;  %5876 = vst [vmem:[#allocation20_spill] sm:$0xff] %v4114_v31  ;;  %5882 = vst [vmem:[#allocation7_spill] sm:$0xff] %v4132_v54  ;;  %v1114_v32 = vmul.f32 %v3839_v49, %v1065_v3 }
 0x191   : > { %v950_v53 = vadd.f32 %v918_v21, %v754_v17  ;;  %v4251_v21 = vld [vmem:[%s4174_s16 + $0x70] sm:$0xff] }
 0x192   : > { %v4117_v35 = vadd.f32 %v1109_v56, %v945_v63  ;;  %v949_v63 = vadd.f32 %v917_v11, %v753_v4  ;;  %v4231_v11 = vld [vmem:[%s4174_s16 + $0x50] sm:$0xff]  ;;  %5892 = vst [vmem:[#allocation38_spill] sm:$0xff] %v4251_v21  ;;  %v4261_v4 = vld [vmem:[%s4174_s16 + $0x80] sm:$0xff] }
 0x193   : > { %v1053_v2 = vpop.permute.xlu1 %1052  ;;  %v1073_v46 = vpop.permute.xlu0 %1072  ;;  %v4142_v38 = vadd.f32 %v1114_v32, %v950_v53  ;;  %v4271_v17 = vld [vmem:[%s4174_s16 + $0x90] sm:$0xff]  ;;  %v4274_v32 = vld [vmem:[%s4174_s16 + $0x98] sm:$0xff] }
 0x194   : > { %5877 = vst [vmem:[#allocation21_spill] sm:$0xff] %v4117_v35  ;;  %v1111_v22 = vmul.f32 %v3839_v49, %v1053_v2  ;;  %1259 = vrot.lane.b32.xlu1 %v4117_v35, %s3303_s13  ;;  %1261 = vrot.lane.b32.xlu0 %v4114_v31, %s3303_s13  ;;  %v1116_v6 = vmul.f32 %v3839_v49, %v1073_v46  ;;  %v4234_v2 = vld [vmem:[%s4174_s16 + $0x58] sm:$0xff]  ;;  %v4264_v46 = vld [vmem:[%s4174_s16 + $0x88] sm:$0xff] }
 0x195   : > { %5884 = vst [vmem:[#allocation33_spill] sm:$0xff] %v4142_v38  ;;  %v4291_v53 = vld [vmem:[%s4174_s16 + $0xb0] sm:$0xff] }
 0x196   : > { %v4135_v28 = vadd.f32 %v1111_v22, %v947_v9  ;;  %v4153_v56 = vadd.f32 %v1116_v6, %v3845_v8  ;;  %v4221_v9 = vld [vmem:[%s4174_s16 + $0x40] sm:$0xff]  ;;  %v4254_v22 = vld [vmem:[%s4174_s16 + $0x78] sm:$0xff] }
 0x197   : > { %v1061_v7 = vpop.permute.xlu1 %1060  ;;  %v1081_v3 = vpop.permute.xlu0 %1080  ;;  %5893 = vst [vmem:[#allocation24_spill] sm:$0xff] %v4254_v22  ;;  %v4301_v6 = vld [vmem:[%s4174_s16 + $0xc0] sm:$0xff] }
 0x198   : > { %5883 = vst [vmem:[#allocation8_spill] sm:$0xff] %v4135_v28  ;;  %v1113_v27 = vmul.f32 %v3839_v49, %v1061_v7  ;;  %1263 = vrot.lane.b32.xlu1 %v4135_v28, %s3303_s13  ;;  %1265 = vrot.lane.b32.xlu0 %v4132_v54, %s3303_s13  ;;  %5886 = vst [vmem:[#allocation22_spill] sm:$0xff] %v4153_v56  ;;  %v1118_v20 = vmul.f32 %v3839_v49, %v1081_v3  ;;  %v4281_v7 = vld [vmem:[%s4174_s16 + $0xa0] sm:$0xff]  ;;  %v4304_v3 = vld [vmem:[%s4174_s16 + $0xc8] sm:$0xff] }
 0x19a   : > { %v4145_v24 = vadd.f32 %v1113_v27, %v949_v63  ;;  %v4165_v37 = vadd.f32 %v1118_v20, %v3857_v12  ;;  %v4191_v12 = vld [vmem:[%s4174_s16 + $0x10] sm:$0xff]  ;;  %v4284_v63 = vld [vmem:[%s4174_s16 + $0xa8] sm:$0xff]  ;;  %v4294_v27 = vld [vmem:[%s4174_s16 + $0xb8] sm:$0xff] }
 0x19b   : > { %v1069_v47 = vpop.permute.xlu1 %1068 }
 0x19c   : > { %5885 = vst [vmem:[#allocation36_spill] sm:$0xff] %v4145_v24  ;;  %v1115_v48 = vmul.f32 %v3839_v49, %v1069_v47  ;;  %1267 = vrot.lane.b32.xlu1 %v4145_v24, %s3303_s13  ;;  %1269 = vrot.lane.b32.xlu0 %v4142_v38, %s3303_s13  ;;  %5889 = vst [vmem:[#allocation9_spill] sm:$0xff] %v4165_v37  ;;  %v4311_v47 = vld [vmem:[%s4174_s16 + $0xd0] sm:$0xff] }
 0x19e   : > { %v4157_v55 = vadd.f32 %v1115_v48, %v5887_v26  ;;  %v4314_v48 = vld [vmem:[%s4174_s16 + $0xd8] sm:$0xff] }
 0x19f   : > { %v1077_v19 = vpop.permute.xlu1 %1076 }
 0x1a0   : > { %5888 = vst [vmem:[#allocation23_spill] sm:$0xff] %v4157_v55  ;;  %v1117_v61 = vmul.f32 %v3839_v49, %v1077_v19  ;;  %1271 = vrot.lane.b32.xlu1 %v4157_v55, %s3303_s13  ;;  %1273 = vrot.lane.b32.xlu0 %v4153_v56, %s3303_s13  ;;  %v4181_v49 = vld [vmem:[%s4174_s16] sm:$0xff] }
 0x1a1   : > { %v4325_v19 = vld [vmem:[%s4174_s16 + $0xe0] sm:$0xff] }
 0x1a2   : > { %v4168_v8 = vadd.f32 %v1117_v61, %v3841_v13  ;;  %v4184_v13 = vld [vmem:[%s4174_s16 + $0x8] sm:$0xff] }
 0x1a3   : > { %v4328_v61 = vld [vmem:[%s4174_s16 + $0xe8] sm:$0xff] }
 0x1a4   : > { %5890 = vst [vmem:[#allocation10_spill] sm:$0xff] %v4168_v8  ;;  %1275 = vrot.lane.b32.xlu1 %v4168_v8, %s3303_s13  ;;  %1277 = vrot.lane.b32.xlu0 %v4165_v37, %s3303_s13  ;;  %5896 = vst [vmem:[#allocation12_spill] sm:$0xff] %v4328_v61 }
 0x1a8   : > { %1375 = vrot.lane.b32.xlu1 %v4181_v49, %s3304_s17  ;;  %1377 = vrot.lane.b32.xlu0 %v4184_v13, %s3304_s17 }
 0x1ac   : > { %1379 = vrot.lane.b32.xlu1 %v4191_v12, %s3304_s17  ;;  %1381 = vrot.lane.b32.xlu0 %v4194_v33, %s3304_s17 }
 0x1b0   : > { %1383 = vrot.lane.b32.xlu1 %v4201_v43, %s3304_s17  ;;  %1385 = vrot.lane.b32.xlu0 %v4204_v44, %s3304_s17 }
 0x1b4   : > { %1387 = vrot.lane.b32.xlu1 %v4211_v18, %s3304_s17  ;;  %1389 = vrot.lane.b32.xlu0 %v4214_v14, %s3304_s17 }
 0x1b8   : > { %1391 = vrot.lane.b32.xlu1 %v4221_v9, %s3304_s17  ;;  %1393 = vrot.lane.b32.xlu0 %v4224_v30, %s3304_s17 }
 0x1bc   : > { %1395 = vrot.lane.b32.xlu1 %v4231_v11, %s3304_s17  ;;  %1397 = vrot.lane.b32.xlu0 %v4234_v2, %s3304_s17 }
 0x1c0   : > { %1399 = vrot.lane.b32.xlu1 %v4241_v5, %s3304_s17  ;;  %1401 = vrot.lane.b32.xlu0 %v4244_v1, %s3304_s17 }
 0x1c4   : > { %1403 = vrot.lane.b32.xlu1 %v4251_v21, %s3304_s17  ;;  %1405 = vrot.lane.b32.xlu0 %v4254_v22, %s3304_s17 }
 0x1c8   : > { %1407 = vrot.lane.b32.xlu1 %v4261_v4, %s3304_s17  ;;  %1409 = vrot.lane.b32.xlu0 %v4264_v46, %s3304_s17 }
 0x1cc   : > { %1411 = vrot.lane.b32.xlu1 %v4271_v17, %s3304_s17  ;;  %1413 = vrot.lane.b32.xlu0 %v4274_v32, %s3304_s17 }
 0x1d0   : > { %1415 = vrot.lane.b32.xlu1 %v4281_v7, %s3304_s17  ;;  %1417 = vrot.lane.b32.xlu0 %v4284_v63, %s3304_s17 }
 0x1d2   : > { %v4316_v20 = vpop.permute.xlu1 %1215 }
 0x1d3   : > { %5894 = vst [vmem:[#allocation25_spill] sm:$0xff] %v4316_v20  ;;  %v4342_v20 = vld [vmem:[%s4174_s16 + $0xf8] sm:$0xff] }
 0x1d4   : > { %1419 = vrot.lane.b32.xlu1 %v4291_v53, %s3304_s17  ;;  %1421 = vrot.lane.b32.xlu0 %v4294_v27, %s3304_s17 }
 0x1d8   : > { %1423 = vrot.lane.b32.xlu1 %v4301_v6, %s3304_s17  ;;  %1425 = vrot.lane.b32.xlu0 %v4304_v3, %s3304_s17 }
 0x1da   : > { %v4318_v26 = vpop.permute.xlu0 %1217 }
 0x1db   : > { %5895 = vst [vmem:[#allocation11_spill] sm:$0xff] %v4318_v26  ;;  %v4339_v26 = vld [vmem:[%s4174_s16 + $0xf0] sm:$0xff] }
 0x1dc   : > { %1427 = vrot.lane.b32.xlu1 %v4311_v47, %s3304_s17  ;;  %1429 = vrot.lane.b32.xlu0 %v4314_v48, %s3304_s17 }
 0x1de   : > { %v4330_v22 = vpop.permute.xlu1 %1219  ;;  %v4332_v21 = vpop.permute.xlu0 %1221 }
 0x1df   : > { %5897 = vst [vmem:[#allocation37_spill] sm:$0xff] %v4330_v22  ;;  %5898 = vst [vmem:[#allocation40_spill] sm:$0xff] %v4332_v21 }
 0x1e0   : > { %1431 = vrot.lane.b32.xlu1 %v4325_v19, %s3304_s17  ;;  %1433 = vrot.lane.b32.xlu0 %v4328_v61, %s3304_s17 }
 0x1e2   : > { %v4344_v1 = vpop.permute.xlu1 %1223  ;;  %v4346_v37 = vpop.permute.xlu0 %1225 }
 0x1e3   : > { %5899 = vst [vmem:[#allocation26_spill] sm:$0xff] %v4344_v1  ;;  %5900 = vst [vmem:[#allocation27_spill] sm:$0xff] %v4346_v37 }
 0x1e4   : > { %1435 = vrot.lane.b32.xlu1 %v4339_v26, %s3304_s17  ;;  %1437 = vrot.lane.b32.xlu0 %v4342_v20, %s3304_s17 }
 0x1e6   : > { %v4352_v21 = vpop.permute.xlu1 %1227  ;;  %v4354_v22 = vpop.permute.xlu0 %1229 }
 0x1e7   : > { %5901 = vst [vmem:[#allocation13_spill] sm:$0xff] %v4352_v21  ;;  %5902 = vst [vmem:[#allocation14_spill] sm:$0xff] %v4354_v22 }
 0x1e8   : > { %1503 = vrot.lane.b32.xlu1 %v3849_v50, %s3304_s17  ;;  %1505 = vrot.lane.b32.xlu0 %v3877_v60, %s3304_s17 }
 0x1ea   : > { %v4360_v61 = vpop.permute.xlu1 %1231  ;;  %v4362_v1 = vpop.permute.xlu0 %1233 }
 0x1eb   : > { %5903 = vst [vmem:[#allocation39_spill] sm:$0xff] %v4360_v61  ;;  %5904 = vst [vmem:[#allocation42_spill] sm:$0xff] %v4362_v1 }
 0x1ec   : > { %1507 = vrot.lane.b32.xlu1 %v3897_v62, %s3304_s17  ;;  %1509 = vrot.lane.b32.xlu0 %v3894_v16, %s3304_s17 }
 0x1ee   : > { %v4368_v37 = vpop.permute.xlu1 %1235  ;;  %v4370_v21 = vpop.permute.xlu0 %1237 }
 0x1ef   : > { %5905 = vst [vmem:[#allocation28_spill] sm:$0xff] %v4368_v37  ;;  %5906 = vst [vmem:[#allocation29_spill] sm:$0xff] %v4370_v21 }
 0x1f0   : > { %1511 = vrot.lane.b32.xlu1 %v3919_v58, %s3304_s17  ;;  %1513 = vrot.lane.b32.xlu0 %v3916_v59, %s3304_s17 }
 0x1f2   : > { %v4376_v22 = vpop.permute.xlu1 %1239  ;;  %v4378_v61 = vpop.permute.xlu0 %1241 }
 0x1f3   : > { %5907 = vst [vmem:[#allocation15_spill] sm:$0xff] %v4376_v22  ;;  %5908 = vst [vmem:[#allocation16_spill] sm:$0xff] %v4378_v61 }
 0x1f4   : > { %1515 = vrot.lane.b32.xlu1 %v3941_v51, %s3304_s17  ;;  %1517 = vrot.lane.b32.xlu0 %v3938_v57, %s3304_s17 }
 0x1f6   : > { %v4384_v1 = vpop.permute.xlu1 %1243  ;;  %v4386_v37 = vpop.permute.xlu0 %1245 }
 0x1f7   : > { %5909 = vst [vmem:[#allocation41_spill] sm:$0xff] %v4384_v1  ;;  %5910 = vst [vmem:[#allocation44_spill] sm:$0xff] %v4386_v37 }
 0x1f8   : > { %1535 = vrot.lane.b32.xlu1 %v4051_v40, %s3304_s17  ;;  %1537 = vrot.lane.b32.xlu0 %v4048_v15, %s3304_s17 }
 0x1fa   : > { %v4392_v21 = vpop.permute.xlu1 %1247  ;;  %v4394_v22 = vpop.permute.xlu0 %1249 }
 0x1fc   : > { %1539 = vrot.lane.b32.xlu1 %v4073_v34, %s3304_s17  ;;  %1695 = vrot.lane.b32.xlu0 %v4181_v49, %s3303_s13 }
 0x1fe   : > { %v4400_v61 = vpop.permute.xlu1 %1251  ;;  %v4402_v1 = vpop.permute.xlu0 %1253 }
 0x200   : > { %1727 = vrot.lane.b32.xlu1 %v4261_v4, %s3303_s13  ;;  %1541 = vrot.lane.b32.xlu0 %v4070_v0, %s3304_s17 }
 0x202   : > { %v4408_v37 = vpop.permute.xlu1 %1255  ;;  %v4410_v57 = vpop.permute.xlu0 %1257 }
 0x203   : > { %5911 = vst [vmem:[#allocation30_spill] sm:$0xff] %v4408_v37  ;;  %5912 = vst [vmem:[#allocation31_spill] sm:$0xff] %v4410_v57 }
 0x204   : > { %1697 = vrot.lane.b32.xlu1 %v4184_v13, %s3303_s13  ;;  %1729 = vrot.lane.b32.xlu0 %v4264_v46, %s3303_s13 }
 0x206   : > { %v4416_v51 = vpop.permute.xlu1 %1259  ;;  %v4418_v59 = vpop.permute.xlu0 %1261 }
 0x207   : > { %5913 = vst [vmem:[#allocation17_spill] sm:$0xff] %v4416_v51  ;;  %5914 = vst [vmem:[#allocation18_spill] sm:$0xff] %v4418_v59 }
 0x208   : > { %1855 = vrot.lane.b32.xlu1 %v4181_v49, %s3305_s23  ;;  %1887 = vrot.lane.b32.xlu0 %v4261_v4, %s3305_s23 }
 0x20a   : > { %v4424_v37 = vpop.permute.xlu1 %1263  ;;  %v4426_v57 = vpop.permute.xlu0 %1265 }
 0x20b   : > { %5915 = vst [vmem:[#allocation43_spill] sm:$0xff] %v4424_v37  ;;  %5916 = vst [vmem:[#allocation46_spill] sm:$0xff] %v4426_v57 }
 0x20c   : > { %1857 = vrot.lane.b32.xlu1 %v4184_v13, %s3305_s23  ;;  %1889 = vrot.lane.b32.xlu0 %v4264_v46, %s3305_s23 }
 0x20e   : > { %v4432_v51 = vpop.permute.xlu1 %1267  ;;  %v4434_v59 = vpop.permute.xlu0 %1269 }
 0x20f   : > { %5917 = vst [vmem:[#allocation45_spill] sm:$0xff] %v4432_v51  ;;  %5918 = vst [vmem:[#allocation53_spill] sm:$0xff] %v4434_v59 }
 0x210   : > { %1543 = vrot.lane.b32.xlu1 %v4095_v29, %s3304_s17  ;;  %1699 = vrot.lane.b32.xlu0 %v4191_v12, %s3303_s13 }
 0x212   : > { %v4440_v49 = vpop.permute.xlu1 %1271  ;;  %v4442_v4 = vpop.permute.xlu0 %1273 }
 0x213   : > { %5919 = vst [vmem:[#allocation54_spill] sm:$0xff] %v4440_v49  ;;  %5920 = vst [vmem:[#allocation55_spill] sm:$0xff] %v4442_v4 }
 0x214   : > { %1731 = vrot.lane.b32.xlu1 %v4271_v17, %s3303_s13  ;;  %1545 = vrot.lane.b32.xlu0 %v4092_v45, %s3304_s17 }
 0x216   : > { %v4448_v13 = vpop.permute.xlu1 %1275  ;;  %v4450_v46 = vpop.permute.xlu0 %1277 }
 0x217   : > { %5921 = vst [vmem:[#allocation56_spill] sm:$0xff] %v4448_v13  ;;  %5922 = vst [vmem:[#allocation57_spill] sm:$0xff] %v4450_v46 }
 0x218   : > { %1701 = vrot.lane.b32.xlu1 %v4194_v33, %s3303_s13  ;;  %1733 = vrot.lane.b32.xlu0 %v4274_v32, %s3303_s13 }
 0x21a   : > { %v4456_v59 = vpop.permute.xlu1 %1375  ;;  %v4458_v49 = vpop.permute.xlu0 %1377 }
 0x21c   : > { %1859 = vrot.lane.b32.xlu1 %v4191_v12, %s3305_s23  ;;  %1891 = vrot.lane.b32.xlu0 %v4271_v17, %s3305_s23 }
 0x21e   : > { %v4464_v4 = vpop.permute.xlu1 %1379  ;;  %v4466_v13 = vpop.permute.xlu0 %1381 }
 0x220   : > { %1861 = vrot.lane.b32.xlu1 %v4194_v33, %s3305_s23  ;;  %1893 = vrot.lane.b32.xlu0 %v4274_v32, %s3305_s23 }
 0x222   : > { %v4472_v46 = vpop.permute.xlu1 %1383  ;;  %v4474_v51 = vpop.permute.xlu0 %1385 }
 0x223   : > { %5923 = vst [vmem:[#allocation58_spill] sm:$0xff] %v4474_v51  ;;  %v1328_v51 = vadd.f32 %v4394_v22, %v4048_v15 }
 0x224   : > { %1547 = vrot.lane.b32.xlu1 %v4117_v35, %s3304_s17  ;;  %1703 = vrot.lane.b32.xlu0 %v4201_v43, %s3303_s13  ;;  %v5954_v35 = vld [vmem:[#allocation38_spill] sm:$0xff] }
 0x226   : > { %v4480_v12 = vpop.permute.xlu1 %1387  ;;  %v4482_v17 = vpop.permute.xlu0 %1389 }
 0x227   : > { %5924 = vst [vmem:[#allocation59_spill] sm:$0xff] %v4480_v12  ;;  %5925 = vst [vmem:[#allocation60_spill] sm:$0xff] %v4482_v17 }
 0x228   : > { %1735 = vrot.lane.b32.xlu1 %v4281_v7, %s3303_s13  ;;  %1549 = vrot.lane.b32.xlu0 %v4114_v31, %s3304_s17 }
 0x22a   : > { %v4488_v33 = vpop.permute.xlu1 %1391  ;;  %v4490_v32 = vpop.permute.xlu0 %1393 }
 0x22b   : > { %5926 = vst [vmem:[#allocation61_spill] sm:$0xff] %v4488_v33  ;;  %5927 = vst [vmem:[#allocation62_spill] sm:$0xff] %v4490_v32 }
 0x22c   : > { %1705 = vrot.lane.b32.xlu1 %v4204_v44, %s3303_s13  ;;  %1737 = vrot.lane.b32.xlu0 %v4284_v63, %s3303_s13 }
 0x22e   : > { %v4496_v57 = vpop.permute.xlu1 %1395  ;;  %v4498_v37 = vpop.permute.xlu0 %1397 }
 0x22f   : > { %5928 = vst [vmem:[#allocation63_spill] sm:$0xff] %v4496_v57  ;;  %5929 = vst [vmem:[#allocation64_spill] sm:$0xff] %v4498_v37 }
 0x230   : > { %1863 = vrot.lane.b32.xlu1 %v4201_v43, %s3305_s23  ;;  %1895 = vrot.lane.b32.xlu0 %v4281_v7, %s3305_s23 }
 0x232   : > { %v4504_v17 = vpop.permute.xlu1 %1399  ;;  %v4506_v33 = vpop.permute.xlu0 %1401 }
 0x233   : > { %5930 = vst [vmem:[#allocation65_spill] sm:$0xff] %v4504_v17  ;;  %5931 = vst [vmem:[#allocation66_spill] sm:$0xff] %v4506_v33 }
 0x234   : > { %1865 = vrot.lane.b32.xlu1 %v4204_v44, %s3305_s23  ;;  %1897 = vrot.lane.b32.xlu0 %v4284_v63, %s3305_s23 }
 0x236   : > { %v4512_v32 = vpop.permute.xlu1 %1403  ;;  %v4514_v57 = vpop.permute.xlu0 %1405 }
 0x237   : > { %5932 = vst [vmem:[#allocation67_spill] sm:$0xff] %v4512_v32  ;;  %5933 = vst [vmem:[#allocation68_spill] sm:$0xff] %v4514_v57 }
 0x238   : > { %1519 = vrot.lane.b32.xlu1 %v3963_v10, %s3304_s17  ;;  %1551 = vrot.lane.b32.xlu0 %v4135_v28, %s3304_s17 }
 0x23a   : > { %v4520_v43 = vpop.permute.xlu1 %1407  ;;  %v4522_v7 = vpop.permute.xlu0 %1409 }
 0x23c   : > { %1707 = vrot.lane.b32.xlu1 %v4211_v18, %s3303_s13  ;;  %1739 = vrot.lane.b32.xlu0 %v4291_v53, %s3303_s13 }
 0x23e   : > { %v4528_v44 = vpop.permute.xlu1 %1411  ;;  %v4530_v63 = vpop.permute.xlu0 %1413 }
 0x240   : > { %1521 = vrot.lane.b32.xlu1 %v3960_v36, %s3304_s17  ;;  %1553 = vrot.lane.b32.xlu0 %v4132_v54, %s3304_s17 }
 0x242   : > { %v4536_v57 = vpop.permute.xlu1 %1415  ;;  %v4538_v32 = vpop.permute.xlu0 %1417 }
 0x243   : > { %5934 = vst [vmem:[#allocation69_spill] sm:$0xff] %v4538_v32 }
 0x244   : > { %1709 = vrot.lane.b32.xlu1 %v4214_v14, %s3303_s13  ;;  %1741 = vrot.lane.b32.xlu0 %v4294_v27, %s3303_s13 }
 0x246   : > { %v4544_v33 = vpop.permute.xlu1 %1419  ;;  %v4546_v17 = vpop.permute.xlu0 %1421 }
 0x247   : > { %5935 = vst [vmem:[#allocation70_spill] sm:$0xff] %v4544_v33  ;;  %5936 = vst [vmem:[#allocation71_spill] sm:$0xff] %v4546_v17  ;;  %v5951_v17 = vld [vmem:[#allocation12_spill] sm:$0xff] }
 0x248   : > { %1867 = vrot.lane.b32.xlu1 %v4211_v18, %s3305_s23  ;;  %1899 = vrot.lane.b32.xlu0 %v4291_v53, %s3305_s23 }
 0x24a   : > { %v4552_v37 = vpop.permute.xlu1 %1423  ;;  %v4554_v54 = vpop.permute.xlu0 %1425 }
 0x24b   : > { %5937 = vst [vmem:[#allocation72_spill] sm:$0xff] %v4552_v37  ;;  %5938 = vst [vmem:[#allocation73_spill] sm:$0xff] %v4554_v54 }
 0x24c   : > { %1869 = vrot.lane.b32.xlu1 %v4214_v14, %s3305_s23  ;;  %1901 = vrot.lane.b32.xlu0 %v4294_v27, %s3305_s23 }
 0x24e   : > { %v4560_v36 = vpop.permute.xlu1 %1427  ;;  %v4562_v28 = vpop.permute.xlu0 %1429 }
 0x24f   : > { %5939 = vst [vmem:[#allocation74_spill] sm:$0xff] %v4560_v36  ;;  %5940 = vst [vmem:[#allocation75_spill] sm:$0xff] %v4562_v28 }
 0x250   : > { %1523 = vrot.lane.b32.xlu1 %v3985_v52, %s3304_s17  ;;  %1555 = vrot.lane.b32.xlu0 %v4145_v24, %s3304_s17 }
 0x252   : > { %v4568_v18 = vpop.permute.xlu1 %1431  ;;  %v4570_v53 = vpop.permute.xlu0 %1433 }
 0x253   : > { %5941 = vst [vmem:[#allocation76_spill] sm:$0xff] %v4568_v18  ;;  %5942 = vst [vmem:[#allocation77_spill] sm:$0xff] %v4570_v53 }
 0x254   : > { %1711 = vrot.lane.b32.xlu1 %v4221_v9, %s3303_s13  ;;  %1743 = vrot.lane.b32.xlu0 %v4301_v6, %s3303_s13 }
 0x256   : > { %v4576_v14 = vpop.permute.xlu1 %1435  ;;  %v4578_v27 = vpop.permute.xlu0 %1437 }
 0x257   : > { %5943 = vst [vmem:[#allocation78_spill] sm:$0xff] %v4576_v14  ;;  %5944 = vst [vmem:[#allocation79_spill] sm:$0xff] %v4578_v27 }
 0x258   : > { %1525 = vrot.lane.b32.xlu1 %v3982_v25, %s3304_s17  ;;  %1557 = vrot.lane.b32.xlu0 %v4142_v38, %s3304_s17 }
 0x25a   : > { %v4584_v28 = vpop.permute.xlu1 %1503  ;;  %v4586_v18 = vpop.permute.xlu0 %1505 }
 0x25c   : > { %1713 = vrot.lane.b32.xlu1 %v4224_v30, %s3303_s13  ;;  %1745 = vrot.lane.b32.xlu0 %v4304_v3, %s3303_s13 }
 0x25e   : > { %v4592_v53 = vpop.permute.xlu1 %1507  ;;  %v4594_v14 = vpop.permute.xlu0 %1509 }
 0x260   : > { %1871 = vrot.lane.b32.xlu1 %v4221_v9, %s3305_s23  ;;  %1903 = vrot.lane.b32.xlu0 %v4301_v6, %s3305_s23 }
 0x262   : > { %v4600_v27 = vpop.permute.xlu1 %1511  ;;  %v4602_v38 = vpop.permute.xlu0 %1513 }
 0x263   : > { %5945 = vst [vmem:[#allocation80_spill] sm:$0xff] %v4602_v38 }
 0x264   : > { %1873 = vrot.lane.b32.xlu1 %v4224_v30, %s3305_s23  ;;  %1905 = vrot.lane.b32.xlu0 %v4304_v3, %s3305_s23 }
 0x266   : > { %v4608_v25 = vpop.permute.xlu1 %1515  ;;  %v4610_v36 = vpop.permute.xlu0 %1517 }
 0x267   : > { %5946 = vst [vmem:[#allocation81_spill] sm:$0xff] %v4608_v25  ;;  %5947 = vst [vmem:[#allocation82_spill] sm:$0xff] %v4610_v36  ;;  %v5950_v36 = vld [vmem:[#allocation35_spill] sm:$0xff] }
 0x268   : > { %1527 = vrot.lane.b32.xlu1 %v4007_v39, %s3304_s17  ;;  %1559 = vrot.lane.b32.xlu0 %v4157_v55, %s3304_s17 }
 0x26a   : > { %v1536_v9 = vpop.permute.xlu1 %1535  ;;  %v4616_v6 = vpop.permute.xlu0 %1537 }
 0x26c   : > { %1715 = vrot.lane.b32.xlu1 %v4231_v11, %s3303_s13  ;;  %1747 = vrot.lane.b32.xlu0 %v4311_v47, %s3303_s13 }
 0x26e   : > { %v4622_v30 = vpop.permute.xlu1 %1539  ;;  %v4624_v3 = vpop.permute.xlu0 %1695 }
 0x270   : > { %1529 = vrot.lane.b32.xlu1 %v4004_v23, %s3304_s17  ;;  %1561 = vrot.lane.b32.xlu0 %v4153_v56, %s3304_s17 }
 0x272   : > { %v4630_v55 = vpop.permute.xlu1 %1727  ;;  %v4632_v39 = vpop.permute.xlu0 %1541 }
 0x274   : > { %1717 = vrot.lane.b32.xlu1 %v4234_v2, %s3303_s13  ;;  %1749 = vrot.lane.b32.xlu0 %v4314_v48, %s3303_s13 }
 0x276   : > { %v4638_v24 = vpop.permute.xlu1 %1697  ;;  %v4640_v52 = vpop.permute.xlu0 %1729 }
 0x278   : > { %1875 = vrot.lane.b32.xlu1 %v4231_v11, %s3305_s23  ;;  %1907 = vrot.lane.b32.xlu0 %v4311_v47, %s3305_s23 }
 0x27a   : > { %v4646_v56 = vpop.permute.xlu1 %1855  ;;  %v4648_v23 = vpop.permute.xlu0 %1887 }
 0x27c   : > { %1877 = vrot.lane.b32.xlu1 %v4234_v2, %s3305_s23  ;;  %1909 = vrot.lane.b32.xlu0 %v4314_v48, %s3305_s23 }
 0x27e   : > { %v4654_v54 = vpop.permute.xlu1 %1857  ;;  %v4656_v37 = vpop.permute.xlu0 %1889 }
 0x280   : > { %1531 = vrot.lane.b32.xlu1 %v4029_v42, %s3304_s17  ;;  %1563 = vrot.lane.b32.xlu0 %v4168_v8, %s3304_s17  ;;  %v5949_v42 = vld [vmem:[#allocation9_spill] sm:$0xff] }
 0x282   : > { %v4662_v11 = vpop.permute.xlu1 %1543  ;;  %v4664_v47 = vpop.permute.xlu0 %1699 }
 0x284   : > { %1719 = vrot.lane.b32.xlu1 %v4241_v5, %s3303_s13  ;;  %1751 = vrot.lane.b32.xlu0 %v4325_v19, %s3303_s13 }
 0x286   : > { %v4670_v2 = vpop.permute.xlu1 %1731  ;;  %v4672_v48 = vpop.permute.xlu0 %1545 }
 0x287   : > { %5948 = vst [vmem:[#allocation83_spill] sm:$0xff] %v4672_v48  ;;  %v1327_v48 = vadd.f32 %v4392_v21, %v4051_v40  ;;  %v2467_v40 = vld [vmem:[%s5719_s4 + $0x8] sm:$0xff] }
 0x288   : > { %1533 = vrot.lane.b32.xlu1 %v4026_v41, %s3304_s17  ;;  %1565 = vrot.lane.b32.xlu0 %v5949_v42, %s3304_s17 }
 0x28a   : > { %v4678_v8 = vpop.permute.xlu1 %1701  ;;  %v4680_v10 = vpop.permute.xlu0 %1733 }
 0x28c   : > { %1721 = vrot.lane.b32.xlu1 %v5950_v36, %s3303_s13  ;;  %1753 = vrot.lane.b32.xlu0 %v5951_v17, %s3303_s13 }
 0x28e   : > { %v4686_v31 = vpop.permute.xlu1 %1859  ;;  %v4688_v25 = vpop.permute.xlu0 %1891 }
 0x290   : > { %1879 = vrot.lane.b32.xlu1 %v4241_v5, %s3305_s23  ;;  %1911 = vrot.lane.b32.xlu0 %v4325_v19, %s3305_s23  ;;  %v5955_v5 = vld [vmem:[#allocation25_spill] sm:$0xff] }
 0x291   : > { %v1311_v19 = vadd.f32 %v5955_v5, %v3849_v50  ;;  %v2466_v50 = vld [vmem:[%s5719_s4] sm:$0xff] }
 0x292   : > { %v4694_v42 = vpop.permute.xlu1 %1861  ;;  %v4696_v41 = vpop.permute.xlu0 %1893 }
 0x294   : > { %1881 = vrot.lane.b32.xlu1 %v5950_v36, %s3305_s23  ;;  %1913 = vrot.lane.b32.xlu0 %v5951_v17, %s3305_s23  ;;  %v1471_v17 = vmul.f32 %v4456_v59, %v1311_v19 }
 0x296   : > { %v4702_v33 = vpop.permute.xlu1 %1547  ;;  %v4704_v12 = vpop.permute.xlu0 %1703  ;;  %v1599_v21 = vadd.f32 %v4584_v28, %v1471_v17  ;;  %v2468_v28 = vld [vmem:[%s5719_s4 + $0x10] sm:$0xff] }
 0x297   : > { %5952 = vst [vmem:[#allocation35_spill] sm:$0xff] %v4702_v33  ;;  %5953 = vst [vmem:[#allocation12_spill] sm:$0xff] %v4704_v12  ;;  %v1487_v33 = vmul.f32 %v4520_v43, %v1327_v48  ;;  %v5958_v12 = vld [vmem:[#allocation24_spill] sm:$0xff] }
 0x298   : > { %1723 = vrot.lane.b32.xlu1 %v5954_v35, %s3303_s13  ;;  %1755 = vrot.lane.b32.xlu0 %v4339_v26, %s3303_s13 }
 0x299   : > { %v1615_v5 = vadd.f32 %v1536_v9, %v1487_v33  ;;  %v2469_v33 = vld [vmem:[%s5719_s4 + $0x18] sm:$0xff] }
 0x29a   : > { %v4714_v36 = vpop.permute.xlu1 %1735  ;;  %v4716_v38 = vpop.permute.xlu0 %1549  ;;  %v3127_v15 = vpack.c.bf16 %v2469_v33, %v2468_v28 }
 0x29b   : > { %5956 = vst [vmem:[#allocation38_spill] sm:$0xff] %v4714_v36  ;;  %5957 = vst [vmem:[#allocation25_spill] sm:$0xff] %v4716_v38  ;;  %v3123_v38 = vpack.c.bf16 %v2467_v40, %v2466_v50  ;;  %v5959_v36 = vld [vmem:[#allocation11_spill] sm:$0xff] }
 0x29c   : > { %1725 = vrot.lane.b32.xlu1 %v5958_v12, %s3303_s13  ;;  %1757 = vrot.lane.b32.xlu0 %v4342_v20, %s3303_s13  ;;  %v1312_v32 = vadd.f32 %v5959_v36, %v3877_v60  ;;  %v1488_v36 = vmul.f32 %v4522_v7, %v1328_v51  ;;  %v2471_v51 = vld [vmem:[%s5719_s4 + $0x28] sm:$0xff] }
 0x29d   : > { %3124 = vmatprep.subr.bf16.mxu0 %v3123_v38  ;;  %3139 = vmatprep.subr.bf16.mxu1 %v3123_v38 }
 0x29e   : > { %v4731_v19 = vpop.permute.xlu1 %1705  ;;  %v4733_v48 = vpop.permute.xlu0 %1737  ;;  %3126 = vmatpush3.bf16.msra.mxu0 %v3123_v38  ;;  %3143 = vmatpush3.bf16.msra.mxu1 %v3123_v38  ;;  %v1472_v22 = vmul.f32 %v4458_v49, %v1312_v32  ;;  %v1616_v50 = vadd.f32 %v4616_v6, %v1488_v36  ;;  %v2470_v38 = vld [vmem:[%s5719_s4 + $0x20] sm:$0xff] }
 0x29f   : > { %3128 = vmatprep.subr.bf16.mxu0 %v3127_v15  ;;  %3140 = vmatprep.subr.bf16.mxu1 %v3127_v15  ;;  %v3131_v6 = vpack.c.bf16 %v2471_v51, %v2470_v38  ;;  %v1329_v51 = vadd.f32 %v4400_v61, %v4073_v34 }
 0x2a0   : > { %1883 = vrot.lane.b32.xlu1 %v5954_v35, %s3305_s23  ;;  %1915 = vrot.lane.b32.xlu0 %v4339_v26, %s3305_s23  ;;  %v4750_v35 = vmul.f32 %v1599_v21, %v4456_v59  ;;  %v4753_v26 = vmul.f32 %v1615_v5, %v4520_v43  ;;  %v1600_v17 = vadd.f32 %v4586_v18, %v1472_v22 }
 0x2a1   : > { %v4787_v21 = vmul.f32 %v1616_v50, %v4522_v7  ;;  %v5960_v50 = vld [vmem:[#allocation37_spill] sm:$0xff] }
 0x2a2   : > { %v4755_v60 = vpop.permute.xlu1 %1863  ;;  %v4757_v9 = vpop.permute.xlu0 %1895  ;;  %v1679_v18 = vmul.f32 %v4753_v26, %v4520_v43  ;;  %3130 = vmatpush3.bf16.msra.mxu0 %v3127_v15  ;;  %3144 = vmatpush3.bf16.msra.mxu1 %v3127_v15  ;;  %v4784_v40 = vmul.f32 %v1600_v17, %v4458_v49  ;;  %v2473_v43 = vld [vmem:[%s5719_s4 + $0x38] sm:$0xff]  ;;  %v1791_v5 = vmul.f32 %v4624_v3, %v4750_v35 }
 0x2a3   : > { %3132 = vmatprep.subr.bf16.mxu0 %v3131_v6  ;;  %3141 = vmatprep.subr.bf16.mxu1 %v3131_v6  ;;  %v1807_v28 = vmul.f32 %v4630_v55, %v4753_v26  ;;  %v1680_v55 = vmul.f32 %v4787_v21, %v4522_v7  ;;  %v1313_v38 = vadd.f32 %v5960_v50, %v3897_v62 }
 0x2a4   : > { %1885 = vrot.lane.b32.xlu1 %v5958_v12, %s3305_s23  ;;  %1917 = vrot.lane.b32.xlu0 %v4342_v20, %s3305_s23  ;;  %v1663_v20 = vmul.f32 %v4750_v35, %v4456_v59  ;;  %v2472_v59 = vld [vmem:[%s5719_s4 + $0x30] sm:$0xff]  ;;  %v1664_v3 = vmul.f32 %v4784_v40, %v4458_v49  ;;  %v1808_v7 = vmul.f32 %v4640_v52, %v4787_v21 }
 0x2a5   : > { %v3135_v22 = vpack.c.bf16 %v2473_v43, %v2472_v59  ;;  %v1489_v59 = vmul.f32 %v4528_v44, %v1329_v51  ;;  %v1967_v52 = vmul.f32 %v4648_v23, %v4753_v26  ;;  %v1952_v23 = vmul.f32 %v4654_v54, %v4784_v40 }
 0x2a6   : > { %v4773_v32 = vpop.permute.xlu1 %1865  ;;  %v4775_v12 = vpop.permute.xlu0 %1897  ;;  %3134 = vmatpush3.bf16.msra.mxu0 %v3131_v6  ;;  %3145 = vmatpush3.bf16.msra.mxu1 %v3131_v6  ;;  %v1473_v6 = vmul.f32 %v4464_v4, %v1313_v38 }
 0x2a7   : > { %3136 = vmatprep.subr.bf16.mxu0 %v3135_v22  ;;  %3142 = vmatprep.subr.bf16.mxu1 %v3135_v22  ;;  %v1617_v34 = vadd.f32 %v4622_v30, %v1489_v59 }
 0x2a8   : > { %2015 = vrot.lane.b32.xlu1 %v1663_v20, %s3306_s26  ;;  %2047 = vrot.lane.b32.xlu0 %v1679_v18, %s3306_s26  ;;  %v1792_v20 = vmul.f32 %v4638_v24, %v4784_v40  ;;  %v1601_v62 = vadd.f32 %v4592_v53, %v1473_v6  ;;  %v1951_v24 = vmul.f32 %v4646_v56, %v4750_v35 }
 0x2a9   : > { %v1330_v53 = vadd.f32 %v4402_v1, %v4070_v0  ;;  %v4851_v56 = vmul.f32 %v1617_v34, %v4528_v44 }
 0x2aa   : > { %v4799_v33 = vpop.permute.xlu1 %1519  ;;  %v4801_v15 = vpop.permute.xlu0 %1551  ;;  %3138 = vmatpush3.bf16.msra.mxu0 %v3135_v22  ;;  %3146 = vmatpush3.bf16.msra.mxu1 %v3135_v22  ;;  %v4848_v30 = vmul.f32 %v1601_v62, %v4464_v4  ;;  %v1968_v22 = vmul.f32 %v4656_v37, %v4787_v21 }
 0x2ab   : > { %v1490_v0 = vmul.f32 %v4530_v63, %v1330_v53  ;;  %v1681_v51 = vmul.f32 %v4851_v56, %v4528_v44 }
 0x2ac   : > { %2175 = vrot.lane.b32.xlu0 %v1807_v28, %s3305_s23  ;;  %2143 = vrot.lane.b32.xlu1 %v1791_v5, %s3305_s23  ;;  %v5961_v5 = vld [vmem:[#allocation40_spill] sm:$0xff]  ;;  %v1665_v37 = vmul.f32 %v4848_v30, %v4464_v4 }
 0x2ad   : > { %v1314_v28 = vadd.f32 %v5961_v5, %v3894_v16  ;;  %v1618_v50 = vadd.f32 %v4632_v39, %v1490_v0  ;;  %v1793_v39 = vmul.f32 %v4664_v47, %v4848_v30  ;;  %v5964_v0 = vld [vmem:[#allocation47_spill] sm:$0xff] }
 0x2ae   : > { %v4805_v36 = vpop.permute.xlu1 %1707  ;;  %v4807_v17 = vpop.permute.xlu0 %1739 }
 0x2af   : > { %v1474_v16 = vmul.f32 %v4466_v13, %v1314_v28 }
 0x2b0   : > { %2049 = vrot.lane.b32.xlu0 %v1680_v55, %s3306_s26  ;;  %2017 = vrot.lane.b32.xlu1 %v1664_v3, %s3306_s26 }
 0x2b1   : > { %v1602_v1 = vadd.f32 %v4594_v14, %v1474_v16  ;;  %v4881_v14 = vmul.f32 %v1618_v50, %v4530_v63 }
 0x2b2   : > { %v4823_v18 = vpop.permute.xlu1 %1521  ;;  %v4825_v49 = vpop.permute.xlu0 %1553 }
 0x2b3   : > { %v1682_v62 = vmul.f32 %v4881_v14, %v4530_v63  ;;  %v1810_v28 = vmul.f32 %v4680_v10, %v4881_v14  ;;  %v1969_v10 = vmul.f32 %v4688_v25, %v4851_v56 }
 0x2b4   : > { %2145 = vrot.lane.b32.xlu1 %v1792_v20, %s3305_s23  ;;  %2177 = vrot.lane.b32.xlu0 %v1808_v7, %s3305_s23  ;;  %v4878_v20 = vmul.f32 %v1602_v1, %v4466_v13  ;;  %v1809_v7 = vmul.f32 %v4670_v2, %v4851_v56  ;;  %v5962_v2 = vld [vmem:[#allocation26_spill] sm:$0xff]  ;;  %v5965_v1 = vld [vmem:[#allocation27_spill] sm:$0xff] }
 0x2b5   : > { %v1315_v34 = vadd.f32 %v5962_v2, %v3919_v58  ;;  %v1316_v50 = vadd.f32 %v5965_v1, %v5964_v0  ;;  %v5970_v2 = vld [vmem:[#allocation69_spill] sm:$0xff] }
 0x2b6   : > { %v4837_v61 = vpop.permute.xlu1 %1709  ;;  %v4839_v43 = vpop.permute.xlu0 %1741  ;;  %v1666_v47 = vmul.f32 %v4878_v20, %v4466_v13  ;;  %v1794_v5 = vmul.f32 %v4678_v8, %v4878_v20  ;;  %v1953_v8 = vmul.f32 %v4686_v31, %v4848_v30  ;;  %v1954_v25 = vmul.f32 %v4694_v42, %v4878_v20 }
 0x2b7   : > { %v1475_v13 = vmul.f32 %v4472_v46, %v1315_v34  ;;  %v5971_v34 = vld [vmem:[#allocation80_spill] sm:$0xff] }
 0x2b8   : > { %2271 = vrot.lane.b32.xlu1 %v1951_v24, %s3303_s13  ;;  %2303 = vrot.lane.b32.xlu0 %v1967_v52, %s3303_s13  ;;  %v5963_v24 = vld [vmem:[#allocation30_spill] sm:$0xff] }
 0x2b9   : > { %v1331_v52 = vadd.f32 %v5963_v24, %v4095_v29  ;;  %v1603_v58 = vadd.f32 %v4600_v27, %v1475_v13  ;;  %v5966_v27 = vld [vmem:[#allocation31_spill] sm:$0xff] }
 0x2ba   : > { %v4857_v55 = vpop.permute.xlu1 %1867  ;;  %v4859_v3 = vpop.permute.xlu0 %1899 }
 0x2bc   : > { %2273 = vrot.lane.b32.xlu1 %v1952_v23, %s3303_s13  ;;  %2305 = vrot.lane.b32.xlu0 %v1968_v22, %s3303_s13  ;;  %v1491_v23 = vmul.f32 %v4536_v57, %v1331_v52  ;;  %v5972_v52 = vld [vmem:[#allocation83_spill] sm:$0xff] }
 0x2be   : > { %v4867_v54 = vpop.permute.xlu1 %1869  ;;  %v4869_v38 = vpop.permute.xlu0 %1901  ;;  %v1619_v29 = vadd.f32 %v4662_v11, %v1491_v23  ;;  %v1332_v11 = vadd.f32 %v5966_v27, %v4092_v45 }
 0x2c0   : > { %2019 = vrot.lane.b32.xlu1 %v1665_v37, %s3306_s26  ;;  %2051 = vrot.lane.b32.xlu0 %v1681_v51, %s3306_s26  ;;  %v4936_v37 = vmul.f32 %v1603_v58, %v4472_v46  ;;  %v4939_v31 = vmul.f32 %v1619_v29, %v4536_v57  ;;  %v1970_v51 = vmul.f32 %v4696_v41, %v4881_v14  ;;  %v5975_v29 = vld [vmem:[#allocation12_spill] sm:$0xff] }
 0x2c1   : > { %v1492_v45 = vmul.f32 %v5970_v2, %v1332_v11 }
 0x2c2   : > { %v4887_v4 = vpop.permute.xlu1 %1523  ;;  %v4889_v6 = vpop.permute.xlu0 %1555  ;;  %5967 = vst [vmem:[#allocation24_spill] sm:$0xff] %v4936_v37  ;;  %5968 = vst [vmem:[#allocation11_spill] sm:$0xff] %v4939_v31  ;;  %v1667_v41 = vmul.f32 %v4936_v37, %v4472_v46  ;;  %v1683_v13 = vmul.f32 %v4939_v31, %v4536_v57 }
 0x2c4   : > { %2179 = vrot.lane.b32.xlu0 %v1809_v7, %s3305_s23  ;;  %2147 = vrot.lane.b32.xlu1 %v1793_v39, %s3305_s23 }
 0x2c6   : > { %v4893_v44 = vpop.permute.xlu1 %1711  ;;  %v4895_v59 = vpop.permute.xlu0 %1743 }
 0x2c8   : > { %2053 = vrot.lane.b32.xlu0 %v1682_v62, %s3306_s26  ;;  %2021 = vrot.lane.b32.xlu1 %v1666_v47, %s3306_s26  ;;  %v5969_v62 = vld [vmem:[#allocation58_spill] sm:$0xff] }
 0x2c9   : > { %v1476_v47 = vmul.f32 %v5969_v62, %v1316_v50 }
 0x2ca   : > { %v4911_v63 = vpop.permute.xlu1 %1525  ;;  %v4913_v53 = vpop.permute.xlu0 %1557 }
 0x2cb   : > { %v1604_v24 = vadd.f32 %v5971_v34, %v1476_v47  ;;  %v5980_v34 = vld [vmem:[#allocation17_spill] sm:$0xff] }
 0x2cc   : > { %2149 = vrot.lane.b32.xlu1 %v1794_v5, %s3305_s23  ;;  %2181 = vrot.lane.b32.xlu0 %v1810_v28, %s3305_s23  ;;  %v1620_v5 = vadd.f32 %v5972_v52, %v1492_v45  ;;  %v5979_v45 = vld [vmem:[#allocation21_spill] sm:$0xff] }
 0x2cd   : > { %v4966_v23 = vmul.f32 %v1604_v24, %v5969_v62  ;;  %v1333_v24 = vadd.f32 %v5980_v34, %v5979_v45  ;;  %v5986_v45 = vld [vmem:[#allocation14_spill] sm:$0xff] }
 0x2ce   : > { %v4925_v22 = vpop.permute.xlu1 %1713  ;;  %v4927_v16 = vpop.permute.xlu0 %1745  ;;  %v4969_v58 = vmul.f32 %v1620_v5, %v5970_v2 }
 0x2cf   : > { %5973 = vst [vmem:[#allocation37_spill] sm:$0xff] %v4966_v23  ;;  %v1668_v11 = vmul.f32 %v4966_v23, %v5969_v62  ;;  %v1796_v52 = vmul.f32 %v4731_v19, %v4966_v23  ;;  %v5981_v62 = vld [vmem:[#allocation59_spill] sm:$0xff]  ;;  %v1955_v19 = vmul.f32 %v4755_v60, %v4936_v37 }
 0x2d0   : > { %2275 = vrot.lane.b32.xlu1 %v1953_v8, %s3303_s13  ;;  %2307 = vrot.lane.b32.xlu0 %v1969_v10, %s3303_s13  ;;  %5974 = vst [vmem:[#allocation40_spill] sm:$0xff] %v4969_v58  ;;  %v1795_v8 = vmul.f32 %v5975_v29, %v4936_v37  ;;  %v5976_v10 = vld [vmem:[#allocation38_spill] sm:$0xff]  ;;  %v1684_v27 = vmul.f32 %v4969_v58, %v5970_v2  ;;  %v6002_v37 = vld [vmem:[#allocation72_spill] sm:$0xff] }
 0x2d1   : > { %v1811_v0 = vmul.f32 %v5976_v10, %v4939_v31  ;;  %v1812_v5 = vmul.f32 %v4733_v48, %v4969_v58  ;;  %v5982_v29 = vld [vmem:[#allocation70_spill] sm:$0xff]  ;;  %v5983_v10 = vld [vmem:[#allocation81_spill] sm:$0xff]  ;;  %v1971_v48 = vmul.f32 %v4757_v9, %v4939_v31  ;;  %v1956_v9 = vmul.f32 %v4773_v32, %v4966_v23 }
 0x2d2   : > { %v4945_v39 = vpop.permute.xlu1 %1871  ;;  %v4947_v7 = vpop.permute.xlu0 %1903 }
 0x2d4   : > { %2277 = vrot.lane.b32.xlu1 %v1954_v25, %s3303_s13  ;;  %2309 = vrot.lane.b32.xlu0 %v1970_v51, %s3303_s13  ;;  %v5977_v25 = vld [vmem:[#allocation49_spill] sm:$0xff] }
 0x2d5   : > { %v5978_v51 = vld [vmem:[#allocation13_spill] sm:$0xff] }
 0x2d6   : > { %v4955_v42 = vpop.permute.xlu1 %1873  ;;  %v4957_v28 = vpop.permute.xlu0 %1905  ;;  %v1317_v47 = vadd.f32 %v5978_v51, %v5977_v25 }
 0x2d8   : > { %2023 = vrot.lane.b32.xlu1 %v1667_v41, %s3306_s26  ;;  %2055 = vrot.lane.b32.xlu0 %v1683_v13, %s3306_s26  ;;  %v1477_v13 = vmul.f32 %v5981_v62, %v1317_v47  ;;  %v5985_v47 = vld [vmem:[#allocation48_spill] sm:$0xff] }
 0x2d9   : > { %v1318_v34 = vadd.f32 %v5986_v45, %v5985_v47  ;;  %v5992_v47 = vld [vmem:[#allocation71_spill] sm:$0xff] }
 0x2da   : > { %v4975_v46 = vpop.permute.xlu1 %1527  ;;  %v4977_v1 = vpop.permute.xlu0 %1559 }
 0x2dc   : > { %2183 = vrot.lane.b32.xlu0 %v1811_v0, %s3305_s23  ;;  %2151 = vrot.lane.b32.xlu1 %v1795_v8, %s3305_s23  ;;  %v1493_v8 = vmul.f32 %v5982_v29, %v1333_v24  ;;  %v1605_v0 = vadd.f32 %v5983_v10, %v1477_v13  ;;  %v5987_v24 = vld [vmem:[#allocation20_spill] sm:$0xff] }
 0x2de   : > { %v4981_v57 = vpop.permute.xlu1 %1715  ;;  %v4983_v50 = vpop.permute.xlu0 %1747  ;;  %v5024_v13 = vmul.f32 %v1605_v0, %v5981_v62  ;;  %v5993_v0 = vld [vmem:[#allocation82_spill] sm:$0xff] }
 0x2e0   : > { %2057 = vrot.lane.b32.xlu0 %v1684_v27, %s3306_s26  ;;  %2025 = vrot.lane.b32.xlu1 %v1668_v11, %s3306_s26  ;;  %v5984_v27 = vld [vmem:[#allocation35_spill] sm:$0xff]  ;;  %5989 = vst [vmem:[#allocation26_spill] sm:$0xff] %v5024_v13 }
 0x2e1   : > { %v1621_v11 = vadd.f32 %v5984_v27, %v1493_v8  ;;  %v1972_v8 = vmul.f32 %v4775_v12, %v4969_v58  ;;  %v1669_v12 = vmul.f32 %v5024_v13, %v5981_v62 }
 0x2e2   : > { %v4999_v2 = vpop.permute.xlu1 %1529  ;;  %v5001_v41 = vpop.permute.xlu0 %1561 }
 0x2e3   : > { %v5027_v60 = vmul.f32 %v1621_v11, %v5982_v29 }
 0x2e4   : > { %2153 = vrot.lane.b32.xlu1 %v1796_v52, %s3305_s23  ;;  %2185 = vrot.lane.b32.xlu0 %v1812_v5, %s3305_s23  ;;  %v5988_v52 = vld [vmem:[#allocation18_spill] sm:$0xff] }
 0x2e5   : > { %v1334_v5 = vadd.f32 %v5988_v52, %v5987_v24  ;;  %5990 = vst [vmem:[#allocation30_spill] sm:$0xff] %v5027_v60  ;;  %v5994_v24 = vld [vmem:[#allocation25_spill] sm:$0xff] }
 0x2e6   : > { %v5013_v25 = vpop.permute.xlu1 %1717  ;;  %v5015_v51 = vpop.permute.xlu0 %1749 }
 0x2e7   : > { %v1494_v45 = vmul.f32 %v5992_v47, %v1334_v5 }
 0x2e8   : > { %2279 = vrot.lane.b32.xlu1 %v1955_v19, %s3303_s13  ;;  %2311 = vrot.lane.b32.xlu0 %v1971_v48, %s3303_s13  ;;  %v5991_v19 = vld [vmem:[#allocation60_spill] sm:$0xff] }
 0x2e9   : > { %v1478_v48 = vmul.f32 %v5991_v19, %v1318_v34  ;;  %v1622_v52 = vadd.f32 %v5994_v24, %v1494_v45  ;;  %v1685_v34 = vmul.f32 %v5027_v60, %v5982_v29  ;;  %v5998_v24 = vld [vmem:[#allocation39_spill] sm:$0xff] }
 0x2ea   : > { %v5033_v10 = vpop.permute.xlu1 %1875  ;;  %v5035_v27 = vpop.permute.xlu0 %1907 }
 0x2eb   : > { %v1606_v11 = vadd.f32 %v5993_v0, %v1478_v48  ;;  %v1813_v48 = vmul.f32 %v4807_v17, %v5027_v60  ;;  %v5997_v17 = vld [vmem:[#allocation51_spill] sm:$0xff] }
 0x2ec   : > { %2281 = vrot.lane.b32.xlu1 %v1956_v9, %s3303_s13  ;;  %2313 = vrot.lane.b32.xlu0 %v1972_v8, %s3303_s13  ;;  %v5057_v9 = vmul.f32 %v1622_v52, %v5992_v47  ;;  %v1797_v8 = vmul.f32 %v4805_v36, %v5024_v13  ;;  %v1319_v52 = vadd.f32 %v5998_v24, %v5997_v17 }
 0x2ed   : > { %v5054_v5 = vmul.f32 %v1606_v11, %v5991_v19 }
 0x2ee   : > { %v5043_v32 = vpop.permute.xlu1 %1877  ;;  %v5045_v23 = vpop.permute.xlu0 %1909  ;;  %5996 = vst [vmem:[#allocation27_spill] sm:$0xff] %v5057_v9  ;;  %v1686_v36 = vmul.f32 %v5057_v9, %v5992_v47  ;;  %v1814_v58 = vmul.f32 %v4839_v43, %v5057_v9  ;;  %v6001_v47 = vld [vmem:[#allocation61_spill] sm:$0xff]  ;;  %v1973_v43 = vmul.f32 %v4859_v3, %v5027_v60 }
 0x2ef   : > { %5995 = vst [vmem:[#allocation47_spill] sm:$0xff] %v5054_v5  ;;  %v1670_v11 = vmul.f32 %v5054_v5, %v5991_v19  ;;  %v1958_v3 = vmul.f32 %v4867_v54, %v5054_v5  ;;  %v6010_v60 = vld [vmem:[#allocation73_spill] sm:$0xff] }
 0x2f0   : > { %2027 = vrot.lane.b32.xlu1 %v1669_v12, %s3306_s26  ;;  %2059 = vrot.lane.b32.xlu0 %v1685_v34, %s3306_s26  ;;  %v5999_v12 = vld [vmem:[#allocation8_spill] sm:$0xff]  ;;  %v6000_v34 = vld [vmem:[#allocation43_spill] sm:$0xff] }
 0x2f2   : > { %v5063_v62 = vpop.permute.xlu1 %1531  ;;  %v5065_v45 = vpop.permute.xlu0 %1563 }
 0x2f4   : > { %2155 = vrot.lane.b32.xlu1 %v1797_v8, %s3305_s23  ;;  %2187 = vrot.lane.b32.xlu0 %v1813_v48, %s3305_s23  ;;  %v1335_v8 = vadd.f32 %v6000_v34, %v5999_v12  ;;  %v1798_v48 = vmul.f32 %v4837_v61, %v5054_v5  ;;  %v1957_v61 = vmul.f32 %v4857_v55, %v5024_v13  ;;  %v6017_v13 = vld [vmem:[#allocation74_spill] sm:$0xff] }
 0x2f6   : > { %v5069_v29 = vpop.permute.xlu1 %1719  ;;  %v5071_v0 = vpop.permute.xlu0 %1751 }
 0x2f8   : > { %2029 = vrot.lane.b32.xlu1 %v1670_v11, %s3306_s26  ;;  %2061 = vrot.lane.b32.xlu0 %v1686_v36, %s3306_s26  ;;  %v1479_v11 = vmul.f32 %v6001_v47, %v1319_v52  ;;  %v1495_v36 = vmul.f32 %v6002_v37, %v1335_v8  ;;  %v6003_v52 = vld [vmem:[#allocation50_spill] sm:$0xff] }
 0x2fa   : > { %v5087_v19 = vpop.permute.xlu1 %1533  ;;  %v5089_v31 = vpop.permute.xlu0 %1565  ;;  %v1607_v17 = vadd.f32 %v4799_v33, %v1479_v11  ;;  %v1623_v24 = vadd.f32 %v4801_v15, %v1495_v36  ;;  %v6005_v33 = vld [vmem:[#allocation7_spill] sm:$0xff]  ;;  %v1974_v36 = vmul.f32 %v4869_v38, %v5057_v9 }
 0x2fc   : > { %2157 = vrot.lane.b32.xlu1 %v1798_v48, %s3305_s23  ;;  %2189 = vrot.lane.b32.xlu0 %v1814_v58, %s3305_s23  ;;  %v6004_v58 = vld [vmem:[#allocation42_spill] sm:$0xff]  ;;  %v5112_v11 = vmul.f32 %v1607_v17, %v6001_v47  ;;  %v5115_v55 = vmul.f32 %v1623_v24, %v6002_v37 }
 0x2fd   : > { %v1320_v8 = vadd.f32 %v6004_v58, %v6003_v52  ;;  %v6006_v48 = vld [vmem:[#allocation46_spill] sm:$0xff] }
 0x2fe   : > { %v5101_v12 = vpop.permute.xlu1 %1721  ;;  %v5103_v34 = vpop.permute.xlu0 %1753  ;;  %v1336_v15 = vadd.f32 %v6006_v48, %v6005_v33  ;;  %6007 = vst [vmem:[#allocation31_spill] sm:$0xff] %v5112_v11  ;;  %6008 = vst [vmem:[#allocation58_spill] sm:$0xff] %v5115_v55  ;;  %v6009_v52 = vld [vmem:[#allocation62_spill] sm:$0xff]  ;;  %v1671_v38 = vmul.f32 %v5112_v11, %v6001_v47 }
 0x2ff   : > { %v1480_v58 = vmul.f32 %v6009_v52, %v1320_v8  ;;  %v1687_v8 = vmul.f32 %v5115_v55, %v6002_v37 }
 0x300   : > { %2283 = vrot.lane.b32.xlu1 %v1957_v61, %s3303_s13  ;;  %2315 = vrot.lane.b32.xlu0 %v1973_v43, %s3303_s13  ;;  %v1496_v33 = vmul.f32 %v6010_v60, %v1336_v15 }
 0x301   : > { %v1608_v17 = vadd.f32 %v4823_v18, %v1480_v58 }
 0x302   : > { %v5121_v61 = vpop.permute.xlu1 %1879  ;;  %v5123_v43 = vpop.permute.xlu0 %1911  ;;  %v1624_v24 = vadd.f32 %v4825_v49, %v1496_v33  ;;  %v1799_v49 = vmul.f32 %v4893_v44, %v5112_v11 }
 0x303   : > { %v5142_v15 = vmul.f32 %v1608_v17, %v6009_v52  ;;  %v6013_v17 = vld [vmem:[#allocation28_spill] sm:$0xff] }
 0x304   : > { %2285 = vrot.lane.b32.xlu1 %v1958_v3, %s3303_s13  ;;  %2317 = vrot.lane.b32.xlu0 %v1974_v36, %s3303_s13  ;;  %v5145_v18 = vmul.f32 %v1624_v24, %v6010_v60  ;;  %v1815_v3 = vmul.f32 %v4895_v59, %v5115_v55  ;;  %v6012_v59 = vld [vmem:[#allocation52_spill] sm:$0xff] }
 0x305   : > { %v1672_v33 = vmul.f32 %v5142_v15, %v6009_v52  ;;  %v1321_v24 = vadd.f32 %v6013_v17, %v6012_v59 }
 0x306   : > { %v5131_v54 = vpop.permute.xlu1 %1881  ;;  %v5133_v48 = vpop.permute.xlu0 %1913  ;;  %6011 = vst [vmem:[#allocation69_spill] sm:$0xff] %v5145_v18  ;;  %v1688_v44 = vmul.f32 %v5145_v18, %v6010_v60  ;;  %v1816_v9 = vmul.f32 %v4927_v16, %v5145_v18  ;;  %v6016_v60 = vld [vmem:[#allocation63_spill] sm:$0xff]  ;;  %v1975_v16 = vmul.f32 %v4947_v7, %v5115_v55  ;;  %v1960_v7 = vmul.f32 %v4955_v42, %v5142_v15  ;;  %v6022_v55 = vld [vmem:[#allocation64_spill] sm:$0xff] }
 0x308   : > { %2031 = vrot.lane.b32.xlu1 %v1671_v38, %s3306_s26  ;;  %2063 = vrot.lane.b32.xlu0 %v1687_v8, %s3306_s26  ;;  %v6014_v38 = vld [vmem:[#allocation36_spill] sm:$0xff]  ;;  %v6015_v8 = vld [vmem:[#allocation45_spill] sm:$0xff] }
 0x30a   : > { %v5151_v47 = vpop.permute.xlu1 %1723  ;;  %v5153_v36 = vpop.permute.xlu0 %1755 }
 0x30c   : > { %2159 = vrot.lane.b32.xlu1 %v1799_v49, %s3305_s23  ;;  %2191 = vrot.lane.b32.xlu0 %v1815_v3, %s3305_s23  ;;  %v1337_v49 = vadd.f32 %v6015_v8, %v6014_v38  ;;  %v1800_v3 = vmul.f32 %v4925_v22, %v5142_v15  ;;  %v1959_v22 = vmul.f32 %v4945_v39, %v5112_v11 }
 0x30e   : > { %v5157_v37 = vpop.permute.xlu1 %1725  ;;  %v5159_v58 = vpop.permute.xlu0 %1757 }
 0x310   : > { %2033 = vrot.lane.b32.xlu1 %v1672_v33, %s3306_s26  ;;  %2065 = vrot.lane.b32.xlu0 %v1688_v44, %s3306_s26  ;;  %v1481_v33 = vmul.f32 %v6016_v60, %v1321_v24  ;;  %v1497_v44 = vmul.f32 %v6017_v13, %v1337_v49  ;;  %v6018_v24 = vld [vmem:[#allocation19_spill] sm:$0xff] }
 0x312   : > { %v5175_v52 = vpop.permute.xlu1 %1883  ;;  %v5177_v5 = vpop.permute.xlu0 %1915  ;;  %v1609_v59 = vadd.f32 %v4887_v4, %v1481_v33  ;;  %v1625_v17 = vadd.f32 %v4889_v6, %v1497_v44  ;;  %v6020_v4 = vld [vmem:[#allocation33_spill] sm:$0xff]  ;;  %v1976_v44 = vmul.f32 %v4957_v28, %v5145_v18  ;;  %v6027_v18 = vld [vmem:[#allocation54_spill] sm:$0xff] }
 0x314   : > { %2161 = vrot.lane.b32.xlu1 %v1800_v3, %s3305_s23  ;;  %2193 = vrot.lane.b32.xlu0 %v1816_v9, %s3305_s23  ;;  %v6019_v9 = vld [vmem:[#allocation29_spill] sm:$0xff]  ;;  %v5200_v33 = vmul.f32 %v1609_v59, %v6016_v60  ;;  %v5203_v39 = vmul.f32 %v1625_v17, %v6017_v13 }
 0x315   : > { %v1322_v49 = vadd.f32 %v6019_v9, %v6018_v24  ;;  %v6021_v3 = vld [vmem:[#allocation53_spill] sm:$0xff]  ;;  %v6023_v24 = vld [vmem:[#allocation75_spill] sm:$0xff] }
 0x316   : > { %v5189_v38 = vpop.permute.xlu1 %1885  ;;  %v5191_v8 = vpop.permute.xlu0 %1917  ;;  %v1338_v6 = vadd.f32 %v6021_v3, %v6020_v4  ;;  %v1673_v42 = vmul.f32 %v5200_v33, %v6016_v60  ;;  %v1689_v28 = vmul.f32 %v5203_v39, %v6017_v13 }
 0x317   : > { %v1482_v11 = vmul.f32 %v6022_v55, %v1322_v49 }
 0x318   : > { %2287 = vrot.lane.b32.xlu1 %v1959_v22, %s3303_s13  ;;  %2319 = vrot.lane.b32.xlu0 %v1975_v16, %s3303_s13  ;;  %v1498_v9 = vmul.f32 %v6023_v24, %v1338_v6 }
 0x319   : > { %v1610_v59 = vadd.f32 %v4911_v63, %v1482_v11  ;;  %v1801_v63 = vmul.f32 %v4981_v57, %v5200_v33 }
 0x31a   : > { %v2016_v22 = vpop.permute.xlu1 %2015  ;;  %v2048_v16 = vpop.permute.xlu0 %2047  ;;  %v1626_v17 = vadd.f32 %v4913_v53, %v1498_v9  ;;  %v1817_v53 = vmul.f32 %v4983_v50, %v5203_v39 }
 0x31b   : > { %v5222_v49 = vmul.f32 %v1610_v59, %v6022_v55  ;;  %v3203_v59 = vld [vmem:[%s4174_s16] sm:$0xff] }
 0x31c   : > { %2289 = vrot.lane.b32.xlu1 %v1960_v7, %s3303_s13  ;;  %2321 = vrot.lane.b32.xlu0 %v1976_v44, %s3303_s13  ;;  %v5225_v6 = vmul.f32 %v1626_v17, %v6023_v24  ;;  %v1823_v17 = vmul.f32 %v3203_v59, %v4750_v35 }
 0x31d   : > { %v1674_v44 = vmul.f32 %v5222_v49, %v6022_v55  ;;  %v6024_v55 = vld [vmem:[#allocation6_spill] sm:$0xff] }
 0x31e   : > { %v2144_v4 = vpop.permute.xlu1 %2143  ;;  %v2176_v3 = vpop.permute.xlu0 %2175  ;;  %v1690_v57 = vmul.f32 %v5225_v6, %v6023_v24  ;;  %v6026_v24 = vld [vmem:[#allocation23_spill] sm:$0xff] }
 0x31f   : > { %v2368_v9 = vsel %vm2367_vm0, %v2016_v22, %v2144_v4  ;;  %v2384_v50 = vsel %vm2367_vm0, %v2048_v16, %v2176_v3  ;;  %v1339_v22 = vadd.f32 %v6027_v18, %v6026_v24  ;;  %v1802_v16 = vmul.f32 %v5013_v25, %v5222_v49  ;;  %v3205_v25 = vld [vmem:[%s4174_s16 + $0x8] sm:$0xff] }
 0x320   : > { %2035 = vrot.lane.b32.xlu1 %v1673_v42, %s3306_s26  ;;  %2067 = vrot.lane.b32.xlu0 %v1689_v28, %s3306_s26  ;;  %v3204_v42 = vld [vmem:[%s4174_s16 + $0x80] sm:$0xff]  ;;  %v1818_v4 = vmul.f32 %v5015_v51, %v5225_v6  ;;  %v1824_v51 = vmul.f32 %v3205_v25, %v4784_v40  ;;  %v6035_v25 = vld [vmem:[#allocation77_spill] sm:$0xff] }
 0x321   : > { %v1839_v28 = vmul.f32 %v3204_v42, %v4753_v26 }
 0x322   : > { %v2018_v11 = vpop.permute.xlu1 %2017  ;;  %v2050_v60 = vpop.permute.xlu0 %2049 }
 0x323   : > { %v2417_v26 = vsel %vm2400_vm1, %v2384_v50, %v1839_v28 }
 0x324   : > { %2163 = vrot.lane.b32.xlu1 %v1801_v63, %s3305_s23  ;;  %2195 = vrot.lane.b32.xlu0 %v1817_v53, %s3305_s23  ;;  %v6025_v63 = vld [vmem:[#allocation15_spill] sm:$0xff] }
 0x325   : > { %v1323_v53 = vadd.f32 %v6025_v63, %v6024_v55  ;;  %v6028_v55 = vld [vmem:[#allocation65_spill] sm:$0xff] }
 0x326   : > { %v2146_v13 = vpop.permute.xlu1 %2145  ;;  %v2178_v7 = vpop.permute.xlu0 %2177 }
 0x327   : > { %v2385_v59 = vsel %vm2367_vm0, %v2050_v60, %v2178_v7  ;;  %v1483_v63 = vmul.f32 %v6028_v55, %v1323_v53 }
 0x328   : > { %2037 = vrot.lane.b32.xlu1 %v1674_v44, %s3306_s26  ;;  %2069 = vrot.lane.b32.xlu0 %v1690_v57, %s3306_s26  ;;  %v2401_v44 = vsel %vm2400_vm1, %v2368_v9, %v1823_v17  ;;  %v2369_v57 = vsel %vm2367_vm0, %v2018_v11, %v2146_v13  ;;  %v3206_v9 = vld [vmem:[%s4174_s16 + $0x88] sm:$0xff]  ;;  %v6029_v17 = vld [vmem:[#allocation76_spill] sm:$0xff]  ;;  %v1961_v13 = vmul.f32 %v5033_v10, %v5200_v33 }
 0x329   : > { %v1840_v50 = vmul.f32 %v3206_v9, %v4787_v21  ;;  %v1499_v11 = vmul.f32 %v6029_v17, %v1339_v22  ;;  %v1611_v60 = vadd.f32 %v4975_v46, %v1483_v63  ;;  %v2402_v7 = vsel %vm2400_vm1, %v2369_v57, %v1824_v51  ;;  %v6030_v46 = vld [vmem:[#allocation5_spill] sm:$0xff]  ;;  %v6031_v10 = vld [vmem:[#allocation16_spill] sm:$0xff] }
 0x32a   : > { %v2272_v35 = vpop.permute.xlu1 %2271  ;;  %v2304_v3 = vpop.permute.xlu0 %2303  ;;  %v1977_v21 = vmul.f32 %v5035_v27, %v5203_v39  ;;  %v1962_v27 = vmul.f32 %v5043_v32, %v5222_v49 }
 0x32b   : > { %v2434_v18 = vsel %vm2433_vm2, %v2401_v44, %v2272_v35  ;;  %v2450_v42 = vsel %vm2433_vm2, %v2417_v26, %v2304_v3  ;;  %v2418_v53 = vsel %vm2400_vm1, %v2385_v59, %v1840_v50  ;;  %v1627_v24 = vadd.f32 %v4977_v1, %v1499_v11  ;;  %v6032_v44 = vld [vmem:[#allocation22_spill] sm:$0xff]  ;;  %v6033_v26 = vld [vmem:[#allocation55_spill] sm:$0xff] }
 0x32c   : > { %3075 = vmatprep.mubr.msk.f32.mxu0 %vm2506_vm3, %v2434_v18  ;;  %2165 = vrot.lane.b32.xlu1 %v1802_v16, %s3305_s23  ;;  %v5286_v1 = vmul.f32 %v1611_v60, %v6028_v55  ;;  %v1340_v57 = vadd.f32 %v6033_v26, %v6032_v44  ;;  %v1978_v18 = vmul.f32 %v5045_v23, %v5225_v6  ;;  %v6038_v44 = vld [vmem:[#allocation10_spill] sm:$0xff]  ;;  %v6039_v26 = vld [vmem:[#allocation56_spill] sm:$0xff] }
 0x32d   : > { %2197 = vrot.lane.b32.xlu0 %v1818_v4, %s3305_s23  ;;  %3099 = vmatprep.mubr.msk.f32.mxu1 %vm2506_vm3, %v2450_v42  ;;  %v1324_v4 = vadd.f32 %v6031_v10, %v6030_v46  ;;  %v5293_v59 = vmul.f32 %v1627_v24, %v6029_v17  ;;  %v6034_v42 = vld [vmem:[#allocation66_spill] sm:$0xff] }
 0x32e   : > { %v2274_v28 = vpop.permute.xlu1 %2273  ;;  %v2306_v40 = vpop.permute.xlu0 %2305  ;;  %v1500_v51 = vmul.f32 %v6035_v25, %v1340_v57  ;;  %v1675_v11 = vmul.f32 %v5286_v1, %v6028_v55  ;;  %v6036_v10 = vld [vmem:[#allocation34_spill] sm:$0xff] }
 0x32f   : > { %v2435_v22 = vsel %vm2433_vm2, %v2402_v7, %v2274_v28  ;;  %v2451_v16 = vsel %vm2433_vm2, %v2418_v53, %v2306_v40  ;;  %v1484_v63 = vmul.f32 %v6034_v42, %v1324_v4  ;;  %v1691_v23 = vmul.f32 %v5293_v59, %v6029_v17  ;;  %v6037_v4 = vld [vmem:[#allocation41_spill] sm:$0xff] }
 0x330   : > { %3076 = vmatmul.mubr.msk.f32.vlgmr.msra.gmra.mrb[0].mxu0 %vm2506_vm3, %v2435_v22  ;;  %2291 = vrot.lane.b32.xlu1 %v1961_v13, %s3303_s13  ;;  %v1628_v60 = vadd.f32 %v5001_v41, %v1500_v51  ;;  %v1819_v41 = vmul.f32 %v5071_v0, %v5293_v59  ;;  %v3207_v22 = vld [vmem:[%s4174_s16 + $0x10] sm:$0xff] }
 0x331   : > { %2323 = vrot.lane.b32.xlu0 %v1977_v21, %s3303_s13  ;;  %3100 = vmatmul.mubr.msk.f32.vlgmr.msra.gmra.mrb[0].mxu1 %vm2506_vm3, %v2451_v16  ;;  %v1612_v32 = vadd.f32 %v4999_v2, %v1484_v63  ;;  %v1803_v2 = vmul.f32 %v5069_v29, %v5286_v1  ;;  %v1825_v0 = vmul.f32 %v3207_v22, %v4848_v30  ;;  %v3208_v16 = vld [vmem:[%s4174_s16 + $0x90] sm:$0xff] }
 0x332   : > { %v2020_v35 = vpop.permute.xlu1 %2019  ;;  %v2052_v3 = vpop.permute.xlu0 %2051  ;;  %v5315_v55 = vmul.f32 %v1628_v60, %v6035_v25  ;;  %v1841_v46 = vmul.f32 %v3208_v16, %v4851_v56  ;;  %v6044_v16 = vld [vmem:[#allocation9_spill] sm:$0xff] }
 0x333   : > { %v5310_v13 = vmul.f32 %v1612_v32, %v6034_v42 }
 0x334   : > { %2293 = vrot.lane.b32.xlu1 %v1962_v27, %s3303_s13  ;;  %v1692_v21 = vmul.f32 %v5315_v55, %v6035_v25  ;;  %v1325_v27 = vadd.f32 %v6037_v4, %v6036_v10  ;;  %v1820_v57 = vmul.f32 %v5103_v34, %v5315_v55 }
 0x335   : > { %2325 = vrot.lane.b32.xlu0 %v1978_v18, %s3303_s13  ;;  %v1676_v40 = vmul.f32 %v5310_v13, %v6034_v42 }
 0x336   : > { %v2148_v9 = vpop.permute.xlu1 %2147  ;;  %v2180_v50 = vpop.permute.xlu0 %2179 }
 0x337   : > { %v2370_v29 = vsel %vm2367_vm0, %v2020_v35, %v2148_v9  ;;  %v2386_v24 = vsel %vm2367_vm0, %v2052_v3, %v2180_v50  ;;  %v1341_v35 = vadd.f32 %v6039_v26, %v6038_v44  ;;  %v1804_v3 = vmul.f32 %v5101_v12, %v5310_v13  ;;  %v6040_v9 = vld [vmem:[#allocation67_spill] sm:$0xff]  ;;  %v3209_v12 = vld [vmem:[%s4174_s16 + $0x18] sm:$0xff]  ;;  %v6046_v44 = vld [vmem:[#allocation68_spill] sm:$0xff] }
 0x338   : > { %2039 = vrot.lane.b32.xlu1 %v1675_v11, %s3306_s26  ;;  %v2403_v30 = vsel %vm2400_vm1, %v2370_v29, %v1825_v0  ;;  %v2419_v56 = vsel %vm2400_vm1, %v2386_v24, %v1841_v46  ;;  %v1485_v50 = vmul.f32 %v6040_v9, %v1325_v27  ;;  %v1826_v34 = vmul.f32 %v3209_v12, %v4878_v20  ;;  %v3210_v11 = vld [vmem:[%s4174_s16 + $0x98] sm:$0xff] }
 0x339   : > { %2071 = vrot.lane.b32.xlu0 %v1691_v23, %s3306_s26  ;;  %v1842_v60 = vmul.f32 %v3210_v11, %v4881_v14  ;;  %v6041_v23 = vld [vmem:[#allocation78_spill] sm:$0xff]  ;;  %v1979_v14 = vmul.f32 %v5123_v43, %v5293_v59  ;;  %v1964_v43 = vmul.f32 %v5131_v54, %v5310_v13  ;;  %v6045_v46 = vld [vmem:[#allocation57_spill] sm:$0xff]  ;;  %v1980_v27 = vmul.f32 %v5133_v48, %v5315_v55 }
 0x33a   : > { %v2022_v7 = vpop.permute.xlu1 %2021  ;;  %v2054_v28 = vpop.permute.xlu0 %2053  ;;  %v1342_v10 = vadd.f32 %v6045_v46, %v6044_v16  ;;  %v3211_v11 = vld [vmem:[%s4174_s16 + $0x20] sm:$0xff] }
 0x33c   : > { %2167 = vrot.lane.b32.xlu1 %v1803_v2, %s3305_s23  ;;  %v1501_v2 = vmul.f32 %v6041_v23, %v1341_v35  ;;  %v6047_v35 = vld [vmem:[#allocation79_spill] sm:$0xff] }
 0x33d   : > { %2199 = vrot.lane.b32.xlu0 %v1819_v41, %s3305_s23 }
 0x33e   : > { %v2150_v17 = vpop.permute.xlu1 %2149  ;;  %v2182_v53 = vpop.permute.xlu0 %2181 }
 0x33f   : > { %v2371_v63 = vsel %vm2367_vm0, %v2022_v7, %v2150_v17  ;;  %v2387_v25 = vsel %vm2367_vm0, %v2054_v28, %v2182_v53  ;;  %v1613_v7 = vadd.f32 %v5063_v62, %v1485_v50  ;;  %v1963_v28 = vmul.f32 %v5121_v61, %v5286_v1  ;;  %v6042_v62 = vld [vmem:[#allocation32_spill] sm:$0xff] }
 0x340   : > { %2041 = vrot.lane.b32.xlu1 %v1676_v40, %s3306_s26  ;;  %v2404_v41 = vsel %vm2400_vm1, %v2371_v63, %v1826_v34  ;;  %v2420_v53 = vsel %vm2400_vm1, %v2387_v25, %v1842_v60  ;;  %v1629_v40 = vadd.f32 %v5065_v45, %v1501_v2  ;;  %v6043_v61 = vld [vmem:[#allocation44_spill] sm:$0xff]  ;;  %v6049_v2 = vld [vmem:[#allocation11_spill] sm:$0xff] }
 0x341   : > { %2073 = vrot.lane.b32.xlu0 %v1692_v21, %s3306_s26  ;;  %v1326_v21 = vadd.f32 %v6043_v61, %v6042_v62  ;;  %v5374_v45 = vmul.f32 %v1613_v7, %v6040_v9 }
 0x342   : > { %v2276_v18 = vpop.permute.xlu1 %2275  ;;  %v2308_v42 = vpop.permute.xlu0 %2307  ;;  %v5381_v4 = vmul.f32 %v1629_v40, %v6041_v23 }
 0x343   : > { %v2436_v51 = vsel %vm2433_vm2, %v2403_v30, %v2276_v18  ;;  %v2452_v32 = vsel %vm2433_vm2, %v2419_v56, %v2308_v42  ;;  %v1486_v26 = vmul.f32 %v6046_v44, %v1326_v21  ;;  %v1677_v18 = vmul.f32 %v5374_v45, %v6040_v9  ;;  %v3214_v21 = vld [vmem:[%s4174_s16 + $0xa8] sm:$0xff] }
 0x344   : > { %3078 = vmatprep.mubr.msk.f32.mxu0 %vm2506_vm3, %v2436_v51  ;;  %2169 = vrot.lane.b32.xlu1 %v1804_v3, %s3305_s23  ;;  %v1502_v3 = vmul.f32 %v6047_v35, %v1342_v10  ;;  %v1693_v48 = vmul.f32 %v5381_v4, %v6041_v23  ;;  %v3212_v23 = vld [vmem:[%s4174_s16 + $0xa0] sm:$0xff] }
 0x345   : > { %2201 = vrot.lane.b32.xlu0 %v1820_v57, %s3305_s23  ;;  %3102 = vmatprep.mubr.msk.f32.mxu1 %vm2506_vm3, %v2452_v32  ;;  %v1614_v54 = vadd.f32 %v5087_v19, %v1486_v26  ;;  %v1805_v19 = vmul.f32 %v5151_v47, %v5374_v45  ;;  %v1843_v7 = vmul.f32 %v3212_v23, %v6049_v2 }
 0x346   : > { %v2278_v17 = vpop.permute.xlu1 %2277  ;;  %v2310_v20 = vpop.permute.xlu0 %2309  ;;  %v1630_v56 = vadd.f32 %v5089_v31, %v1502_v3  ;;  %v1821_v31 = vmul.f32 %v5153_v36, %v5381_v4  ;;  %v6048_v36 = vld [vmem:[#allocation24_spill] sm:$0xff] }
 0x347   : > { %v2437_v29 = vsel %vm2433_vm2, %v2404_v41, %v2278_v17  ;;  %v2453_v24 = vsel %vm2433_vm2, %v2420_v53, %v2310_v20  ;;  %v5398_v42 = vmul.f32 %v1614_v54, %v6046_v44  ;;  %v1827_v60 = vmul.f32 %v3211_v11, %v6048_v36 }
 0x348   : > { %3079 = vmatmul.mubr.msk.f32.gmra.mrb[2].mxu0 %vm2506_vm3, %v2437_v29  ;;  %2295 = vrot.lane.b32.xlu1 %v1963_v28, %s3303_s13  ;;  %v5403_v51 = vmul.f32 %v1630_v56, %v6047_v35 }
 0x349   : > { %2327 = vrot.lane.b32.xlu0 %v1979_v14, %s3303_s13  ;;  %3103 = vmatmul.mubr.msk.f32.gmra.mrb[2].mxu1 %vm2506_vm3, %v2453_v24  ;;  %v1678_v50 = vmul.f32 %v5398_v42, %v6046_v44  ;;  %v1806_v28 = vmul.f32 %v5157_v37, %v5398_v42  ;;  %v3213_v37 = vld [vmem:[%s4174_s16 + $0x28] sm:$0xff]  ;;  %v1981_v44 = vmul.f32 %v5177_v5, %v5381_v4 }
 0x34a   : > { %v2024_v22 = vpop.permute.xlu1 %2023  ;;  %v2056_v0 = vpop.permute.xlu0 %2055  ;;  %v1694_v34 = vmul.f32 %v5403_v51, %v6047_v35  ;;  %v1822_v41 = vmul.f32 %v5159_v58, %v5403_v51  ;;  %v6050_v58 = vld [vmem:[#allocation37_spill] sm:$0xff]  ;;  %v1982_v5 = vmul.f32 %v5191_v8, %v5403_v51  ;;  %v3216_v8 = vld [vmem:[%s4174_s16 + $0xb0] sm:$0xff] }
 0x34b   : > { %v1828_v61 = vmul.f32 %v3213_v37, %v6050_v58 }
 0x34c   : > { %2297 = vrot.lane.b32.xlu1 %v1964_v43, %s3303_s13  ;;  %v6051_v43 = vld [vmem:[#allocation40_spill] sm:$0xff] }
 0x34d   : > { %2329 = vrot.lane.b32.xlu0 %v1980_v27, %s3303_s13 }
 0x34e   : > { %v2152_v57 = vpop.permute.xlu1 %2151  ;;  %v2184_v30 = vpop.permute.xlu0 %2183 }
 0x34f   : > { %v2372_v47 = vsel %vm2367_vm0, %v2024_v22, %v2152_v57  ;;  %v2388_v12 = vsel %vm2367_vm0, %v2056_v0, %v2184_v30  ;;  %v1844_v22 = vmul.f32 %v3214_v21, %v6051_v43  ;;  %v1965_v0 = vmul.f32 %v5175_v52, %v5374_v45 }
 0x350   : > { %2043 = vrot.lane.b32.xlu1 %v1677_v18, %s3306_s26  ;;  %v2405_v17 = vsel %vm2400_vm1, %v2372_v47, %v1827_v60  ;;  %v2421_v20 = vsel %vm2400_vm1, %v2388_v12, %v1843_v7  ;;  %v1966_v52 = vmul.f32 %v5189_v38, %v5398_v42  ;;  %v3217_v7 = vld [vmem:[%s4174_s16 + $0x38] sm:$0xff] }
 0x351   : > { %2075 = vrot.lane.b32.xlu0 %v1693_v48, %s3306_s26 }
 0x352   : > { %v2026_v63 = vpop.permute.xlu1 %2025  ;;  %v2058_v25 = vpop.permute.xlu0 %2057 }
 0x354   : > { %2171 = vrot.lane.b32.xlu1 %v1805_v19, %s3305_s23 }
 0x355   : > { %2203 = vrot.lane.b32.xlu0 %v1821_v31, %s3305_s23  ;;  %v6052_v31 = vld [vmem:[#allocation26_spill] sm:$0xff] }
 0x356   : > { %v2154_v32 = vpop.permute.xlu1 %2153  ;;  %v2186_v9 = vpop.permute.xlu0 %2185 }
 0x357   : > { %v2373_v14 = vsel %vm2367_vm0, %v2026_v63, %v2154_v32  ;;  %v2389_v29 = vsel %vm2367_vm0, %v2058_v25, %v2186_v9  ;;  %v3215_v25 = vld [vmem:[%s4174_s16 + $0x30] sm:$0xff]  ;;  %v6053_v9 = vld [vmem:[#allocation30_spill] sm:$0xff] }
 0x358   : > { %2045 = vrot.lane.b32.xlu1 %v1678_v50, %s3306_s26  ;;  %v2406_v16 = vsel %vm2400_vm1, %v2373_v14, %v1828_v61  ;;  %v2422_v10 = vsel %vm2400_vm1, %v2389_v29, %v1844_v22  ;;  %v1829_v32 = vmul.f32 %v3215_v25, %v6052_v31  ;;  %v1845_v50 = vmul.f32 %v3216_v8, %v6053_v9  ;;  %v3222_v31 = vld [vmem:[%s4174_s16 + $0xc8] sm:$0xff] }
 0x359   : > { %2077 = vrot.lane.b32.xlu0 %v1694_v34, %s3306_s26 }
 0x35a   : > { %v2280_v53 = vpop.permute.xlu1 %2279  ;;  %v2312_v40 = vpop.permute.xlu0 %2311 }
 0x35b   : > { %v2438_v24 = vsel %vm2433_vm2, %v2405_v17, %v2280_v53  ;;  %v2454_v62 = vsel %vm2433_vm2, %v2421_v20, %v2312_v40  ;;  %v3218_v17 = vld [vmem:[%s4174_s16 + $0xb8] sm:$0xff]  ;;  %v6055_v53 = vld [vmem:[#allocation27_spill] sm:$0xff] }
 0x35c   : > { %2173 = vrot.lane.b32.xlu1 %v1806_v28, %s3305_s23  ;;  %3081 = vmatprep.mubr.msk.f32.mxu0 %vm2506_vm3, %v2438_v24  ;;  %v6054_v28 = vld [vmem:[#allocation47_spill] sm:$0xff]  ;;  %v1846_v20 = vmul.f32 %v3218_v17, %v6055_v53 }
 0x35d   : > { %2205 = vrot.lane.b32.xlu0 %v1822_v41, %s3305_s23  ;;  %3105 = vmatprep.mubr.msk.f32.mxu1 %vm2506_vm3, %v2454_v62  ;;  %v1830_v41 = vmul.f32 %v3217_v7, %v6054_v28 }
 0x35e   : > { %v2282_v46 = vpop.permute.xlu1 %2281  ;;  %v2314_v27 = vpop.permute.xlu0 %2313 }
 0x35f   : > { %v2439_v26 = vsel %vm2433_vm2, %v2406_v16, %v2282_v46  ;;  %v2455_v35 = vsel %vm2433_vm2, %v2422_v10, %v2314_v27 }
 0x360   : > { %2299 = vrot.lane.b32.xlu1 %v1965_v0, %s3303_s13  ;;  %3082 = vmatmul.mubr.msk.f32.gmra.mrb[4].mxu0 %vm2506_vm3, %v2439_v26  ;;  %v6056_v26 = vld [vmem:[#allocation31_spill] sm:$0xff] }
 0x361   : > { %2331 = vrot.lane.b32.xlu0 %v1981_v44, %s3303_s13  ;;  %3106 = vmatmul.mubr.msk.f32.gmra.mrb[4].mxu1 %vm2506_vm3, %v2455_v35  ;;  %v3219_v44 = vld [vmem:[%s4174_s16 + $0x40] sm:$0xff] }
 0x362   : > { %v2028_v3 = vpop.permute.xlu1 %2027  ;;  %v2060_v54 = vpop.permute.xlu0 %2059  ;;  %v1831_v35 = vmul.f32 %v3219_v44, %v6056_v26 }
 0x364   : > { %2301 = vrot.lane.b32.xlu1 %v1966_v52, %s3303_s13  ;;  %v3220_v52 = vld [vmem:[%s4174_s16 + $0xc0] sm:$0xff] }
 0x365   : > { %2333 = vrot.lane.b32.xlu0 %v1982_v5, %s3303_s13  ;;  %s284_s13 = sand.u32 1, %s3289_s19  }
 0x366   : > { %v2156_v57 = vpop.permute.xlu1 %2155  ;;  %v2188_v30 = vpop.permute.xlu0 %2187  ;;  %s2970_s12 = sshll.u32 %s284_s13, 8  ;;  %s5654_s14 = scalar_lea.sflag [#allocation3], %s284_s13 }
 0x367   : > { %v2374_v63 = vsel %vm2367_vm0, %v2028_v3, %v2156_v57  ;;  %v2390_v38 = vsel %vm2367_vm0, %v2060_v54, %v2188_v30  ;;  %v6057_v3 = vld [vmem:[#allocation58_spill] sm:$0xff] }
 0x368   : > { %v2407_v47 = vsel %vm2400_vm1, %v2374_v63, %v1829_v32  ;;  %v2423_v34 = vsel %vm2400_vm1, %v2390_v38, %v1845_v50  ;;  %v1847_v54 = vmul.f32 %v3220_v52, %v6057_v3  ;;  %v3221_v38 = vld [vmem:[%s4174_s16 + $0x48] sm:$0xff]  ;;  %v6058_v32 = vld [vmem:[#allocation69_spill] sm:$0xff] }
 0x369   : > { %v1832_v25 = vmul.f32 %v3221_v38, %v5142_v15  ;;  %v1848_v8 = vmul.f32 %v3222_v31, %v6058_v32 }
 0x36a   : > { %v2030_v18 = vpop.permute.xlu1 %2029  ;;  %v2062_v56 = vpop.permute.xlu0 %2061 }
 0x36e   : > { %v2158_v48 = vpop.permute.xlu1 %2157  ;;  %v2190_v19 = vpop.permute.xlu0 %2189 }
 0x36f   : > { %v2375_v36 = vsel %vm2367_vm0, %v2030_v18, %v2158_v48  ;;  %v2391_v60 = vsel %vm2367_vm0, %v2062_v56, %v2190_v19 }
 0x370   : > { %v2408_v40 = vsel %vm2400_vm1, %v2375_v36, %v1830_v41  ;;  %v2424_v29 = vsel %vm2400_vm1, %v2391_v60, %v1846_v20  ;;  %v3223_v20 = vld [vmem:[%s4174_s16 + $0x50] sm:$0xff] }
 0x372   : > { %v2284_v12 = vpop.permute.xlu1 %2283  ;;  %v2316_v11 = vpop.permute.xlu0 %2315 }
 0x373   : > { %v2440_v23 = vsel %vm2433_vm2, %v2407_v47, %v2284_v12  ;;  %v2456_v2 = vsel %vm2433_vm2, %v2423_v34, %v2316_v11 }
 0x374   : > { %3084 = vmatprep.mubr.msk.f32.mxu0 %vm2506_vm3, %v2440_v23  ;;  %3108 = vmatprep.mubr.msk.f32.mxu1 %vm2506_vm3, %v2456_v2 }
 0x376   : > { %v2286_v14 = vpop.permute.xlu1 %2285  ;;  %v2318_v24 = vpop.permute.xlu0 %2317 }
 0x377   : > { %v2441_v62 = vsel %vm2433_vm2, %v2408_v40, %v2286_v14  ;;  %v2457_v37 = vsel %vm2433_vm2, %v2424_v29, %v2318_v24  ;;  %v1833_v40 = vmul.f32 %v3223_v20, %v5200_v33  ;;  %v3224_v14 = vld [vmem:[%s4174_s16 + $0xd0] sm:$0xff]  ;;  %v3225_v33 = vld [vmem:[%s4174_s16 + $0x58] sm:$0xff] }
 0x378   : > { %3085 = vmatmul.mubr.msk.f32.gmra.mrb[6].mxu0 %vm2506_vm3, %v2441_v62  ;;  %3109 = vmatmul.mubr.msk.f32.gmra.mrb[6].mxu1 %vm2506_vm3, %v2457_v37  ;;  %v1849_v29 = vmul.f32 %v3224_v14, %v5203_v39  ;;  %v3226_v39 = vld [vmem:[%s4174_s16 + $0xd8] sm:$0xff] }
 0x37a   : > { %v2032_v58 = vpop.permute.xlu1 %2031  ;;  %v2064_v61 = vpop.permute.xlu0 %2063 }
 0x37e   : > { %v2160_v21 = vpop.permute.xlu1 %2159  ;;  %v2192_v43 = vpop.permute.xlu0 %2191 }
 0x37f   : > { %v2376_v10 = vsel %vm2367_vm0, %v2032_v58, %v2160_v21  ;;  %v2392_v27 = vsel %vm2367_vm0, %v2064_v61, %v2192_v43 }
 0x380   : > { %v2409_v5 = vsel %vm2400_vm1, %v2376_v10, %v1831_v35  ;;  %v2425_v30 = vsel %vm2400_vm1, %v2392_v27, %v1847_v54 }
 0x382   : > { %v2034_v22 = vpop.permute.xlu1 %2033  ;;  %v2066_v0 = vpop.permute.xlu0 %2065 }
 0x386   : > { %v2162_v16 = vpop.permute.xlu1 %2161  ;;  %v2194_v46 = vpop.permute.xlu0 %2193 }
 0x387   : > { %v2377_v56 = vsel %vm2367_vm0, %v2034_v22, %v2162_v16  ;;  %v2393_v48 = vsel %vm2367_vm0, %v2066_v0, %v2194_v46  ;;  %v1834_v0 = vmul.f32 %v3225_v33, %v5222_v49  ;;  %v1850_v16 = vmul.f32 %v3226_v39, %v5225_v6 }
 0x388   : > { %v2410_v9 = vsel %vm2400_vm1, %v2377_v56, %v1832_v25  ;;  %v2426_v47 = vsel %vm2400_vm1, %v2393_v48, %v1848_v8  ;;  %v3227_v48 = vld [vmem:[%s4174_s16 + $0x60] sm:$0xff] }
 0x38a   : > { %v2288_v57 = vpop.permute.xlu1 %2287  ;;  %v2320_v18 = vpop.permute.xlu0 %2319 }
 0x38b   : > { %v2442_v19 = vsel %vm2433_vm2, %v2409_v5, %v2288_v57  ;;  %v2458_v63 = vsel %vm2433_vm2, %v2425_v30, %v2320_v18 }
 0x38c   : > { %3087 = vmatprep.mubr.msk.f32.mxu0 %vm2506_vm3, %v2442_v19  ;;  %3111 = vmatprep.mubr.msk.f32.mxu1 %vm2506_vm3, %v2458_v63  ;;  %v1835_v19 = vmul.f32 %v3227_v48, %v5286_v1  ;;  %v3228_v63 = vld [vmem:[%s4174_s16 + $0xe0] sm:$0xff]  ;;  %v3229_v1 = vld [vmem:[%s4174_s16 + $0x68] sm:$0xff] }
 0x38d   : > { %v1851_v38 = vmul.f32 %v3228_v63, %v5293_v59  ;;  %v3230_v59 = vld [vmem:[%s4174_s16 + $0xe8] sm:$0xff] }
 0x38e   : > { %v2290_v50 = vpop.permute.xlu1 %2289  ;;  %v2322_v12 = vpop.permute.xlu0 %2321 }
 0x38f   : > { %v2443_v34 = vsel %vm2433_vm2, %v2410_v9, %v2290_v50  ;;  %v2459_v11 = vsel %vm2433_vm2, %v2426_v47, %v2322_v12 }
 0x390   : > { %3088 = vmatmul.mubr.msk.f32.gmra.mrb[8].mxu0 %vm2506_vm3, %v2443_v34  ;;  %3112 = vmatmul.mubr.msk.f32.gmra.mrb[8].mxu1 %vm2506_vm3, %v2459_v11  ;;  %v1836_v34 = vmul.f32 %v3229_v1, %v5310_v13  ;;  %v1852_v11 = vmul.f32 %v3230_v59, %v5315_v55 }
 0x392   : > { %v2036_v15 = vpop.permute.xlu1 %2035  ;;  %v2068_v36 = vpop.permute.xlu0 %2067 }
 0x396   : > { %v2164_v60 = vpop.permute.xlu1 %2163  ;;  %v2196_v23 = vpop.permute.xlu0 %2195 }
 0x397   : > { %v2378_v41 = vsel %vm2367_vm0, %v2036_v15, %v2164_v60  ;;  %v2394_v53 = vsel %vm2367_vm0, %v2068_v36, %v2196_v23 }
 0x398   : > { %v2411_v24 = vsel %vm2400_vm1, %v2378_v41, %v1833_v40  ;;  %v2427_v61 = vsel %vm2400_vm1, %v2394_v53, %v1849_v29 }
 0x39a   : > { %v2038_v2 = vpop.permute.xlu1 %2037  ;;  %v2070_v7 = vpop.permute.xlu0 %2069 }
 0x39e   : > { %v2166_v28 = vpop.permute.xlu1 %2165 }
 0x39f   : > { %v2198_v17 = vpop.permute.xlu0 %2197  ;;  %v2379_v37 = vsel %vm2367_vm0, %v2038_v2, %v2166_v28 }
 0x3a0   : > { %v2395_v43 = vsel %vm2367_vm0, %v2070_v7, %v2198_v17  ;;  %v2412_v46 = vsel %vm2400_vm1, %v2379_v37, %v1834_v0  ;;  %v3232_v37 = vld [vmem:[%s4174_s16 + $0xf0] sm:$0xff] }
 0x3a1   : > { %v2428_v44 = vsel %vm2400_vm1, %v2395_v43, %v1850_v16 }
 0x3a2   : > { %v2292_v62 = vpop.permute.xlu1 %2291 }
 0x3a3   : > { %v2444_v58 = vsel %vm2433_vm2, %v2411_v24, %v2292_v62  ;;  %v2324_v21 = vpop.permute.xlu0 %2323  ;;  %v3231_v24 = vld [vmem:[%s4174_s16 + $0x70] sm:$0xff] }
 0x3a4   : > { %v2460_v22 = vsel %vm2433_vm2, %v2427_v61, %v2324_v21  ;;  %3090 = vmatprep.mubr.msk.f32.mxu0 %vm2506_vm3, %v2444_v58  ;;  %v1837_v62 = vmul.f32 %v3231_v24, %v5374_v45  ;;  %v1853_v58 = vmul.f32 %v3232_v37, %v5381_v4  ;;  %v3233_v45 = vld [vmem:[%s4174_s16 + $0x78] sm:$0xff] }
 0x3a5   : > { %3114 = vmatprep.mubr.msk.f32.mxu1 %vm2506_vm3, %v2460_v22  ;;  %v1838_v4 = vmul.f32 %v3233_v45, %v5398_v42 }
 0x3a6   : > { %v2294_v10 = vpop.permute.xlu1 %2293 }
 0x3a7   : > { %v2445_v27 = vsel %vm2433_vm2, %v2412_v46, %v2294_v10  ;;  %v2326_v26 = vpop.permute.xlu0 %2325  ;;  %v3234_v46 = vld [vmem:[%s4174_s16 + $0xf8] sm:$0xff]  ;;  %s5582_s16 = scalar_lea.vmem %s5717_s2, %s3393_s7  ;;  %s5590_s7 = scalar_lea.vmem [#allocation2], %s2970_s12 }
 0x3a8   : > { %v2461_v35 = vsel %vm2433_vm2, %v2428_v44, %v2326_v26  ;;  %3091 = vmatmul.mubr.msk.f32.gmra.mrb[10].mxu0 %vm2506_vm3, %v2445_v27  ;;  %v1854_v10 = vmul.f32 %v3234_v46, %v5403_v51  ;;  %v2475_v42 = vld [vmem:[%s5582_s16 + $0x8] sm:$0xff]  ;;  %v2477_v63 = vld [vmem:[%s5582_s16 + $0x18] sm:$0xff] }
 0x3a9   : > { %3115 = vmatmul.mubr.msk.f32.gmra.mrb[10].mxu1 %vm2506_vm3, %v2461_v35  ;;  %v2491_v51 = vld [vmem:[%s5582_s16 + $0x88] sm:$0xff] }
 0x3aa   : > { %v2040_v49 = vpop.permute.xlu1 %2039  ;;  %v2479_v59 = vld [vmem:[%s5582_s16 + $0x28] sm:$0xff] }
 0x3ab   : > { %v2072_v52 = vpop.permute.xlu0 %2071 }
 0x3ae   : > { %v2168_v3 = vpop.permute.xlu1 %2167 }
 0x3af   : > { %v2200_v6 = vpop.permute.xlu0 %2199  ;;  %v2380_v30 = vsel %vm2367_vm0, %v2040_v49, %v2168_v3  ;;  %v2474_v3 = vld [vmem:[%s5582_s16] sm:$0xff] }
 0x3b0   : > { %v2396_v56 = vsel %vm2367_vm0, %v2072_v52, %v2200_v6  ;;  %v2413_v25 = vsel %vm2400_vm1, %v2380_v30, %v1835_v19 }
 0x3b1   : > { %v2429_v9 = vsel %vm2400_vm1, %v2396_v56, %v1851_v38  ;;  %v2493_v38 = vld [vmem:[%s5582_s16 + $0x98] sm:$0xff] }
 0x3b2   : > { %v2042_v54 = vpop.permute.xlu1 %2041 }
 0x3b3   : > { %v2074_v5 = vpop.permute.xlu0 %2073 }
 0x3b6   : > { %v2170_v57 = vpop.permute.xlu1 %2169 }
 0x3b7   : > { %v2202_v18 = vpop.permute.xlu0 %2201  ;;  %v2381_v32 = vsel %vm2367_vm0, %v2042_v54, %v2170_v57  ;;  %v2490_v54 = vld [vmem:[%s5582_s16 + $0x80] sm:$0xff] }
 0x3b8   : > { %v2397_v47 = vsel %vm2367_vm0, %v2074_v5, %v2202_v18  ;;  %v2414_v15 = vsel %vm2400_vm1, %v2381_v32, %v1836_v34  ;;  %v2492_v32 = vld [vmem:[%s5582_s16 + $0x90] sm:$0xff] }
 0x3b9   : > { %v2430_v23 = vsel %vm2400_vm1, %v2397_v47, %v1852_v11  ;;  %v2495_v11 = vld [vmem:[%s5582_s16 + $0xa8] sm:$0xff] }
 0x3ba   : > { %v2296_v31 = vpop.permute.xlu1 %2295 }
 0x3bb   : > { %v2446_v8 = vsel %vm2433_vm2, %v2413_v25, %v2296_v31  ;;  %v2328_v50 = vpop.permute.xlu0 %2327  ;;  %v2476_v25 = vld [vmem:[%s5582_s16 + $0x10] sm:$0xff] }
 0x3bc   : > { %v2462_v12 = vsel %vm2433_vm2, %v2429_v9, %v2328_v50  ;;  %3093 = vmatprep.mubr.msk.f32.mxu0 %vm2506_vm3, %v2446_v8 }
 0x3bd   : > { %3117 = vmatprep.mubr.msk.f32.mxu1 %vm2506_vm3, %v2462_v12 }
 0x3be   : > { %v2298_v36 = vpop.permute.xlu1 %2297 }
 0x3bf   : > { %v2447_v60 = vsel %vm2433_vm2, %v2414_v15, %v2298_v36  ;;  %v2330_v2 = vpop.permute.xlu0 %2329  ;;  %v2478_v15 = vld [vmem:[%s5582_s16 + $0x20] sm:$0xff] }
 0x3c0   : > { %v2463_v7 = vsel %vm2433_vm2, %v2430_v23, %v2330_v2  ;;  %3094 = vmatmul.mubr.msk.f32.gmra.mrb[12].mxu0 %vm2506_vm3, %v2447_v60  ;;  %v2494_v60 = vld [vmem:[%s5582_s16 + $0xa0] sm:$0xff] }
 0x3c1   : > { %3118 = vmatmul.mubr.msk.f32.gmra.mrb[12].mxu1 %vm2506_vm3, %v2463_v7 }
 0x3c2   : > { %v2044_v13 = vpop.permute.xlu1 %2043 }
 0x3c3   : > { %v2076_v28 = vpop.permute.xlu0 %2075 }
 0x3c6   : > { %v2172_v41 = vpop.permute.xlu1 %2171 }
 0x3c7   : > { %v2204_v55 = vpop.permute.xlu0 %2203  ;;  %v2382_v40 = vsel %vm2367_vm0, %v2044_v13, %v2172_v41 }
 0x3c8   : > { %v2398_v29 = vsel %vm2367_vm0, %v2076_v28, %v2204_v55  ;;  %v2415_v61 = vsel %vm2400_vm1, %v2382_v40, %v1837_v62  ;;  %v2496_v40 = vld [vmem:[%s5582_s16 + $0xb0] sm:$0xff] }
 0x3c9   : > { %v2431_v33 = vsel %vm2400_vm1, %v2398_v29, %v1853_v58 }
 0x3ca   : > { %v2046_v17 = vpop.permute.xlu1 %2045 }
 0x3cb   : > { %v2078_v53 = vpop.permute.xlu0 %2077 }
 0x3ce   : > { %v2174_v20 = vpop.permute.xlu1 %2173 }
 0x3cf   : > { %v2206_v14 = vpop.permute.xlu0 %2205  ;;  %v2383_v43 = vsel %vm2367_vm0, %v2046_v17, %v2174_v20  ;;  %v2481_v17 = vld [vmem:[%s5582_s16 + $0x38] sm:$0xff]  ;;  %v2480_v20 = vld [vmem:[%s5582_s16 + $0x30] sm:$0xff] }
 0x3d0   : > { %v2399_v39 = vsel %vm2367_vm0, %v2078_v53, %v2206_v14  ;;  %v2416_v27 = vsel %vm2400_vm1, %v2383_v43, %v1838_v4  ;;  %v2497_v53 = vld [vmem:[%s5582_s16 + $0xb8] sm:$0xff]  ;;  %v2483_v43 = vld [vmem:[%s5582_s16 + $0x48] sm:$0xff] }
 0x3d1   : > { %v2432_v35 = vsel %vm2400_vm1, %v2399_v39, %v1854_v10 }
 0x3d2   : > { %v2300_v21 = vpop.permute.xlu1 %2299 }
 0x3d3   : > { %v2448_v22 = vsel %vm2433_vm2, %v2415_v61, %v2300_v21  ;;  %v2332_v0 = vpop.permute.xlu0 %2331 }
 0x3d4   : > { %v2464_v16 = vsel %vm2433_vm2, %v2431_v33, %v2332_v0  ;;  %3096 = vmatprep.mubr.msk.f32.mxu0 %vm2506_vm3, %v2448_v22  ;;  %v2499_v22 = vld [vmem:[%s5582_s16 + $0xc8] sm:$0xff]  ;;  %v2482_v33 = vld [vmem:[%s5582_s16 + $0x40] sm:$0xff] }
 0x3d5   : > { %3120 = vmatprep.mubr.msk.f32.mxu1 %vm2506_vm3, %v2464_v16  ;;  %v2498_v0 = vld [vmem:[%s5582_s16 + $0xc0] sm:$0xff] }
 0x3d6   : > { %v2302_v44 = vpop.permute.xlu1 %2301 }
 0x3d7   : > { %v2449_v26 = vsel %vm2433_vm2, %v2416_v27, %v2302_v44  ;;  %v2334_v49 = vpop.permute.xlu0 %2333 }
 0x3d8   : > { %v2465_v52 = vsel %vm2433_vm2, %v2432_v35, %v2334_v49  ;;  %3097 = vmatmul.mubr.msk.f32.gmra.mrb[14].mxu0 %vm2506_vm3, %v2449_v26  ;;  %v2485_v26 = vld [vmem:[%s5582_s16 + $0x58] sm:$0xff]  ;;  %v2484_v49 = vld [vmem:[%s5582_s16 + $0x50] sm:$0xff] }
 0x3d9   : > { %3121 = vmatmul.mubr.msk.f32.gmra.mrb[14].mxu1 %vm2506_vm3, %v2465_v52  ;;  %v2501_v35 = vld [vmem:[%s5582_s16 + $0xd8] sm:$0xff] }
 0x403   : > { %v3077_v6 = vpop.f32.mrb[0].mxu0 }
 0x404   : > { %v2675_v5 = vadd.f32 %v3077_v6, %v2475_v42  ;;  %v3101_v57 = vpop.f32.mrb[0].mxu1  ;;  %v2669_v30 = vpop.f32.mrb[1].mxu0  ;;  %v2500_v42 = vld [vmem:[%s5582_s16 + $0xd0] sm:$0xff] }
 0x405   : > { %v2755_v18 = vadd.f32 %v3101_v57, %v2491_v51  ;;  %v2670_v56 = vadd.f32 %v2669_v30, %v2474_v3  ;;  %v2749_v48 = vpop.f32.mrb[1].mxu1 }
 0x406   : > { %2829 = vst [vmem:[%s5590_s7 + $0x8] sm:$0xff] %v2675_v5  ;;  %v2750_v19 = vadd.f32 %v2749_v48, %v2490_v54  ;;  %v2486_v48 = vld [vmem:[%s5582_s16 + $0x60] sm:$0xff] }
 0x407   : > { %2845 = vst [vmem:[%s5590_s7 + $0x88] sm:$0xff] %v2755_v18  ;;  %2828 = vst [vmem:[%s5590_s7] sm:$0xff] %v2670_v56  ;;  %v2487_v18 = vld [vmem:[%s5582_s16 + $0x68] sm:$0xff] }
 0x408   : > { %2844 = vst [vmem:[%s5590_s7 + $0x80] sm:$0xff] %v2750_v19  ;;  %v2503_v56 = vld [vmem:[%s5582_s16 + $0xe8] sm:$0xff] }
 0x41b   : > { %v3080_v31 = vpop.f32.mrb[2].mxu0 }
 0x41c   : > { %v2685_v8 = vadd.f32 %v3080_v31, %v2477_v63  ;;  %v3104_v9 = vpop.f32.mrb[2].mxu1  ;;  %v2679_v50 = vpop.f32.mrb[3].mxu0  ;;  %v2502_v63 = vld [vmem:[%s5582_s16 + $0xe0] sm:$0xff] }
 0x41d   : > { %v2765_v47 = vadd.f32 %v3104_v9, %v2493_v38  ;;  %v2680_v12 = vadd.f32 %v2679_v50, %v2476_v25  ;;  %v2759_v1 = vpop.f32.mrb[3].mxu1 }
 0x41e   : > { %2831 = vst [vmem:[%s5590_s7 + $0x18] sm:$0xff] %v2685_v8  ;;  %v2760_v34 = vadd.f32 %v2759_v1, %v2492_v32  ;;  %v2488_v1 = vld [vmem:[%s5582_s16 + $0x70] sm:$0xff] }
 0x41f   : > { %2847 = vst [vmem:[%s5590_s7 + $0x98] sm:$0xff] %v2765_v47  ;;  %2830 = vst [vmem:[%s5590_s7 + $0x10] sm:$0xff] %v2680_v12  ;;  %v2489_v47 = vld [vmem:[%s5582_s16 + $0x78] sm:$0xff] }
 0x420   : > { %2846 = vst [vmem:[%s5590_s7 + $0x90] sm:$0xff] %v2760_v34  ;;  %v2505_v12 = vld [vmem:[%s5582_s16 + $0xf8] sm:$0xff] }
 0x433   : > { %v3083_v36 = vpop.f32.mrb[4].mxu0 }
 0x434   : > { %v2695_v23 = vadd.f32 %v3083_v36, %v2479_v59  ;;  %v3107_v2 = vpop.f32.mrb[4].mxu1  ;;  %v2689_v7 = vpop.f32.mrb[5].mxu0  ;;  %v2504_v59 = vld [vmem:[%s5582_s16 + $0xf0] sm:$0xff] }
 0x435   : > { %v2775_v13 = vadd.f32 %v3107_v2, %v2495_v11  ;;  %v2690_v28 = vadd.f32 %v2689_v7, %v2478_v15  ;;  %v2769_v41 = vpop.f32.mrb[5].mxu1 }
 0x436   : > { %2833 = vst [vmem:[%s5590_s7 + $0x28] sm:$0xff] %v2695_v23  ;;  %v2770_v55 = vadd.f32 %v2769_v41, %v2494_v60 }
 0x437   : > { %2849 = vst [vmem:[%s5590_s7 + $0xa8] sm:$0xff] %v2775_v13  ;;  %2832 = vst [vmem:[%s5590_s7 + $0x20] sm:$0xff] %v2690_v28 }
 0x438   : > { %2848 = vst [vmem:[%s5590_s7 + $0xa0] sm:$0xff] %v2770_v55 }
 0x44b   : > { %v3086_v14 = vpop.f32.mrb[6].mxu0  ;;  %v3110_v29 = vpop.f32.mrb[6].mxu1 }
 0x44c   : > { %v2705_v24 = vadd.f32 %v3086_v14, %v2481_v17  ;;  %v2785_v62 = vadd.f32 %v3110_v29, %v2497_v53  ;;  %v2699_v37 = vpop.f32.mrb[7].mxu0  ;;  %v2779_v58 = vpop.f32.mrb[7].mxu1 }
 0x44d   : > { %v2700_v61 = vadd.f32 %v2699_v37, %v2480_v20  ;;  %v2780_v21 = vadd.f32 %v2779_v58, %v2496_v40 }
 0x44e   : > { %2835 = vst [vmem:[%s5590_s7 + $0x38] sm:$0xff] %v2705_v24  ;;  %2851 = vst [vmem:[%s5590_s7 + $0xb8] sm:$0xff] %v2785_v62 }
 0x44f   : > { %2834 = vst [vmem:[%s5590_s7 + $0x30] sm:$0xff] %v2700_v61  ;;  %2850 = vst [vmem:[%s5590_s7 + $0xb0] sm:$0xff] %v2780_v21 }
 0x463   : > { %v3089_v39 = vpop.f32.mrb[8].mxu0  ;;  %v3113_v16 = vpop.f32.mrb[8].mxu1 }
 0x464   : > { %v2715_v45 = vadd.f32 %v3089_v39, %v2483_v43  ;;  %v2795_v4 = vadd.f32 %v3113_v16, %v2499_v22  ;;  %v2709_v46 = vpop.f32.mrb[9].mxu0  ;;  %v2789_v10 = vpop.f32.mrb[9].mxu1 }
 0x465   : > { %v2710_v27 = vadd.f32 %v2709_v46, %v2482_v33  ;;  %v2790_v44 = vadd.f32 %v2789_v10, %v2498_v0 }
 0x466   : > { %2837 = vst [vmem:[%s5590_s7 + $0x48] sm:$0xff] %v2715_v45  ;;  %2853 = vst [vmem:[%s5590_s7 + $0xc8] sm:$0xff] %v2795_v4 }
 0x467   : > { %2836 = vst [vmem:[%s5590_s7 + $0x40] sm:$0xff] %v2710_v27  ;;  %2852 = vst [vmem:[%s5590_s7 + $0xc0] sm:$0xff] %v2790_v44 }
 0x47b   : > { %v3092_v52 = vpop.f32.mrb[10].mxu0 }
 0x47c   : > { %v2725_v51 = vadd.f32 %v3092_v52, %v2485_v26  ;;  %v3116_v3 = vpop.f32.mrb[10].mxu1  ;;  %v2719_v6 = vpop.f32.mrb[11].mxu0 }
 0x47d   : > { %v2805_v54 = vadd.f32 %v3116_v3, %v2501_v35  ;;  %v2720_v5 = vadd.f32 %v2719_v6, %v2484_v49  ;;  %v2799_v57 = vpop.f32.mrb[11].mxu1 }
 0x47e   : > { %2839 = vst [vmem:[%s5590_s7 + $0x58] sm:$0xff] %v2725_v51  ;;  %v2800_v30 = vadd.f32 %v2799_v57, %v2500_v42 }
 0x47f   : > { %2855 = vst [vmem:[%s5590_s7 + $0xd8] sm:$0xff] %v2805_v54  ;;  %2838 = vst [vmem:[%s5590_s7 + $0x50] sm:$0xff] %v2720_v5 }
 0x480   : > { %2854 = vst [vmem:[%s5590_s7 + $0xd0] sm:$0xff] %v2800_v30 }
 0x493   : > { %v3095_v19 = vpop.f32.mrb[12].mxu0 }
 0x494   : > { %v2735_v38 = vadd.f32 %v3095_v19, %v2487_v18  ;;  %v3119_v25 = vpop.f32.mrb[12].mxu1  ;;  %v2729_v31 = vpop.f32.mrb[13].mxu0 }
 0x495   : > { %v2815_v32 = vadd.f32 %v3119_v25, %v2503_v56  ;;  %v2730_v8 = vadd.f32 %v2729_v31, %v2486_v48  ;;  %v2809_v9 = vpop.f32.mrb[13].mxu1 }
 0x496   : > { %2841 = vst [vmem:[%s5590_s7 + $0x68] sm:$0xff] %v2735_v38  ;;  %v2810_v50 = vadd.f32 %v2809_v9, %v2502_v63 }
 0x497   : > { %2857 = vst [vmem:[%s5590_s7 + $0xe8] sm:$0xff] %v2815_v32  ;;  %2840 = vst [vmem:[%s5590_s7 + $0x60] sm:$0xff] %v2730_v8 }
 0x498   : > { %2856 = vst [vmem:[%s5590_s7 + $0xe0] sm:$0xff] %v2810_v50 }
 0x4aa   : > { %2867 = sbr.rel (!%p3378_p5) target bundleno = 1229 (0x4cd), region = 44 }
 0x4ab   : > { %v3098_v34 = vpop.f32.mrb[14].mxu0 }
 0x4ac   : > { %v2745_v11 = vadd.f32 %v3098_v34, %v2489_v47  ;;  %v3122_v15 = vpop.f32.mrb[14].mxu1  ;;  %v2739_v36 = vpop.f32.mrb[15].mxu0 }
 0x4ad   : > { %v2825_v60 = vadd.f32 %v3122_v15, %v2505_v12  ;;  %v2740_v23 = vadd.f32 %v2739_v36, %v2488_v1  ;;  %v2819_v2 = vpop.f32.mrb[15].mxu1 }
 0x4ae   : > { %2843 = vst [vmem:[%s5590_s7 + $0x78] sm:$0xff] %v2745_v11  ;;  %v2820_v7 = vadd.f32 %v2819_v2, %v2504_v59 }
 0x4af   : > { %2859 = vst [vmem:[%s5590_s7 + $0xf8] sm:$0xff] %v2825_v60  ;;  %2842 = vst [vmem:[%s5590_s7 + $0x70] sm:$0xff] %v2740_v23 }
 0x4b0   : > { %2858 = vst [vmem:[%s5590_s7 + $0xf0] sm:$0xff] %v2820_v7 }
 0x4b1   : > { %s6064_s15 = smov (!%p2870_p11, %s2869_s15), 32 }
 0x4b2   : > { %s5659_s17 = sshll.u32 %s6064_s15, 7 }
 0x4b3   : > { %s2874_s25 = ssub.s32 4096, %s5659_s17 }
 0x4b4   : > { %2875 = vsyncadd %s5654_s14, %s2874_s25  ;;  %p3012_p12 = scmp.ne.s32.totalorder %s5659_s17, 0  ;;  %s3018_s26 = sshll.u32 %s3361_s22, 12 }
 0x4b5   : > { %s5668_s8 = scalar_lea.hbm %s5720_s5, %s3018_s26  ;;  %s2880_s30 = sshll.u32 %s5590_s7, 4  ;;  %s5671_s30 = int_to_ptr.vmem [resolvable:$true] %s2880_s30 }
 0x4b6   : > { %s3235_s9 = scalar_lea.vmem %s5671_s30, %s5659_s17  ;;  %s3307_s10 = smov [#allocation2]  }
 0x4b7   : > { %p3236_p13 = scmp.ne.s32.totalorder %s5671_s30, %s3235_s9  ;;  %s3239_s13 = sshll.u32 %s3307_s10, 4  ;;  %s3240_s13 = int_to_ptr.vmem [resolvable:$false] %s3239_s13 }
 0x4b8   : > { %s3241_s22 = scalar_lea.vmem %s3240_s13, 8192  ;;  %p3242_p2 = scmp.lt.s32.totalorder %s5671_s30, %s3240_s13 }
 0x4b9   : > { %p3237_p0 = pnand %p3236_p13, %p3012_p12  ;;  %p3243_p3 = scmp.lt.s32.totalorder %s3241_s22, %s3235_s9 }
 0x4bb   : > { %p3238_p1 = pneg %p3237_p0  ;;  %p3244_p4 = por %p3243_p3, %p3242_p2 }
 0x4bd   : > { %p3245_p5 = pnand %p3244_p4, %p3238_p1 }
 0x4bf   : > { %3248 = shalt.err (!%p3245_p5)
}
 0x4c0   : > { %s3249_s23 = scalar_lea.hbm %s5668_s8, %s5659_s17  ;;  %s3253_s12 = scalar_lea.hbm %s5720_s5, 8064 }
 0x4c1   : > { %p3250_p7 = scmp.ne.s32.totalorder %s5668_s8, %s3249_s23  ;;  %p3254_p10 = scmp.lt.u32.totalorder %s5668_s8, %s5720_s5 }
 0x4c2   : > { %p3255_p11 = scmp.lt.u32.totalorder %s3253_s12, %s3249_s23  ;;  %p3257_p0 = scmp.lt.u32.totalorder %s3249_s23, %s5668_s8 }
 0x4c3   : > { %p3251_p8 = pnand %p3250_p7, %p3012_p12 }
 0x4c4   : > { %p3256_p13 = por %p3255_p11, %p3254_p10 }
 0x4c5   : > { %p3252_p9 = pneg %p3251_p8 }
 0x4c6   : > { %p3258_p1 = por %p3257_p0, %p3256_p13 }
 0x4c8   : > { %p3259_p2 = pnand %p3258_p1, %p3252_p9 }
 0x4ca   : > { %3262 = shalt.err (!%p3259_p2)
}
 0x4cb   : > { %s3308_s25 = smov 128   ;;  %s3309_s26 = smov 8  }
 0x4cc   : > { %2886 = dma.vmem_to_hbm [thread:$0]  (%p3012_p12), %s5671_s30, %s5659_s17, %s5668_s8, %s5654_s14, %s3308_s25, %s3308_s25, %s3309_s26  }
 0x4cd PF: > { %p3152_p3 = scmp.ge.s32.totalorder %s3297_s21, 2  ;;  %s2895_s6 = sand.u32 1, %s3285_s18  }
 0x4ce   : > { %s2896_s28 = scalar_lea.sflag [#allocation3], %s2895_s6 }
 0x4cf   : > { %p3149_p4 = pnand %p3152_p3, %p3382_p6 }
 0x4d1   : > { %3280 = dma.done.wait (!%p3149_p4), %s2896_s28, 4096  }
 0x4d2   : > { %3282 = vsyncadd (!%p3149_p4), %s2896_s28, 4294963200  ;;  %p15_p5 = scmp.ge.s32.totalorder %s3365_s24, 4   ;;  %s6059_s18 = smov %s3289_s19 }
 0x4d3   : > { %s6060_s19 = smov %s3293_s20  ;;  %s6061_s20 = smov %s3376_s27 }
 0x4d4   : > { %s6062_s21 = smov %s3365_s24  ;;  %17 = sbr.rel (!%p15_p5) target bundleno = 3 (0x3), region = 81 }
 0x4db   :  { %2901 = vsyncpa [#allocation3], 1 }
 0x4dc   :  { %2903 = vsyncpa [#allocation3 + $0x1], 1 }

</bundles_post_ra>
